<compile_context>
chip_gen: v6e
topology: v6e:2x2x1
jax: 0.10.0
libtpu: 0.0.40
codegen_flags: <defaults>
</compile_context>

<pallas_src>
import jax
import jax.numpy as jnp
from jax.experimental import pallas as pl
from jax.experimental.pallas import tpu as pltpu

# Module hyper-parameters (exactly as the PyTorch file defines them).
HIDDEN_DIM = 256
HR_SIZE = 28
LR_SCALE = 2
LR_SIZE = HR_SIZE // LR_SCALE            # 14
INPUT_DIM = LR_SIZE * LR_SIZE            # 196
NUM_HIDDEN_LAYERS = 4
OUTPUT_DIM = HR_SIZE * HR_SIZE           # 784

IN_PAD = 256                             # 196 -> 2*128 (zero-padded features)


def _round_up(x, m):
    return ((x + m - 1) // m) * m


def _mlp_shared_head_kernel(x_ref, w_in_ref, b_in_ref, w_h_ref, b_h_ref,
                            w_out_ref, b_out_ref, out_ref):
    """One batch tile of the whole MLP with the shared head fused per layer.

    x_ref    : (TB, IN_PAD)                  bf16
    w_in_ref : (IN_PAD, HIDDEN_DIM)          bf16
    b_in_ref : (1, HIDDEN_DIM)               f32
    w_h_ref  : (L, HIDDEN_DIM, HIDDEN_DIM)   bf16
    b_h_ref  : (L, 1, HIDDEN_DIM)            f32
    w_out_ref: (HIDDEN_DIM, OUTPUT_DIM)      bf16
    b_out_ref: (1, OUTPUT_DIM)               f32
    out_ref  : (L+1, TB, OUTPUT_DIM)         bf16
    """
    w_out = w_out_ref[...]
    b_out = b_out_ref[...]

    # Input layer: bf16 MXU matmul, f32 accumulate, f32 bias + ReLU on the VPU.
    h = jnp.dot(x_ref[...], w_in_ref[...], preferred_element_type=jnp.float32)
    h = jnp.maximum(h + b_in_ref[...], 0.0)
    h_bf16 = h.astype(jnp.bfloat16)

    # Shared head on representation 0 (fused, no stacked temporary).
    o = jnp.dot(h_bf16, w_out, preferred_element_type=jnp.float32) + b_out
    out_ref[0] = o.astype(out_ref.dtype)

    # Hidden layers (static unrolled loop); shared head fused after each one.
    for i in range(NUM_HIDDEN_LAYERS):
        h = jnp.dot(h_bf16, w_h_ref[i], preferred_element_type=jnp.float32)
        h = jnp.maximum(h + b_h_ref[i], 0.0)
        h_bf16 = h.astype(jnp.bfloat16)
        o = jnp.dot(h_bf16, w_out, preferred_element_type=jnp.float32) + b_out
        out_ref[i + 1] = o.astype(out_ref.dtype)


def sr_mlp_shared_head(x, params, *, batch_tile=None, out_dtype=jnp.bfloat16):
    """x: (B, 1, LR_SIZE, LR_SIZE) or (B, INPUT_DIM).

    Returns the stacked outputs, shape (NUM_HIDDEN_LAYERS + 1, B, OUTPUT_DIM),
    i.e. out[k] == k-th entry of the PyTorch module's returned list.
    Output dtype defaults to bf16 (kernel is writeback bound); pass
    out_dtype=jnp.float32 if full precision storage is required.
    """
    b = x.shape[0]
    x2d = x.reshape(b, -1)                      # matches x.view(x.size(0), -1)
    assert x2d.shape[1] == INPUT_DIM
    L = NUM_HIDDEN_LAYERS

    # Batch tiling: sublane-aligned (multiple of 8); once the batch exceeds
    # 128 rows, force >= 2 grid steps (v7x megacore) and cap the tile at 512
    # rows (amortizes per-step overhead; bf16 output keeps VMEM ~10 MB/tile).
    b8 = _round_up(b, 8)
    if batch_tile is None:
        if b8 <= 128:
            tb = b8
        else:
            tb = min(512, _round_up(-(-b8 // 2), 8))
    else:
        tb = _round_up(batch_tile, 8)
    b_pad = _round_up(b8, tb)

    # Pad input: batch -> b_pad, features 196 -> 256; bf16 MXU operand.
    x_pad = jnp.pad(x2d.astype(jnp.bfloat16),
                    ((0, b_pad - b), (0, IN_PAD - INPUT_DIM)))

    # Weights: bf16 for the MXU, zero-padded where dims were padded. Biases f32.
    w_in = jnp.pad(params["w_in"].astype(jnp.bfloat16),
                   ((0, IN_PAD - INPUT_DIM), (0, 0)))
    b_in = params["b_in"].astype(jnp.float32).reshape(1, HIDDEN_DIM)
    w_h = params["w_h"].astype(jnp.bfloat16)
    b_h = params["b_h"].astype(jnp.float32).reshape(L, 1, HIDDEN_DIM)
    w_out = params["w_out"].astype(jnp.bfloat16)                 # (256, 784)
    b_out = params["b_out"].astype(jnp.float32).reshape(1, OUTPUT_DIM)

    grid = (b_pad // tb,)

    out = pl.pallas_call(
        _mlp_shared_head_kernel,
        out_shape=jax.ShapeDtypeStruct((L + 1, b_pad, OUTPUT_DIM), out_dtype),
        grid_spec=pltpu.PrefetchScalarGridSpec(
            num_scalar_prefetch=0,
            grid=grid,
            in_specs=[
                # x: tiled over batch.
                pl.BlockSpec((tb, IN_PAD), lambda i: (i, 0)),
                # Weights/biases: same block every grid step -> stay resident.
                pl.BlockSpec((IN_PAD, HIDDEN_DIM), lambda i: (0, 0)),
                pl.BlockSpec((1, HIDDEN_DIM), lambda i: (0, 0)),
                pl.BlockSpec((L, HIDDEN_DIM, HIDDEN_DIM), lambda i: (0, 0, 0)),
                pl.BlockSpec((L, 1, HIDDEN_DIM), lambda i: (0, 0, 0)),
                pl.BlockSpec((HIDDEN_DIM, OUTPUT_DIM), lambda i: (0, 0)),
                pl.BlockSpec((1, OUTPUT_DIM), lambda i: (0, 0)),
            ],
            out_specs=pl.BlockSpec((L + 1, tb, OUTPUT_DIM), lambda i: (0, i, 0)),
        ),
        compiler_params=pltpu.CompilerParams(
            # Batch axis is independent -> shards across both TCs on v7x.
            dimension_semantics=("parallel",),
        ),
    )(x_pad, w_in, b_in, w_h, b_h, w_out, b_out)

    # Only the (usually tiny) batch padding is sliced off; the lane dim is
    # already exactly OUTPUT_DIM, so no extra full-output copy is made.
    if b_pad != b:
        out = out[:, :b, :]
    return out


def sr_mlp_shared_head_list(x, params):
    """Same structure as the PyTorch module's return value (a Python list)."""
    out = sr_mlp_shared_head(x, params)
    return list(out)


def init_params(key):
    """Deterministic synthetic parameter init (same shapes as the nn.Module)."""
    ks = jax.random.split(key, 6)
    scale = 0.02
    w_in = scale * jax.random.normal(ks[0], (INPUT_DIM, HIDDEN_DIM), jnp.float32)
    b_in = scale * jax.random.normal(ks[1], (HIDDEN_DIM,), jnp.float32)
    w_h = scale * jax.random.normal(
        ks[2], (NUM_HIDDEN_LAYERS, HIDDEN_DIM, HIDDEN_DIM), jnp.float32)
    b_h = scale * jax.random.normal(
        ks[3], (NUM_HIDDEN_LAYERS, HIDDEN_DIM), jnp.float32)
    w_out = scale * jax.random.normal(ks[4], (HIDDEN_DIM, OUTPUT_DIM), jnp.float32)
    b_out = scale * jax.random.normal(ks[5], (OUTPUT_DIM,), jnp.float32)
    return dict(w_in=w_in, b_in=b_in, w_h=w_h, b_h=b_h, w_out=w_out, b_out=b_out)


def _reference(x, params):
    """Pure-JAX f32 reference for a sanity check (stacked)."""
    b = x.shape[0]
    h = x.reshape(b, -1).astype(jnp.float32)
    h = jnp.maximum(h @ params["w_in"] + params["b_in"], 0.0)
    outs = [h @ params["w_out"] + params["b_out"]]
    for i in range(NUM_HIDDEN_LAYERS):
        h = jnp.maximum(h @ params["w_h"][i] + params["b_h"][i], 0.0)
        outs.append(h @ params["w_out"] + params["b_out"])
    return jnp.stack(outs, axis=0)


if __name__ == "__main__":
    key = jax.random.PRNGKey(0)
    k_x, k_p = jax.random.split(key)

    batch = 4
    # Low-res input image, NCHW like PyTorch would provide: (B, 1, 14, 14).
    x = jax.random.normal(k_x, (batch, 1, LR_SIZE, LR_SIZE), jnp.float32)
    params = init_params(k_p)

    out = sr_mlp_shared_head(x, params)
    out = jax.block_until_ready(out)

    assert out.shape == (NUM_HIDDEN_LAYERS + 1, batch, OUTPUT_DIM)

    # Sanity check vs. pure-JAX f32 reference (bf16 matmul operands + bf16
    # output storage, f32 accumulation).
    ref = _reference(x, params)
    err = jnp.max(jnp.abs(out.astype(jnp.float32) - ref))
    assert jnp.allclose(out.astype(jnp.float32), ref, atol=2e-2, rtol=2e-2), float(err)

    print("KERNEL_OK")
</pallas_src>

<mosaic_0001>
module attributes {stable_mosaic.version = 11 : i64} {
  func.func @_mlp_shared_head_kernel(%arg0: i32, %arg1: memref<8x256xbf16, #tpu.memory_space<vmem>>, %arg2: memref<256x256xbf16, #tpu.memory_space<vmem>>, %arg3: memref<1x256xf32, #tpu.memory_space<vmem>>, %arg4: memref<4x256x256xbf16, #tpu.memory_space<vmem>>, %arg5: memref<4x1x256xf32, #tpu.memory_space<vmem>>, %arg6: memref<256x784xbf16, #tpu.memory_space<vmem>>, %arg7: memref<1x784xf32, #tpu.memory_space<vmem>>, %arg8: memref<5x8x784xbf16, #tpu.memory_space<vmem>>) attributes {dimension_semantics = [#tpu.dimension_semantics<parallel>], iteration_bounds = array<i64: 1>, scalar_prefetch = 0 : i64, scratch_operands = 0 : i64, tpu.core_type = #tpu.core_type<tc>, window_params = [{transform_indices = @transform_0, window_bounds = array<i64: 8, 256>}, {pipeline_mode = #tpu.pipeline_mode<synchronous>, transform_indices = @transform_1, window_bounds = array<i64: 256, 256>}, {pipeline_mode = #tpu.pipeline_mode<synchronous>, transform_indices = @transform_2, window_bounds = array<i64: 1, 256>}, {pipeline_mode = #tpu.pipeline_mode<synchronous>, transform_indices = @transform_3, window_bounds = array<i64: 4, 256, 256>}, {pipeline_mode = #tpu.pipeline_mode<synchronous>, transform_indices = @transform_4, window_bounds = array<i64: 4, 1, 256>}, {pipeline_mode = #tpu.pipeline_mode<synchronous>, transform_indices = @transform_5, window_bounds = array<i64: 256, 784>}, {pipeline_mode = #tpu.pipeline_mode<synchronous>, transform_indices = @transform_6, window_bounds = array<i64: 1, 784>}, {transform_indices = @transform_7, window_bounds = array<i64: 5, 8, 784>}]} {
    %c0 = arith.constant 0 : index
    %c0_0 = arith.constant 0 : index
    %0 = vector.load %arg6[%c0, %c0_0] : memref<256x784xbf16, #tpu.memory_space<vmem>>, vector<256x784xbf16>
    %c0_1 = arith.constant 0 : index
    %c0_2 = arith.constant 0 : index
    %1 = vector.load %arg7[%c0_1, %c0_2] : memref<1x784xf32, #tpu.memory_space<vmem>>, vector<1x784xf32>
    %c0_3 = arith.constant 0 : index
    %c0_4 = arith.constant 0 : index
    %2 = vector.load %arg1[%c0_3, %c0_4] : memref<8x256xbf16, #tpu.memory_space<vmem>>, vector<8x256xbf16>
    %c0_5 = arith.constant 0 : index
    %c0_6 = arith.constant 0 : index
    %3 = vector.load %arg2[%c0_5, %c0_6] : memref<256x256xbf16, #tpu.memory_space<vmem>>, vector<256x256xbf16>
    %cst = arith.constant dense<0.000000e+00> : vector<8x256xf32>
    %4 = tpu.matmul %2, %3, %cst {dimension_numbers = #tpu.dot_dimension_numbers<[1], [0], [0], [1], [0, 0, 1, 1], [], []>} : vector<8x256xbf16>, vector<256x256xbf16>, vector<8x256xf32> -> vector<8x256xf32>
    %c0_7 = arith.constant 0 : index
    %c0_8 = arith.constant 0 : index
    %5 = vector.load %arg3[%c0_7, %c0_8] : memref<1x256xf32, #tpu.memory_space<vmem>>, vector<1x256xf32>
    %6 = vector.broadcast %5 : vector<1x256xf32> to vector<8x256xf32>
    %7 = arith.addf %4, %6 : vector<8x256xf32>
    %cst_9 = arith.constant 0.000000e+00 : f32
    %8 = vector.broadcast %cst_9 : f32 to vector<8x256xf32>
    %9 = arith.maximumf %7, %8 : vector<8x256xf32>
    %10 = arith.truncf %9 : vector<8x256xf32> to vector<8x256xbf16>
    %cst_10 = arith.constant dense<0.000000e+00> : vector<8x784xf32>
    %11 = tpu.matmul %10, %0, %cst_10 {dimension_numbers = #tpu.dot_dimension_numbers<[1], [0], [0], [1], [0, 0, 1, 1], [], []>} : vector<8x256xbf16>, vector<256x784xbf16>, vector<8x784xf32> -> vector<8x784xf32>
    %12 = vector.broadcast %1 : vector<1x784xf32> to vector<8x784xf32>
    %13 = arith.addf %11, %12 : vector<8x784xf32>
    %14 = arith.truncf %13 : vector<8x784xf32> to vector<8x784xbf16>
    %c0_11 = arith.constant 0 : index
    %c0_12 = arith.constant 0 : index
    %c0_13 = arith.constant 0 : index
    %15 = vector.load %arg8[%c0_11, %c0_12, %c0_13] : memref<5x8x784xbf16, #tpu.memory_space<vmem>>, vector<1x8x784xbf16>
    %16 = vector.shape_cast %15 : vector<1x8x784xbf16> to vector<8x784xbf16>
    %17 = vector.shape_cast %14 : vector<8x784xbf16> to vector<1x8x784xbf16>
    tpu.vector_store %arg8[%c0_11, %c0_12, %c0_13], %17 {strides = array<i32>} : memref<5x8x784xbf16, #tpu.memory_space<vmem>>, vector<1x8x784xbf16>,
    %c0_14 = arith.constant 0 : index
    %c0_15 = arith.constant 0 : index
    %c0_16 = arith.constant 0 : index
    %18 = vector.load %arg4[%c0_14, %c0_15, %c0_16] : memref<4x256x256xbf16, #tpu.memory_space<vmem>>, vector<1x256x256xbf16>
    %19 = vector.shape_cast %18 : vector<1x256x256xbf16> to vector<256x256xbf16>
    %cst_17 = arith.constant dense<0.000000e+00> : vector<8x256xf32>
    %20 = tpu.matmul %10, %19, %cst_17 {dimension_numbers = #tpu.dot_dimension_numbers<[1], [0], [0], [1], [0, 0, 1, 1], [], []>} : vector<8x256xbf16>, vector<256x256xbf16>, vector<8x256xf32> -> vector<8x256xf32>
    %c0_18 = arith.constant 0 : index
    %c0_19 = arith.constant 0 : index
    %c0_20 = arith.constant 0 : index
    %21 = vector.load %arg5[%c0_18, %c0_19, %c0_20] : memref<4x1x256xf32, #tpu.memory_space<vmem>>, vector<1x1x256xf32>
    %22 = vector.shape_cast %21 : vector<1x1x256xf32> to vector<1x256xf32>
    %23 = vector.broadcast %22 : vector<1x256xf32> to vector<8x256xf32>
    %24 = arith.addf %20, %23 : vector<8x256xf32>
    %cst_21 = arith.constant 0.000000e+00 : f32
    %25 = vector.broadcast %cst_21 : f32 to vector<8x256xf32>
    %26 = arith.maximumf %24, %25 : vector<8x256xf32>
    %27 = arith.truncf %26 : vector<8x256xf32> to vector<8x256xbf16>
    %cst_22 = arith.constant dense<0.000000e+00> : vector<8x784xf32>
    %28 = tpu.matmul %27, %0, %cst_22 {dimension_numbers = #tpu.dot_dimension_numbers<[1], [0], [0], [1], [0, 0, 1, 1], [], []>} : vector<8x256xbf16>, vector<256x784xbf16>, vector<8x784xf32> -> vector<8x784xf32>
    %29 = vector.broadcast %1 : vector<1x784xf32> to vector<8x784xf32>
    %30 = arith.addf %28, %29 : vector<8x784xf32>
    %31 = arith.truncf %30 : vector<8x784xf32> to vector<8x784xbf16>
    %c1 = arith.constant 1 : index
    %c0_23 = arith.constant 0 : index
    %c0_24 = arith.constant 0 : index
    %32 = vector.load %arg8[%c1, %c0_23, %c0_24] : memref<5x8x784xbf16, #tpu.memory_space<vmem>>, vector<1x8x784xbf16>
    %33 = vector.shape_cast %32 : vector<1x8x784xbf16> to vector<8x784xbf16>
    %34 = vector.shape_cast %31 : vector<8x784xbf16> to vector<1x8x784xbf16>
    tpu.vector_store %arg8[%c1, %c0_23, %c0_24], %34 {strides = array<i32>} : memref<5x8x784xbf16, #tpu.memory_space<vmem>>, vector<1x8x784xbf16>,
    %c1_25 = arith.constant 1 : index
    %c0_26 = arith.constant 0 : index
    %c0_27 = arith.constant 0 : index
    %35 = vector.load %arg4[%c1_25, %c0_26, %c0_27] : memref<4x256x256xbf16, #tpu.memory_space<vmem>>, vector<1x256x256xbf16>
    %36 = vector.shape_cast %35 : vector<1x256x256xbf16> to vector<256x256xbf16>
    %cst_28 = arith.constant dense<0.000000e+00> : vector<8x256xf32>
    %37 = tpu.matmul %27, %36, %cst_28 {dimension_numbers = #tpu.dot_dimension_numbers<[1], [0], [0], [1], [0, 0, 1, 1], [], []>} : vector<8x256xbf16>, vector<256x256xbf16>, vector<8x256xf32> -> vector<8x256xf32>
    %c1_29 = arith.constant 1 : index
    %c0_30 = arith.constant 0 : index
    %c0_31 = arith.constant 0 : index
    %38 = vector.load %arg5[%c1_29, %c0_30, %c0_31] : memref<4x1x256xf32, #tpu.memory_space<vmem>>, vector<1x1x256xf32>
    %39 = vector.shape_cast %38 : vector<1x1x256xf32> to vector<1x256xf32>
    %40 = vector.broadcast %39 : vector<1x256xf32> to vector<8x256xf32>
    %41 = arith.addf %37, %40 : vector<8x256xf32>
    %cst_32 = arith.constant 0.000000e+00 : f32
    %42 = vector.broadcast %cst_32 : f32 to vector<8x256xf32>
    %43 = arith.maximumf %41, %42 : vector<8x256xf32>
    %44 = arith.truncf %43 : vector<8x256xf32> to vector<8x256xbf16>
    %cst_33 = arith.constant dense<0.000000e+00> : vector<8x784xf32>
    %45 = tpu.matmul %44, %0, %cst_33 {dimension_numbers = #tpu.dot_dimension_numbers<[1], [0], [0], [1], [0, 0, 1, 1], [], []>} : vector<8x256xbf16>, vector<256x784xbf16>, vector<8x784xf32> -> vector<8x784xf32>
    %46 = vector.broadcast %1 : vector<1x784xf32> to vector<8x784xf32>
    %47 = arith.addf %45, %46 : vector<8x784xf32>
    %48 = arith.truncf %47 : vector<8x784xf32> to vector<8x784xbf16>
    %c2 = arith.constant 2 : index
    %c0_34 = arith.constant 0 : index
    %c0_35 = arith.constant 0 : index
    %49 = vector.load %arg8[%c2, %c0_34, %c0_35] : memref<5x8x784xbf16, #tpu.memory_space<vmem>>, vector<1x8x784xbf16>
    %50 = vector.shape_cast %49 : vector<1x8x784xbf16> to vector<8x784xbf16>
    %51 = vector.shape_cast %48 : vector<8x784xbf16> to vector<1x8x784xbf16>
    tpu.vector_store %arg8[%c2, %c0_34, %c0_35], %51 {strides = array<i32>} : memref<5x8x784xbf16, #tpu.memory_space<vmem>>, vector<1x8x784xbf16>,
    %c2_36 = arith.constant 2 : index
    %c0_37 = arith.constant 0 : index
    %c0_38 = arith.constant 0 : index
    %52 = vector.load %arg4[%c2_36, %c0_37, %c0_38] : memref<4x256x256xbf16, #tpu.memory_space<vmem>>, vector<1x256x256xbf16>
    %53 = vector.shape_cast %52 : vector<1x256x256xbf16> to vector<256x256xbf16>
    %cst_39 = arith.constant dense<0.000000e+00> : vector<8x256xf32>
    %54 = tpu.matmul %44, %53, %cst_39 {dimension_numbers = #tpu.dot_dimension_numbers<[1], [0], [0], [1], [0, 0, 1, 1], [], []>} : vector<8x256xbf16>, vector<256x256xbf16>, vector<8x256xf32> -> vector<8x256xf32>
    %c2_40 = arith.constant 2 : index
    %c0_41 = arith.constant 0 : index
    %c0_42 = arith.constant 0 : index
    %55 = vector.load %arg5[%c2_40, %c0_41, %c0_42] : memref<4x1x256xf32, #tpu.memory_space<vmem>>, vector<1x1x256xf32>
    %56 = vector.shape_cast %55 : vector<1x1x256xf32> to vector<1x256xf32>
    %57 = vector.broadcast %56 : vector<1x256xf32> to vector<8x256xf32>
    %58 = arith.addf %54, %57 : vector<8x256xf32>
    %cst_43 = arith.constant 0.000000e+00 : f32
    %59 = vector.broadcast %cst_43 : f32 to vector<8x256xf32>
    %60 = arith.maximumf %58, %59 : vector<8x256xf32>
    %61 = arith.truncf %60 : vector<8x256xf32> to vector<8x256xbf16>
    %cst_44 = arith.constant dense<0.000000e+00> : vector<8x784xf32>
    %62 = tpu.matmul %61, %0, %cst_44 {dimension_numbers = #tpu.dot_dimension_numbers<[1], [0], [0], [1], [0, 0, 1, 1], [], []>} : vector<8x256xbf16>, vector<256x784xbf16>, vector<8x784xf32> -> vector<8x784xf32>
    %63 = vector.broadcast %1 : vector<1x784xf32> to vector<8x784xf32>
    %64 = arith.addf %62, %63 : vector<8x784xf32>
    %65 = arith.truncf %64 : vector<8x784xf32> to vector<8x784xbf16>
    %c3 = arith.constant 3 : index
    %c0_45 = arith.constant 0 : index
    %c0_46 = arith.constant 0 : index
    %66 = vector.load %arg8[%c3, %c0_45, %c0_46] : memref<5x8x784xbf16, #tpu.memory_space<vmem>>, vector<1x8x784xbf16>
    %67 = vector.shape_cast %66 : vector<1x8x784xbf16> to vector<8x784xbf16>
    %68 = vector.shape_cast %65 : vector<8x784xbf16> to vector<1x8x784xbf16>
    tpu.vector_store %arg8[%c3, %c0_45, %c0_46], %68 {strides = array<i32>} : memref<5x8x784xbf16, #tpu.memory_space<vmem>>, vector<1x8x784xbf16>,
    %c3_47 = arith.constant 3 : index
    %c0_48 = arith.constant 0 : index
    %c0_49 = arith.constant 0 : index
    %69 = vector.load %arg4[%c3_47, %c0_48, %c0_49] : memref<4x256x256xbf16, #tpu.memory_space<vmem>>, vector<1x256x256xbf16>
    %70 = vector.shape_cast %69 : vector<1x256x256xbf16> to vector<256x256xbf16>
    %cst_50 = arith.constant dense<0.000000e+00> : vector<8x256xf32>
    %71 = tpu.matmul %61, %70, %cst_50 {dimension_numbers = #tpu.dot_dimension_numbers<[1], [0], [0], [1], [0, 0, 1, 1], [], []>} : vector<8x256xbf16>, vector<256x256xbf16>, vector<8x256xf32> -> vector<8x256xf32>
    %c3_51 = arith.constant 3 : index
    %c0_52 = arith.constant 0 : index
    %c0_53 = arith.constant 0 : index
    %72 = vector.load %arg5[%c3_51, %c0_52, %c0_53] : memref<4x1x256xf32, #tpu.memory_space<vmem>>, vector<1x1x256xf32>
    %73 = vector.shape_cast %72 : vector<1x1x256xf32> to vector<1x256xf32>
    %74 = vector.broadcast %73 : vector<1x256xf32> to vector<8x256xf32>
    %75 = arith.addf %71, %74 : vector<8x256xf32>
    %cst_54 = arith.constant 0.000000e+00 : f32
    %76 = vector.broadcast %cst_54 : f32 to vector<8x256xf32>
    %77 = arith.maximumf %75, %76 : vector<8x256xf32>
    %78 = arith.truncf %77 : vector<8x256xf32> to vector<8x256xbf16>
    %cst_55 = arith.constant dense<0.000000e+00> : vector<8x784xf32>
    %79 = tpu.matmul %78, %0, %cst_55 {dimension_numbers = #tpu.dot_dimension_numbers<[1], [0], [0], [1], [0, 0, 1, 1], [], []>} : vector<8x256xbf16>, vector<256x784xbf16>, vector<8x784xf32> -> vector<8x784xf32>
    %80 = vector.broadcast %1 : vector<1x784xf32> to vector<8x784xf32>
    %81 = arith.addf %79, %80 : vector<8x784xf32>
    %82 = arith.truncf %81 : vector<8x784xf32> to vector<8x784xbf16>
    %c4 = arith.constant 4 : index
    %c0_56 = arith.constant 0 : index
    %c0_57 = arith.constant 0 : index
    %83 = vector.load %arg8[%c4, %c0_56, %c0_57] : memref<5x8x784xbf16, #tpu.memory_space<vmem>>, vector<1x8x784xbf16>
    %84 = vector.shape_cast %83 : vector<1x8x784xbf16> to vector<8x784xbf16>
    %85 = vector.shape_cast %82 : vector<8x784xbf16> to vector<1x8x784xbf16>
    tpu.vector_store %arg8[%c4, %c0_56, %c0_57], %85 {strides = array<i32>} : memref<5x8x784xbf16, #tpu.memory_space<vmem>>, vector<1x8x784xbf16>,
    return
  }
  func.func @transform_0(%arg0: i32) -> (i32, i32) {
    %c0_i32 = arith.constant 0 : i32
    %c0_i32_0 = arith.constant 0 : i32
    return %arg0, %c0_i32 : i32, i32
  }
  func.func @transform_1(%arg0: i32) -> (i32, i32) {
    %c0_i32 = arith.constant 0 : i32
    %c0_i32_0 = arith.constant 0 : i32
    %c0_i32_1 = arith.constant 0 : i32
    return %c0_i32, %c0_i32_0 : i32, i32
  }
  func.func @transform_2(%arg0: i32) -> (i32, i32) {
    %c0_i32 = arith.constant 0 : i32
    %c0_i32_0 = arith.constant 0 : i32
    %c0_i32_1 = arith.constant 0 : i32
    return %c0_i32, %c0_i32_0 : i32, i32
  }
  func.func @transform_3(%arg0: i32) -> (i32, i32, i32) {
    %c0_i32 = arith.constant 0 : i32
    %c0_i32_0 = arith.constant 0 : i32
    %c0_i32_1 = arith.constant 0 : i32
    %c0_i32_2 = arith.constant 0 : i32
    return %c0_i32, %c0_i32_0, %c0_i32_1 : i32, i32, i32
  }
  func.func @transform_4(%arg0: i32) -> (i32, i32, i32) {
    %c0_i32 = arith.constant 0 : i32
    %c0_i32_0 = arith.constant 0 : i32
    %c0_i32_1 = arith.constant 0 : i32
    %c0_i32_2 = arith.constant 0 : i32
    return %c0_i32, %c0_i32_0, %c0_i32_1 : i32, i32, i32
  }
  func.func @transform_5(%arg0: i32) -> (i32, i32) {
    %c0_i32 = arith.constant 0 : i32
    %c0_i32_0 = arith.constant 0 : i32
    %c0_i32_1 = arith.constant 0 : i32
    return %c0_i32, %c0_i32_0 : i32, i32
  }
  func.func @transform_6(%arg0: i32) -> (i32, i32) {
    %c0_i32 = arith.constant 0 : i32
    %c0_i32_0 = arith.constant 0 : i32
    %c0_i32_1 = arith.constant 0 : i32
    return %c0_i32, %c0_i32_0 : i32, i32
  }
  func.func @transform_7(%arg0: i32) -> (i32, i32, i32) {
    %c0_i32 = arith.constant 0 : i32
    %c0_i32_0 = arith.constant 0 : i32
    %c0_i32_1 = arith.constant 0 : i32
    return %c0_i32, %arg0, %c0_i32_0 : i32, i32, i32
  }
}

</mosaic_0001>

<bundles_post_ra>
// kernel: tpu_custom_call.1
= control target key start
LH: loop header
LB: loop body
LE: loop exit
PB: predicated region body
PF: predicated region fallthrough
CT: control target
= control target key end

     0   :  { %s6459_s0 = inlined_call_operand.vmem [shape: bf16[8,256], index: 0, kind: input, shape index: {}]   ;;  %s6460_s1 = inlined_call_operand.vmem [shape: bf16[256,256], index: 1, kind: input, shape index: {}]   ;;  %s6461_s2 = inlined_call_operand.vmem [shape: f32[1,256], index: 2, kind: input, shape index: {}]   ;;  %s6462_s3 = inlined_call_operand.vmem [shape: bf16[4,256,256], index: 3, kind: input, shape index: {}]   ;;  %s6463_s4 = inlined_call_operand.vmem [shape: f32[4,1,256], index: 4, kind: input, shape index: {}]   ;;  %s6464_s5 = inlined_call_operand.vmem [shape: bf16[256,784], index: 5, kind: input, shape index: {}]   ;;  %s6465_s6 = inlined_call_operand.vmem [shape: f32[1,784], index: 6, kind: input, shape index: {}]   ;;  %s6466_s7 = inlined_call_operand.hbm [shape: bf16[5,8,784], index: 7, kind: output, shape index: {}]  }
   0x1   :  { %v3555_v0 = vld [vmem:[%s6460_s1 + $0x74] ss:$8 sps:$4 sm:$0xff]   ;;  %v3557_v1 = vld [vmem:[%s6460_s1 + $0x70] ss:$8 sps:$4 sm:$0xff]   ;;  %v3558_v2 = vld [vmem:[%s6460_s1 + $0x64] ss:$8 sps:$4 sm:$0xff]  }
   0x2   :  { %369 = vmatprep.subr.bf16.mxu0 %v3555_v0  ;;  %v3560_v3 = vld [vmem:[%s6460_s1 + $0x60] ss:$8 sps:$4 sm:$0xff]   ;;  %v3561_v4 = vld [vmem:[%s6460_s1 + $0x54] ss:$8 sps:$4 sm:$0xff]   ;;  %v3563_v5 = vld [vmem:[%s6460_s1 + $0x50] ss:$8 sps:$4 sm:$0xff]  }
   0x3   :  { %370 = vmatpush1.bf16.msra.mxu0 %v3557_v1  ;;  %v3564_v6 = vld [vmem:[%s6460_s1 + $0x44] ss:$8 sps:$4 sm:$0xff]   ;;  %v3566_v7 = vld [vmem:[%s6460_s1 + $0x40] ss:$8 sps:$4 sm:$0xff]   ;;  %v3567_v8 = vld [vmem:[%s6460_s1 + $0x34] ss:$8 sps:$4 sm:$0xff]  }
   0x4   :  { %371 = vmatprep.subr.bf16.mxu0 %v3558_v2  ;;  %v3569_v9 = vld [vmem:[%s6460_s1 + $0x30] ss:$8 sps:$4 sm:$0xff]   ;;  %v3570_v10 = vld [vmem:[%s6460_s1 + $0x24] ss:$8 sps:$4 sm:$0xff]   ;;  %v3572_v11 = vld [vmem:[%s6460_s1 + $0x20] ss:$8 sps:$4 sm:$0xff]  }
   0x5   :  { %v3573_v12 = vld [vmem:[%s6460_s1 + $0x14] ss:$8 sps:$4 sm:$0xff]   ;;  %v4180_v13 = vld [vmem:[%s6459_s0] sm:$0xff]  ;;  %v3605_v15 = vld [vmem:[%s6464_s5 + $0x18c] ss:$28 sps:$4 sm:$0xff]  }
   0x6   :  { %v3030_v14 = vcombine.high %v4180_v13, %v4180_v13  ;;  %v3575_v16 = vld [vmem:[%s6460_s1 + $0x10] ss:$8 sps:$4 sm:$0xff]   ;;  %v3609_v17 = vld [vmem:[%s6464_s5 + $0x188] ss:$28 sps:$4 sm:$0xff]   ;;  %1026 = vmatprep.subr.bf16.mxu1 %v3605_v15  ;;  %v3579_v23 = vld [vmem:[%s6460_s1 + $0xf4] ss:$8 sps:$4 sm:$0xff]   ;;  %v3029_v59 = vcombine.low %v4180_v13, %v4180_v13 }
   0x7   :  { %372 = vmatpush1.bf16.msra.mxu0 %v3560_v3  ;;  %v3576_v18 = vld [vmem:[%s6460_s1 + $0x4] ss:$8 sps:$4 sm:$0xff]   ;;  %v3611_v19 = vld [vmem:[%s6464_s5 + $0x154] ss:$28 sps:$4 sm:$0xff]   ;;  %v3578_v20 = vld [vmem:[%s6460_s1] ss:$8 sps:$4 sm:$0xff]   ;;  %1027 = vmatpush1.bf16.msra.mxu1 %v3609_v17 }
   0x8   :  { %373 = vmatprep.subr.bf16.mxu0 %v3561_v4  ;;  %401 = vmatprep.mubr.bf16.mxu0 %v3030_v14  ;;  %v4205_v21 = vld [vmem:[%s6464_s5 + $0x150] ss:$28 sps:$4 sm:$0xff]   ;;  %v4210_v22 = vld [vmem:[%s6464_s5 + $0x11c] ss:$28 sps:$4 sm:$0xff]   ;;  %v4228_v26 = vld [vmem:[%s6464_s5 + $0xe4] ss:$28 sps:$4 sm:$0xff]  }
   0x9   :  { %1028 = vmatprep.subr.bf16.mxu1 %v3611_v19  ;;  %v4219_v24 = vld [vmem:[%s6464_s5 + $0x118] ss:$28 sps:$4 sm:$0xff]   ;;  %v3582_v27 = vld [vmem:[%s6460_s1 + $0xe4] ss:$8 sps:$4 sm:$0xff]   ;;  %v3584_v28 = vld [vmem:[%s6460_s1 + $0xe0] ss:$8 sps:$4 sm:$0xff]  }
   0xa   :  { %v3581_v25 = vld [vmem:[%s6460_s1 + $0xf0] ss:$8 sps:$4 sm:$0xff]   ;;  %v4240_v29 = vld [vmem:[%s6464_s5 + $0xe0] ss:$28 sps:$4 sm:$0xff]   ;;  %v4246_v30 = vld [vmem:[%s6464_s5 + $0xac] ss:$28 sps:$4 sm:$0xff]  }
   0xb   :  { %374 = vmatpush1.bf16.msra.mxu0 %v3563_v5  ;;  %1029 = vmatpush1.bf16.msra.mxu1 %v4205_v21  ;;  %v3585_v31 = vld [vmem:[%s6460_s1 + $0xd4] ss:$8 sps:$4 sm:$0xff]   ;;  %v4255_v32 = vld [vmem:[%s6464_s5 + $0xa8] ss:$28 sps:$4 sm:$0xff]   ;;  %v3587_v33 = vld [vmem:[%s6460_s1 + $0xd0] ss:$8 sps:$4 sm:$0xff]  }
   0xc   :  { %375 = vmatprep.subr.bf16.mxu0 %v3564_v6  ;;  %1030 = vmatprep.subr.bf16.mxu1 %v4210_v22  ;;  %v4264_v34 = vld [vmem:[%s6464_s5 + $0x74] ss:$28 sps:$4 sm:$0xff]   ;;  %v3588_v35 = vld [vmem:[%s6460_s1 + $0xc4] ss:$8 sps:$4 sm:$0xff]   ;;  %v3590_v36 = vld [vmem:[%s6460_s1 + $0xc0] ss:$8 sps:$4 sm:$0xff]  }
   0xd   :  { %v4276_v37 = vld [vmem:[%s6464_s5 + $0x70] ss:$28 sps:$4 sm:$0xff]   ;;  %v4282_v38 = vld [vmem:[%s6464_s5 + $0x3c] ss:$28 sps:$4 sm:$0xff]   ;;  %v4300_v42 = vld [vmem:[%s6464_s5 + $0x4] ss:$28 sps:$4 sm:$0xff]  }
   0xe   :  { %v3591_v39 = vld [vmem:[%s6460_s1 + $0xb4] ss:$8 sps:$4 sm:$0xff]   ;;  %v3593_v41 = vld [vmem:[%s6460_s1 + $0xb0] ss:$8 sps:$4 sm:$0xff]   ;;  %v3594_v43 = vld [vmem:[%s6460_s1 + $0xa4] ss:$8 sps:$4 sm:$0xff]  }
   0xf   :  { %376 = vmatpush1.bf16.msra.mxu0 %v3566_v7  ;;  %1031 = vmatpush1.bf16.msra.mxu1 %v4219_v24  ;;  %v4291_v40 = vld [vmem:[%s6464_s5 + $0x38] ss:$28 sps:$4 sm:$0xff]   ;;  %v3596_v44 = vld [vmem:[%s6460_s1 + $0xa0] ss:$8 sps:$4 sm:$0xff]   ;;  %v3600_v51 = vld [vmem:[%s6460_s1 + $0x84] ss:$8 sps:$4 sm:$0xff]  }
  0x10   :  { %377 = vmatprep.subr.bf16.mxu0 %v3567_v8  ;;  %1032 = vmatprep.subr.bf16.mxu1 %v4228_v26  ;;  %v4312_v45 = vld [vmem:[%s6464_s5] ss:$28 sps:$4 sm:$0xff]   ;;  %v4318_v46 = vld [vmem:[%s6464_s5 + $0x34c] ss:$28 sps:$4 sm:$0xff]   ;;  %v3599_v49 = vld [vmem:[%s6460_s1 + $0x90] ss:$8 sps:$4 sm:$0xff]  }
  0x11   :  { %v3597_v47 = vld [vmem:[%s6460_s1 + $0x94] ss:$8 sps:$4 sm:$0xff]   ;;  %v4327_v48 = vld [vmem:[%s6464_s5 + $0x348] ss:$28 sps:$4 sm:$0xff]   ;;  %v4351_v54 = vld [vmem:[%s6464_s5 + $0x310] ss:$28 sps:$4 sm:$0xff]  }
  0x12   :  { %v4336_v50 = vld [vmem:[%s6464_s5 + $0x314] ss:$28 sps:$4 sm:$0xff]   ;;  %v3602_v52 = vld [vmem:[%s6460_s1 + $0x80] ss:$8 sps:$4 sm:$0xff]   ;;  %v4357_v55 = vld [vmem:[%s6464_s5 + $0x2dc] ss:$28 sps:$4 sm:$0xff]  }
  0x13   :  { %378 = vmatpush1.bf16.msra.mxu0 %v3569_v9  ;;  %1033 = vmatpush1.bf16.msra.mxu1 %v4240_v29  ;;  %v3607_v53 = vld [vmem:[%s6464_s5 + $0x194] ss:$28 sps:$4 sm:$0xff]   ;;  %v4372_v58 = vld [vmem:[%s6464_s5 + $0x2a4] ss:$28 sps:$4 sm:$0xff]   ;;  %v4379_v60 = vld [vmem:[%s6464_s5 + $0x15c] ss:$28 sps:$4 sm:$0xff]  }
  0x14   :  { %379 = vmatprep.subr.bf16.mxu0 %v3570_v10  ;;  %1034 = vmatprep.subr.bf16.mxu1 %v4246_v30  ;;  %v4362_v56 = vld [vmem:[%s6464_s5 + $0x2d8] ss:$28 sps:$4 sm:$0xff]   ;;  %v4367_v57 = vld [vmem:[%s6464_s5 + $0x190] ss:$28 sps:$4 sm:$0xff]   ;;  %v4386_v61 = vld [vmem:[%s6464_s5 + $0x2a0] ss:$28 sps:$4 sm:$0xff]  }
  0x15   :  { %v4391_v62 = vld [vmem:[%s6464_s5 + $0x158] ss:$28 sps:$4 sm:$0xff]   ;;  %v4396_v63 = vld [vmem:[%s6464_s5 + $0x26c] ss:$28 sps:$4 sm:$0xff]   ;;  %v4401_v0 = vld [vmem:[%s6464_s5 + $0x124] ss:$28 sps:$4 sm:$0xff]  }
  0x16   :  { %v4410_v1 = vld [vmem:[%s6464_s5 + $0x268] ss:$28 sps:$4 sm:$0xff]   ;;  %v4415_v2 = vld [vmem:[%s6464_s5 + $0x120] ss:$28 sps:$4 sm:$0xff]   ;;  %v4420_v3 = vld [vmem:[%s6464_s5 + $0x234] ss:$28 sps:$4 sm:$0xff]  }
  0x17   :  { %380 = vmatpush1.bf16.msra.mxu0 %v3572_v11  ;;  %1035 = vmatpush1.bf16.msra.mxu1 %v4255_v32  ;;  %v4425_v4 = vld [vmem:[%s6464_s5 + $0xec] ss:$28 sps:$4 sm:$0xff]   ;;  %v4444_v7 = vld [vmem:[%s6464_s5 + $0xb4] ss:$28 sps:$4 sm:$0xff]   ;;  %v4458_v9 = vld [vmem:[%s6464_s5 + $0x7c] ss:$28 sps:$4 sm:$0xff]  }
  0x18   :  { %381 = vmatprep.subr.bf16.mxu0 %v3573_v12  ;;  %1036 = vmatprep.subr.bf16.mxu1 %v4264_v34  ;;  %v4434_v5 = vld [vmem:[%s6464_s5 + $0x230] ss:$28 sps:$4 sm:$0xff]   ;;  %v4439_v6 = vld [vmem:[%s6464_s5 + $0xe8] ss:$28 sps:$4 sm:$0xff]   ;;  %v4466_v10 = vld [vmem:[%s6464_s5 + $0x78] ss:$28 sps:$4 sm:$0xff]  }
  0x19   :  { %v4453_v8 = vld [vmem:[%s6464_s5 + $0xb0] ss:$28 sps:$4 sm:$0xff]   ;;  %v4471_v11 = vld [vmem:[%s6464_s5 + $0x44] ss:$28 sps:$4 sm:$0xff]   ;;  %v4507_v17 = vld [vmem:[%s6464_s5 + $0x31c] ss:$28 sps:$4 sm:$0xff]  }
  0x1a   :  { %v4478_v12 = vld [vmem:[%s6464_s5 + $0x40] ss:$28 sps:$4 sm:$0xff]   ;;  %v4483_v13 = vld [vmem:[%s6464_s5 + $0xc] ss:$28 sps:$4 sm:$0xff]   ;;  %v4495_v15 = vld [vmem:[%s6464_s5 + $0x354] ss:$28 sps:$4 sm:$0xff]  }
  0x1b   :  { %382 = vmatpush1.bf16.msra.mxu0 %v3575_v16  ;;  %1037 = vmatpush1.bf16.msra.mxu1 %v4276_v37  ;;  %v4490_v14 = vld [vmem:[%s6464_s5 + $0x8] ss:$28 sps:$4 sm:$0xff]   ;;  %v4502_v16 = vld [vmem:[%s6464_s5 + $0x350] ss:$28 sps:$4 sm:$0xff]  }
  0x1c   :  { %383 = vmatprep.subr.bf16.mxu0 %v3576_v18  ;;  %1038 = vmatprep.subr.bf16.mxu1 %v4282_v38  ;;  %v4514_v18 = vld [vmem:[%s6464_s5 + $0x318] ss:$28 sps:$4 sm:$0xff]   ;;  %v4519_v19 = vld [vmem:[%s6464_s5 + $0x2e4] ss:$28 sps:$4 sm:$0xff]  }
  0x1d   :  { %6652 = vst [vmem:[#allocation5_spill] sm:$0xff] %v4514_v18  ;;  %6653 = vst [vmem:[#allocation6_spill] sm:$0xff] %v4519_v19 }
  0x1f   :  { %384 = vmatpush1.bf16.msra.mxu0 %v3578_v20  ;;  %1039 = vmatpush1.bf16.msra.mxu1 %v4291_v40  ;;  %v4526_v20 = vld [vmem:[%s6464_s5 + $0x2e0] ss:$28 sps:$4 sm:$0xff]  }
  0x20   :  { %385 = vmatprep.subr.bf16.mxu0 %v3579_v23  ;;  %1040 = vmatprep.subr.bf16.mxu1 %v4300_v42  ;;  %6654 = vst [vmem:[#allocation7_spill] sm:$0xff] %v4526_v20  ;;  %v4531_v23 = vld [vmem:[%s6464_s5 + $0x2ac] ss:$28 sps:$4 sm:$0xff]  }
  0x21   :  { %6655 = vst [vmem:[#allocation8_spill] sm:$0xff] %v4531_v23 }
  0x23   :  { %386 = vmatpush2.bf16.msra.mxu0 %v3581_v25  ;;  %1041 = vmatpush1.bf16.msra.mxu1 %v4312_v45  ;;  %v4538_v25 = vld [vmem:[%s6464_s5 + $0x2a8] ss:$28 sps:$4 sm:$0xff]  }
  0x24   :  { %387 = vmatprep.subr.bf16.mxu0 %v3582_v27  ;;  %1042 = vmatprep.subr.bf16.mxu1 %v4318_v46  ;;  %6656 = vst [vmem:[#allocation9_spill] sm:$0xff] %v4538_v25  ;;  %v4543_v27 = vld [vmem:[%s6464_s5 + $0x274] ss:$28 sps:$4 sm:$0xff]  }
  0x25   :  { %6657 = vst [vmem:[#allocation10_spill] sm:$0xff] %v4543_v27 }
  0x27   :  { %388 = vmatpush2.bf16.msra.mxu0 %v3584_v28  ;;  %1043 = vmatpush2.bf16.msra.mxu1 %v4327_v48  ;;  %v4550_v28 = vld [vmem:[%s6464_s5 + $0x270] ss:$28 sps:$4 sm:$0xff]  }
  0x28   :  { %389 = vmatprep.subr.bf16.mxu0 %v3585_v31  ;;  %1044 = vmatprep.subr.bf16.mxu1 %v4336_v50  ;;  %6658 = vst [vmem:[#allocation11_spill] sm:$0xff] %v4550_v28  ;;  %v4555_v31 = vld [vmem:[%s6464_s5 + $0x23c] ss:$28 sps:$4 sm:$0xff]  }
  0x29   :  { %6659 = vst [vmem:[#allocation12_spill] sm:$0xff] %v4555_v31 }
  0x2b   :  { %390 = vmatpush2.bf16.msra.mxu0 %v3587_v33  ;;  %1045 = vmatpush2.bf16.msra.mxu1 %v4351_v54  ;;  %v4562_v33 = vld [vmem:[%s6464_s5 + $0x238] ss:$28 sps:$4 sm:$0xff]  }
  0x2c   :  { %391 = vmatprep.subr.bf16.mxu0 %v3588_v35  ;;  %1046 = vmatprep.subr.bf16.mxu1 %v4357_v55  ;;  %6660 = vst [vmem:[#allocation13_spill] sm:$0xff] %v4562_v33 }
  0x2f   :  { %392 = vmatpush2.bf16.msra.mxu0 %v3590_v36  ;;  %1047 = vmatpush2.bf16.msra.mxu1 %v4362_v56 }
  0x30   :  { %393 = vmatprep.subr.bf16.mxu0 %v3591_v39  ;;  %1048 = vmatprep.subr.bf16.mxu1 %v4372_v58 }
  0x33   :  { %394 = vmatpush2.bf16.msra.mxu0 %v3593_v41  ;;  %1049 = vmatpush2.bf16.msra.mxu1 %v4386_v61 }
  0x34   :  { %395 = vmatprep.subr.bf16.mxu0 %v3594_v43  ;;  %1050 = vmatprep.subr.bf16.mxu1 %v4396_v63 }
  0x37   :  { %396 = vmatpush2.bf16.msra.mxu0 %v3596_v44  ;;  %1051 = vmatpush2.bf16.msra.mxu1 %v4410_v1 }
  0x38   :  { %397 = vmatprep.subr.bf16.mxu0 %v3597_v47  ;;  %1052 = vmatprep.subr.bf16.mxu1 %v4420_v3 }
  0x3b   :  { %398 = vmatpush2.bf16.msra.mxu0 %v3599_v49  ;;  %1053 = vmatpush2.bf16.msra.mxu1 %v4434_v5 }
  0x3c   :  { %399 = vmatprep.subr.bf16.mxu0 %v3600_v51 }
  0x3f   :  { %400 = vmatpush2.bf16.msra.mxu0 %v3602_v52 }
  0x40   :  { %1067 = vmatprep.subr.bf16.mxu0 %v3607_v53 }
  0x42   :  { %402 = vmatmul.mubr.bf16.vlgmr.msra.gmra.mxu0 %v3029_v59 }
  0x43   :  { %1068 = vmatpush1.bf16.msra.mxu0 %v4367_v57 }
  0x44   :  { %1069 = vmatprep.subr.bf16.mxu0 %v4379_v60 }
  0x47   :  { %1070 = vmatpush1.bf16.msra.mxu0 %v4391_v62 }
  0x48   :  { %1071 = vmatprep.subr.bf16.mxu0 %v4401_v0 }
  0x4b   :  { %1072 = vmatpush1.bf16.msra.mxu0 %v4415_v2 }
  0x4c   :  { %1073 = vmatprep.subr.bf16.mxu0 %v4425_v4 }
  0x4f   :  { %1074 = vmatpush1.bf16.msra.mxu0 %v4439_v6 }
  0x50   :  { %1075 = vmatprep.subr.bf16.mxu0 %v4444_v7 }
  0x53   :  { %1076 = vmatpush1.bf16.msra.mxu0 %v4453_v8 }
  0x54   :  { %1077 = vmatprep.subr.bf16.mxu0 %v4458_v9 }
  0x57   :  { %1078 = vmatpush1.bf16.msra.mxu0 %v4466_v10 }
  0x58   :  { %1079 = vmatprep.subr.bf16.mxu0 %v4471_v11 }
  0x5b   :  { %1080 = vmatpush1.bf16.msra.mxu0 %v4478_v12 }
  0x5c   :  { %1081 = vmatprep.subr.bf16.mxu0 %v4483_v13 }
  0x5f   :  { %1082 = vmatpush1.bf16.msra.mxu0 %v4490_v14 }
  0x60   :  { %1083 = vmatprep.subr.bf16.mxu0 %v4495_v15 }
  0x63   :  { %1084 = vmatpush2.bf16.msra.mxu0 %v4502_v16 }
  0x64   :  { %1085 = vmatprep.subr.bf16.mxu0 %v4507_v17 }
  0x67   :  { %1086 = vmatpush2.bf16.msra.mxu0 %v4514_v18 }
  0x68   :  { %1087 = vmatprep.subr.bf16.mxu0 %v4519_v19 }
  0x6b   :  { %1088 = vmatpush2.bf16.msra.mxu0 %v4526_v20 }
  0x6c   :  { %1089 = vmatprep.subr.bf16.mxu0 %v4531_v23 }
  0x6f   :  { %1090 = vmatpush2.bf16.msra.mxu0 %v4538_v25 }
  0x70   :  { %1091 = vmatprep.subr.bf16.mxu0 %v4543_v27 }
  0x73   :  { %1092 = vmatpush2.bf16.msra.mxu0 %v4550_v28 }
  0x74   :  { %1093 = vmatprep.subr.bf16.mxu0 %v4555_v31 }
  0x77   :  { %1094 = vmatpush2.bf16.msra.mxu0 %v4562_v33 }
  0x78   :  { %12 = vsyncpa [#allocation3], 0  ;;  %v4570_v35 = vld [vmem:[%s6464_s5 + $0x1fc] ss:$28 sps:$4 sm:$0xff]   ;;  %v4575_v36 = vld [vmem:[%s6464_s5 + $0x204] ss:$28 sps:$4 sm:$0xff]   ;;  %v192_v53 = vlaneseq }
  0x79   :  { %6661 = vst [vmem:[#allocation14_spill] sm:$0xff] %v4575_v36  ;;  %v4580_v39 = vld [vmem:[%s6464_s5 + $0x1f8] ss:$28 sps:$4 sm:$0xff]   ;;  %v4585_v41 = vld [vmem:[%s6464_s5 + $0x200] ss:$28 sps:$4 sm:$0xff]   ;;  %1054 = vmatprep.subr.bf16.mxu1 %v4570_v35  ;;  %1095 = vmatprep.subr.bf16.mxu0 %v4575_v36  ;;  %vm1221_vm0 = vcmask 125952  }
  0x7a   :  { %6662 = vst [vmem:[#allocation15_spill] sm:$0xff] %v4585_v41  ;;  %1055 = vmatpush2.bf16.msra.mxu1 %v4580_v39  ;;  %v4594_v43 = vld [vmem:[%s6464_s5 + $0x1c4] ss:$28 sps:$4 sm:$0xff]   ;;  %v4599_v44 = vld [vmem:[%s6464_s5 + $0x1cc] ss:$28 sps:$4 sm:$0xff]   ;;  %v4627_v59 = vshrl.u32 %v192_v53, 7 }
  0x7b   :  { %1096 = vmatpush2.bf16.msra.mxu0 %v4585_v41  ;;  %6663 = vst [vmem:[#allocation16_spill] sm:$0xff] %v4599_v44  ;;  %v4604_v47 = vld [vmem:[%s6464_s5 + $0x1c0] ss:$28 sps:$4 sm:$0xff]   ;;  %v4609_v49 = vld [vmem:[%s6464_s5 + $0x1c8] ss:$28 sps:$4 sm:$0xff]   ;;  %1056 = vmatprep.subr.bf16.mxu1 %v4594_v43 }
  0x7c   :  { %6664 = vst [vmem:[#allocation17_spill] sm:$0xff] %v4609_v49  ;;  %1097 = vmatprep.subr.bf16.mxu0 %v4599_v44  ;;  %v4618_v51 = vld [vmem:[%s6464_s5 + $0x19c] ss:$28 sps:$4 sm:$0xff]   ;;  %v4630_v44 = vsub.s32 0, %v4627_v59  ;;  %v4636_v41 = vsub.s32 1, %v4627_v59 }
  0x7d   :  { %v4623_v52 = vld [vmem:[%s6464_s5 + $0x360] ss:$28 sps:$4 sm:$0xff]   ;;  %v4645_v18 = vld [vmem:[%s6464_s5 + $0x198] ss:$28 sps:$4 sm:$0xff]  }
  0x7e   :  { %1057 = vmatpush2.bf16.msra.mxu1 %v4604_v47  ;;  %6665 = vst [vmem:[#allocation18_spill] sm:$0xff] %v4623_v52  ;;  %6666 = vst [vmem:[#allocation19_spill] sm:$0xff] %v4630_v44 }
  0x7f   :  { %1098 = vmatpush2.bf16.msra.mxu0 %v4609_v49  ;;  %1108 = vmatprep.subr.bf16.mxu1 %v4618_v51  ;;  %v190_v49 = vld [vmem:[%s6461_s2] sm:$0x3] }
  0x80   :  { %3442 = vmatprep.subr.bf16.mxu0 %v4623_v52  ;;  %v195_v36 = vrot.slane %v190_v49, %v4630_v44  ;;  %v199_v33 = vrot.slane %v190_v49, %v4636_v41  ;;  %v4650_v44 = vld [vmem:[%s6464_s5 + $0x1a0] ss:$28 sps:$4 sm:$0xff]  }
 0x102   :  { %v403_v31 = vpop.f32.mrf.mxu0 }
 0x103   :  { %v404_v28 = vadd.f32 %v403_v31, %v195_v36  ;;  %v4690_v31 = vld [vmem:[%s6464_s5 + $0x2f0] ss:$28 sps:$4 sm:$0xff]  }
 0x104   :  { %v405_v52 = vpop.f32.mrf.mxu0  ;;  %6668 = vst [vmem:[#allocation21_spill] sm:$0xff] %v4690_v31  ;;  %v4704_v36 = vld [vmem:[%s6464_s5 + $0x130] ss:$28 sps:$4 sm:$0xff]  }
 0x105   :  { %v406_v27 = vadd.f32 %v405_v52, %v199_v33  ;;  %v410_v53 = vmax.f32 %v404_v28, 0.0  ;;  %v4685_v28 = vld [vmem:[%s6464_s5 + $0x12c] ss:$28 sps:$4 sm:$0xff]   ;;  %6670 = vst [vmem:[#allocation23_spill] sm:$0xff] %v4704_v36  ;;  %v4711_v52 = vld [vmem:[%s6464_s5 + $0xf4] ss:$28 sps:$4 sm:$0xff]  }
 0x106   :  { %v407_v25 = vpop.f32.mrf.mxu0  ;;  %6667 = vst [vmem:[#allocation20_spill] sm:$0xff] %v4685_v28  ;;  %v4699_v33 = vld [vmem:[%s6464_s5 + $0x128] ss:$28 sps:$4 sm:$0xff]   ;;  %6671 = vst [vmem:[#allocation24_spill] sm:$0xff] %v4711_v52 }
 0x107   :  { %v411_v23 = vmax.f32 %v406_v27, 0.0  ;;  %v4652_v49 = vpack.c.bf16 %v410_v53, %v410_v53  ;;  %v4673_v25 = vld [vmem:[%s6464_s5 + $0x160] ss:$28 sps:$4 sm:$0xff]   ;;  %v4678_v27 = vld [vmem:[%s6464_s5 + $0x168] ss:$28 sps:$4 sm:$0xff]   ;;  %6669 = vst [vmem:[#allocation22_spill] sm:$0xff] %v4699_v33 }
 0x108   :  { %v408_v20 = vpop.f32.mrf.mxu0  ;;  %v4716_v53 = vld [vmem:[%s6464_s5 + $0x2b8] ss:$28 sps:$4 sm:$0xff]  }
 0x109   :  { %v4640_v19 = vpack.c.bf16 %v411_v23, %v411_v23  ;;  %v4659_v20 = vld [vmem:[%s6464_s5 + $0x164] ss:$28 sps:$4 sm:$0xff]   ;;  %6672 = vst [vmem:[#allocation25_spill] sm:$0xff] %v4716_v53 }
 0x10a   :  { %v4664_v23 = vld [vmem:[%s6464_s5 + $0x328] ss:$28 sps:$4 sm:$0xff]  }
 0x10b   :  { %1058 = vmatprep.mubr.bf16.mxu1 %v4640_v19  ;;  %1099 = vmatprep.mubr.bf16.mxu0 %v4640_v19 }
 0x10c   :  { %1059 = vmatmul.mubr.bf16.vlgmr.msra.gmra.mxu1 %v4652_v49  ;;  %1100 = vmatmul.mubr.bf16.vlgmr.msra.gmra.mxu0 %v4652_v49 }
 0x10d   :  { %1109 = vmatpush1.bf16.msra.mxu1 %v4645_v18  ;;  %3443 = vmatpush3.bf16.msra.mxu0 %v4650_v44 }
 0x10e   :  { %1140 = vmatprep.mubr.bf16.mxu1 %v4640_v19  ;;  %1181 = vmatprep.mubr.bf16.mxu0 %v4640_v19 }
 0x10f   :  { %1110 = vmatprep.subr.bf16.mxu1 %v4659_v20  ;;  %3444 = vmatprep.subr.bf16.mxu0 %v4664_v23 }
 0x111   :  { %1111 = vmatpush1.bf16.msra.mxu1 %v4673_v25  ;;  %3445 = vmatpush3.bf16.msra.mxu0 %v4678_v27 }
 0x112   :  { %1112 = vmatprep.subr.bf16.mxu1 %v4685_v28  ;;  %3446 = vmatprep.subr.bf16.mxu0 %v4690_v31  ;;  %v4723_v28 = vld [vmem:[%s6464_s5 + $0xf0] ss:$28 sps:$4 sm:$0xff]   ;;  %v4728_v31 = vld [vmem:[%s6464_s5 + $0xf8] ss:$28 sps:$4 sm:$0xff]  }
 0x113   :  { %6673 = vst [vmem:[#allocation26_spill] sm:$0xff] %v4723_v28  ;;  %6674 = vst [vmem:[#allocation27_spill] sm:$0xff] %v4728_v31 }
 0x115   :  { %1113 = vmatpush1.bf16.msra.mxu1 %v4699_v33  ;;  %3447 = vmatpush3.bf16.msra.mxu0 %v4704_v36  ;;  %v4735_v33 = vld [vmem:[%s6464_s5 + $0xbc] ss:$28 sps:$4 sm:$0xff]  }
 0x116   :  { %1114 = vmatprep.subr.bf16.mxu1 %v4711_v52  ;;  %3448 = vmatprep.subr.bf16.mxu0 %v4716_v53  ;;  %6675 = vst [vmem:[#allocation28_spill] sm:$0xff] %v4735_v33  ;;  %v4740_v36 = vld [vmem:[%s6464_s5 + $0x280] ss:$28 sps:$4 sm:$0xff]   ;;  %v4747_v52 = vld [vmem:[%s6464_s5 + $0xb8] ss:$28 sps:$4 sm:$0xff]  }
 0x117   :  { %6676 = vst [vmem:[#allocation29_spill] sm:$0xff] %v4740_v36  ;;  %6677 = vst [vmem:[#allocation30_spill] sm:$0xff] %v4747_v52  ;;  %v4752_v53 = vld [vmem:[%s6464_s5 + $0xc0] ss:$28 sps:$4 sm:$0xff]  }
 0x118   :  { %6678 = vst [vmem:[#allocation31_spill] sm:$0xff] %v4752_v53 }
 0x119   :  { %1115 = vmatpush1.bf16.msra.mxu1 %v4723_v28  ;;  %3449 = vmatpush3.bf16.msra.mxu0 %v4728_v31  ;;  %v4759_v28 = vld [vmem:[%s6464_s5 + $0x84] ss:$28 sps:$4 sm:$0xff]  }
 0x11a   :  { %1116 = vmatprep.subr.bf16.mxu1 %v4735_v33  ;;  %3450 = vmatprep.subr.bf16.mxu0 %v4740_v36  ;;  %6679 = vst [vmem:[#allocation32_spill] sm:$0xff] %v4759_v28  ;;  %v4764_v31 = vld [vmem:[%s6464_s5 + $0x248] ss:$28 sps:$4 sm:$0xff]   ;;  %v4771_v33 = vld [vmem:[%s6464_s5 + $0x80] ss:$28 sps:$4 sm:$0xff]  }
 0x11b   :  { %6680 = vst [vmem:[#allocation33_spill] sm:$0xff] %v4764_v31  ;;  %6681 = vst [vmem:[#allocation34_spill] sm:$0xff] %v4771_v33  ;;  %v4776_v36 = vld [vmem:[%s6464_s5 + $0x88] ss:$28 sps:$4 sm:$0xff]  }
 0x11c   :  { %6682 = vst [vmem:[#allocation35_spill] sm:$0xff] %v4776_v36 }
 0x11d   :  { %1117 = vmatpush1.bf16.msra.mxu1 %v4747_v52  ;;  %3451 = vmatpush3.bf16.msra.mxu0 %v4752_v53  ;;  %v4783_v52 = vld [vmem:[%s6464_s5 + $0x4c] ss:$28 sps:$4 sm:$0xff]  }
 0x11e   :  { %1118 = vmatprep.subr.bf16.mxu1 %v4759_v28  ;;  %3452 = vmatprep.subr.bf16.mxu0 %v4764_v31  ;;  %6683 = vst [vmem:[#allocation36_spill] sm:$0xff] %v4783_v52  ;;  %v4788_v53 = vld [vmem:[%s6464_s5 + $0x210] ss:$28 sps:$4 sm:$0xff]   ;;  %v4795_v28 = vld [vmem:[%s6464_s5 + $0x48] ss:$28 sps:$4 sm:$0xff]  }
 0x11f   :  { %6684 = vst [vmem:[#allocation37_spill] sm:$0xff] %v4788_v53  ;;  %6685 = vst [vmem:[#allocation38_spill] sm:$0xff] %v4795_v28  ;;  %v4800_v31 = vld [vmem:[%s6464_s5 + $0x50] ss:$28 sps:$4 sm:$0xff]  }
 0x120   :  { %6686 = vst [vmem:[#allocation39_spill] sm:$0xff] %v4800_v31 }
 0x121   :  { %1119 = vmatpush1.bf16.msra.mxu1 %v4771_v33  ;;  %3453 = vmatpush3.bf16.msra.mxu0 %v4776_v36  ;;  %v4807_v33 = vld [vmem:[%s6464_s5 + $0x14] ss:$28 sps:$4 sm:$0xff]  }
 0x122   :  { %1120 = vmatprep.subr.bf16.mxu1 %v4783_v52  ;;  %3454 = vmatprep.subr.bf16.mxu0 %v4788_v53  ;;  %6687 = vst [vmem:[#allocation40_spill] sm:$0xff] %v4807_v33  ;;  %v4812_v36 = vld [vmem:[%s6464_s5 + $0x1d8] ss:$28 sps:$4 sm:$0xff]   ;;  %v4819_v52 = vld [vmem:[%s6464_s5 + $0x10] ss:$28 sps:$4 sm:$0xff]  }
 0x123   :  { %6688 = vst [vmem:[#allocation41_spill] sm:$0xff] %v4812_v36  ;;  %v4824_v53 = vld [vmem:[%s6464_s5 + $0x18] ss:$28 sps:$4 sm:$0xff]  }
 0x124   :  { %6689 = vst [vmem:[#allocation42_spill] sm:$0xff] %v4824_v53 }
 0x125   :  { %1121 = vmatpush1.bf16.msra.mxu1 %v4795_v28  ;;  %3455 = vmatpush3.bf16.msra.mxu0 %v4800_v31  ;;  %v4831_v28 = vld [vmem:[%s6464_s5 + $0x35c] ss:$28 sps:$4 sm:$0xff]  }
 0x126   :  { %1122 = vmatprep.subr.bf16.mxu1 %v4807_v33  ;;  %3456 = vmatprep.subr.bf16.mxu0 %v4812_v36  ;;  %6690 = vst [vmem:[#allocation43_spill] sm:$0xff] %v4831_v28  ;;  %v4838_v31 = vld [vmem:[%s6464_s5 + $0x358] ss:$28 sps:$4 sm:$0xff]   ;;  %v4844_v36 = vld [vmem:[%s6464_s5 + $0x324] ss:$28 sps:$4 sm:$0xff]  }
 0x127   :  { %6691 = vst [vmem:[#allocation44_spill] sm:$0xff] %v4838_v31  ;;  %6692 = vst [vmem:[#allocation45_spill] sm:$0xff] %v4844_v36  ;;  %v4849_v33 = vld [vmem:[%s6464_s5 + $0x18c] ss:$28 sps:$4 sm:$0xff]  }
 0x128   :  { %6693 = vst [vmem:[#allocation46_spill] sm:$0xff] %v4849_v33 }
 0x129   :  { %1123 = vmatpush1.bf16.msra.mxu1 %v4819_v52  ;;  %3457 = vmatpush3.bf16.msra.mxu0 %v4824_v53  ;;  %v4862_v53 = vld [vmem:[%s6464_s5 + $0x188] ss:$28 sps:$4 sm:$0xff]  }
 0x12a   :  { %1124 = vmatprep.subr.bf16.mxu1 %v4831_v28  ;;  %1472 = vmatprep.subr.bf16.mxu0 %v4849_v33  ;;  %v4857_v28 = vld [vmem:[%s6464_s5 + $0x320] ss:$28 sps:$4 sm:$0xff]   ;;  %6695 = vst [vmem:[#allocation48_spill] sm:$0xff] %v4862_v53  ;;  %v4869_v33 = vld [vmem:[%s6464_s5 + $0x2ec] ss:$28 sps:$4 sm:$0xff]  }
 0x12b   :  { %6694 = vst [vmem:[#allocation47_spill] sm:$0xff] %v4857_v28 }
 0x12c   :  { %1182 = vmatmul.mubr.bf16.vlgmr.msra.gmra.mxu0 %v4652_v49 }
 0x12d   :  { %1125 = vmatpush2.bf16.msra.mxu1 %v4838_v31  ;;  %1473 = vmatpush1.bf16.msra.mxu0 %v4862_v53  ;;  %v4874_v31 = vld [vmem:[%s6464_s5 + $0x154] ss:$28 sps:$4 sm:$0xff]   ;;  %v4881_v53 = vld [vmem:[%s6464_s5 + $0x2e8] ss:$28 sps:$4 sm:$0xff]  }
 0x12e   :  { %1126 = vmatprep.subr.bf16.mxu1 %v4844_v36  ;;  %1474 = vmatprep.subr.bf16.mxu0 %v4874_v31  ;;  %v4888_v36 = vld [vmem:[%s6464_s5 + $0x2b4] ss:$28 sps:$4 sm:$0xff]  }
 0x131   :  { %1127 = vmatpush2.bf16.msra.mxu1 %v4857_v28  ;;  %1475 = vmatpush1.bf16.msra.mxu0 %v4205_v21  ;;  %v4895_v28 = vld [vmem:[%s6464_s5 + $0x2b0] ss:$28 sps:$4 sm:$0xff]   ;;  %v4902_v21 = vld [vmem:[%s6464_s5 + $0x27c] ss:$28 sps:$4 sm:$0xff]  }
 0x132   :  { %1128 = vmatprep.subr.bf16.mxu1 %v4869_v33  ;;  %1476 = vmatprep.subr.bf16.mxu0 %v4210_v22  ;;  %6696 = vst [vmem:[#allocation49_spill] sm:$0xff] %v4902_v21  ;;  %v4909_v22 = vld [vmem:[%s6464_s5 + $0x278] ss:$28 sps:$4 sm:$0xff]  }
 0x133   :  { %6697 = vst [vmem:[#allocation50_spill] sm:$0xff] %v4909_v22 }
 0x135   :  { %1129 = vmatpush2.bf16.msra.mxu1 %v4881_v53  ;;  %1477 = vmatpush1.bf16.msra.mxu0 %v4219_v24  ;;  %v4916_v24 = vld [vmem:[%s6464_s5 + $0x244] ss:$28 sps:$4 sm:$0xff]  }
 0x136   :  { %1130 = vmatprep.subr.bf16.mxu1 %v4888_v36  ;;  %1478 = vmatprep.subr.bf16.mxu0 %v4228_v26  ;;  %6698 = vst [vmem:[#allocation51_spill] sm:$0xff] %v4916_v24  ;;  %v4923_v26 = vld [vmem:[%s6464_s5 + $0x240] ss:$28 sps:$4 sm:$0xff]  }
 0x137   :  { %6699 = vst [vmem:[#allocation52_spill] sm:$0xff] %v4923_v26 }
 0x139   :  { %1131 = vmatpush2.bf16.msra.mxu1 %v4895_v28  ;;  %1479 = vmatpush1.bf16.msra.mxu0 %v4240_v29  ;;  %v4930_v29 = vld [vmem:[%s6464_s5 + $0x20c] ss:$28 sps:$4 sm:$0xff]  }
 0x13a   :  { %1132 = vmatprep.subr.bf16.mxu1 %v4902_v21  ;;  %1480 = vmatprep.subr.bf16.mxu0 %v4246_v30  ;;  %6700 = vst [vmem:[#allocation53_spill] sm:$0xff] %v4930_v29  ;;  %v4937_v30 = vld [vmem:[%s6464_s5 + $0x208] ss:$28 sps:$4 sm:$0xff]  }
 0x13b   :  { %6701 = vst [vmem:[#allocation54_spill] sm:$0xff] %v4937_v30 }
 0x13d   :  { %1133 = vmatpush2.bf16.msra.mxu1 %v4909_v22  ;;  %1481 = vmatpush1.bf16.msra.mxu0 %v4255_v32  ;;  %v4944_v32 = vld [vmem:[%s6464_s5 + $0x1d4] ss:$28 sps:$4 sm:$0xff]  }
 0x13e   :  { %1134 = vmatprep.subr.bf16.mxu1 %v4916_v24  ;;  %1482 = vmatprep.subr.bf16.mxu0 %v4264_v34  ;;  %6702 = vst [vmem:[#allocation55_spill] sm:$0xff] %v4944_v32  ;;  %v4951_v34 = vld [vmem:[%s6464_s5 + $0x1d0] ss:$28 sps:$4 sm:$0xff]  }
 0x13f   :  { %6703 = vst [vmem:[#allocation56_spill] sm:$0xff] %v4951_v34 }
 0x141   :  { %1135 = vmatpush2.bf16.msra.mxu1 %v4923_v26  ;;  %1483 = vmatpush1.bf16.msra.mxu0 %v4276_v37  ;;  %v3767_v37 = vld [vmem:[%s6462_s3 + $0x74] ss:$8 sps:$4 sm:$0xff]  }
 0x142   :  { %1136 = vmatprep.subr.bf16.mxu1 %v4930_v29  ;;  %1484 = vmatprep.subr.bf16.mxu0 %v4282_v38  ;;  %v3765_v38 = vld [vmem:[%s6462_s3 + $0x70] ss:$8 sps:$4 sm:$0xff]  }
 0x145   :  { %1137 = vmatpush2.bf16.msra.mxu1 %v4937_v30  ;;  %1485 = vmatpush1.bf16.msra.mxu0 %v4291_v40  ;;  %v3770_v40 = vld [vmem:[%s6462_s3 + $0x64] ss:$8 sps:$4 sm:$0xff]  }
 0x146   :  { %1138 = vmatprep.subr.bf16.mxu1 %v4944_v32  ;;  %1486 = vmatprep.subr.bf16.mxu0 %v4300_v42  ;;  %v3768_v42 = vld [vmem:[%s6462_s3 + $0x60] ss:$8 sps:$4 sm:$0xff]  }
 0x149   :  { %1139 = vmatpush2.bf16.msra.mxu1 %v4951_v34  ;;  %1487 = vmatpush1.bf16.msra.mxu0 %v4312_v45  ;;  %v3773_v45 = vld [vmem:[%s6462_s3 + $0x54] ss:$8 sps:$4 sm:$0xff]  }
 0x14a   :  { %1427 = vmatprep.subr.bf16.mxu1 %v3767_v37  ;;  %1488 = vmatprep.subr.bf16.mxu0 %v4318_v46  ;;  %v3771_v46 = vld [vmem:[%s6462_s3 + $0x50] ss:$8 sps:$4 sm:$0xff]   ;;  %v3794_v37 = vld [vmem:[%s6462_s3 + $0xe4] ss:$8 sps:$4 sm:$0xff]  }
 0x14c   :  { %1141 = vmatmul.mubr.bf16.vlgmr.msra.gmra.mxu1 %v4652_v49 }
 0x14d   :  { %1428 = vmatpush1.bf16.msra.mxu1 %v3765_v38  ;;  %1459 = vmatprep.mubr.bf16.mxu1 %v4640_v19  ;;  %v3776_v19 = vld [vmem:[%s6462_s3 + $0x44] ss:$8 sps:$4 sm:$0xff]   ;;  %v3792_v38 = vld [vmem:[%s6462_s3 + $0xe0] ss:$8 sps:$4 sm:$0xff]  }
 0x14e   :  { %1429 = vmatprep.subr.bf16.mxu1 %v3770_v40  ;;  %1489 = vmatpush2.bf16.msra.mxu0 %v4327_v48  ;;  %v3774_v48 = vld [vmem:[%s6462_s3 + $0x40] ss:$8 sps:$4 sm:$0xff]   ;;  %v3797_v40 = vld [vmem:[%s6462_s3 + $0xd4] ss:$8 sps:$4 sm:$0xff]  }
 0x14f   :  { %1490 = vmatprep.subr.bf16.mxu0 %v4336_v50  ;;  %v3779_v50 = vld [vmem:[%s6462_s3 + $0x34] ss:$8 sps:$4 sm:$0xff]  }
 0x151   :  { %1430 = vmatpush1.bf16.msra.mxu1 %v3768_v42  ;;  %v3795_v42 = vld [vmem:[%s6462_s3 + $0xd0] ss:$8 sps:$4 sm:$0xff]  }
 0x152   :  { %1431 = vmatprep.subr.bf16.mxu1 %v3773_v45  ;;  %1491 = vmatpush2.bf16.msra.mxu0 %v4351_v54  ;;  %v3777_v54 = vld [vmem:[%s6462_s3 + $0x30] ss:$8 sps:$4 sm:$0xff]   ;;  %v3800_v45 = vld [vmem:[%s6462_s3 + $0xc4] ss:$8 sps:$4 sm:$0xff]  }
 0x153   :  { %1492 = vmatprep.subr.bf16.mxu0 %v4357_v55  ;;  %v3782_v55 = vld [vmem:[%s6462_s3 + $0x24] ss:$8 sps:$4 sm:$0xff]  }
 0x155   :  { %1432 = vmatpush1.bf16.msra.mxu1 %v3771_v46  ;;  %v3798_v46 = vld [vmem:[%s6462_s3 + $0xc0] ss:$8 sps:$4 sm:$0xff]  }
 0x156   :  { %1433 = vmatprep.subr.bf16.mxu1 %v3776_v19  ;;  %1493 = vmatpush2.bf16.msra.mxu0 %v4362_v56  ;;  %v3780_v56 = vld [vmem:[%s6462_s3 + $0x20] ss:$8 sps:$4 sm:$0xff]   ;;  %v3803_v19 = vld [vmem:[%s6462_s3 + $0xb4] ss:$8 sps:$4 sm:$0xff]  }
 0x157   :  { %1494 = vmatprep.subr.bf16.mxu0 %v4372_v58  ;;  %v3785_v58 = vld [vmem:[%s6462_s3 + $0x14] ss:$8 sps:$4 sm:$0xff]  }
 0x159   :  { %1434 = vmatpush1.bf16.msra.mxu1 %v3774_v48  ;;  %v3801_v48 = vld [vmem:[%s6462_s3 + $0xb0] ss:$8 sps:$4 sm:$0xff]  }
 0x15a   :  { %1435 = vmatprep.subr.bf16.mxu1 %v3779_v50  ;;  %1495 = vmatpush2.bf16.msra.mxu0 %v4386_v61  ;;  %v3783_v61 = vld [vmem:[%s6462_s3 + $0x10] ss:$8 sps:$4 sm:$0xff]   ;;  %v3806_v50 = vld [vmem:[%s6462_s3 + $0xa4] ss:$8 sps:$4 sm:$0xff]  }
 0x15b   :  { %1496 = vmatprep.subr.bf16.mxu0 %v4396_v63  ;;  %v3788_v63 = vld [vmem:[%s6462_s3 + $0x4] ss:$8 sps:$4 sm:$0xff]  }
 0x15d   :  { %1436 = vmatpush1.bf16.msra.mxu1 %v3777_v54  ;;  %v3804_v54 = vld [vmem:[%s6462_s3 + $0xa0] ss:$8 sps:$4 sm:$0xff]  }
 0x15e   :  { %1437 = vmatprep.subr.bf16.mxu1 %v3782_v55  ;;  %1497 = vmatpush2.bf16.msra.mxu0 %v4410_v1  ;;  %v3786_v1 = vld [vmem:[%s6462_s3] ss:$8 sps:$4 sm:$0xff]   ;;  %v3809_v55 = vld [vmem:[%s6462_s3 + $0x94] ss:$8 sps:$4 sm:$0xff]  }
 0x15f   :  { %1498 = vmatprep.subr.bf16.mxu0 %v4420_v3  ;;  %v3791_v3 = vld [vmem:[%s6462_s3 + $0xf4] ss:$8 sps:$4 sm:$0xff]  }
 0x161   :  { %1438 = vmatpush1.bf16.msra.mxu1 %v3780_v56  ;;  %v3807_v56 = vld [vmem:[%s6462_s3 + $0x90] ss:$8 sps:$4 sm:$0xff]  }
 0x162   :  { %1439 = vmatprep.subr.bf16.mxu1 %v3785_v58  ;;  %1499 = vmatpush2.bf16.msra.mxu0 %v4434_v5  ;;  %v3789_v5 = vld [vmem:[%s6462_s3 + $0xf0] ss:$8 sps:$4 sm:$0xff]   ;;  %v3812_v58 = vld [vmem:[%s6462_s3 + $0x84] ss:$8 sps:$4 sm:$0xff]  }
 0x163   :  { %1500 = vmatprep.subr.bf16.mxu0 %v4570_v35 }
 0x165   :  { %1440 = vmatpush1.bf16.msra.mxu1 %v3783_v61  ;;  %v3810_v61 = vld [vmem:[%s6462_s3 + $0x80] ss:$8 sps:$4 sm:$0xff]  }
 0x166   :  { %1441 = vmatprep.subr.bf16.mxu1 %v3788_v63  ;;  %1501 = vmatpush2.bf16.msra.mxu0 %v4580_v39  ;;  %v5076_v63 = vld [vmem:[%s6464_s5 + $0x194] ss:$28 sps:$4 sm:$0xff]  }
 0x167   :  { %1502 = vmatprep.subr.bf16.mxu0 %v4594_v43  ;;  %6704 = vst [vmem:[#allocation57_spill] sm:$0xff] %v5076_v63 }
 0x169   :  { %1442 = vmatpush1.bf16.msra.mxu1 %v3786_v1 }
 0x16a   :  { %1443 = vmatprep.subr.bf16.mxu1 %v3791_v3  ;;  %1503 = vmatpush2.bf16.msra.mxu0 %v4604_v47 }
 0x16b   :  { %1554 = vmatprep.subr.bf16.mxu0 %v4618_v51 }
 0x16d   :  { %1444 = vmatpush2.bf16.msra.mxu1 %v3789_v5 }
 0x16e   :  { %1445 = vmatprep.subr.bf16.mxu1 %v3794_v37 }
 0x171   :  { %1446 = vmatpush2.bf16.msra.mxu1 %v3792_v38 }
 0x172   :  { %1447 = vmatprep.subr.bf16.mxu1 %v3797_v40 }
 0x175   :  { %1448 = vmatpush2.bf16.msra.mxu1 %v3795_v42 }
 0x176   :  { %1449 = vmatprep.subr.bf16.mxu1 %v3800_v45 }
 0x179   :  { %1450 = vmatpush2.bf16.msra.mxu1 %v3798_v46 }
 0x17a   :  { %1451 = vmatprep.subr.bf16.mxu1 %v3803_v19 }
 0x17d   :  { %1452 = vmatpush2.bf16.msra.mxu1 %v3801_v48 }
 0x17e   :  { %1453 = vmatprep.subr.bf16.mxu1 %v3806_v50 }
 0x181   :  { %1454 = vmatpush2.bf16.msra.mxu1 %v3804_v54 }
 0x182   :  { %1455 = vmatprep.subr.bf16.mxu1 %v3809_v55 }
 0x185   :  { %1456 = vmatpush2.bf16.msra.mxu1 %v3807_v56 }
 0x186   :  { %1457 = vmatprep.subr.bf16.mxu1 %v3812_v58 }
 0x189   :  { %1458 = vmatpush2.bf16.msra.mxu1 %v3810_v61 }
 0x18a   :  { %1513 = vmatprep.subr.bf16.mxu1 %v5076_v63 }
 0x18c   :  { %1460 = vmatmul.mubr.bf16.vlgmr.msra.gmra.mxu1 %v4652_v49 }
 0x18d   :  { %1514 = vmatpush1.bf16.msra.mxu1 %v4367_v57  ;;  %v6705_v57 = vld [vmem:[#allocation5_spill] sm:$0xff] }
 0x18e   :  { %1515 = vmatprep.subr.bf16.mxu1 %v4379_v60  ;;  %v6706_v60 = vld [vmem:[#allocation6_spill] sm:$0xff] }
 0x191   :  { %1516 = vmatpush1.bf16.msra.mxu1 %v4391_v62  ;;  %v6707_v62 = vld [vmem:[#allocation7_spill] sm:$0xff] }
 0x192   :  { %1517 = vmatprep.subr.bf16.mxu1 %v4401_v0  ;;  %v6708_v0 = vld [vmem:[#allocation8_spill] sm:$0xff] }
 0x195   :  { %1518 = vmatpush1.bf16.msra.mxu1 %v4415_v2  ;;  %v6709_v2 = vld [vmem:[#allocation9_spill] sm:$0xff] }
 0x196   :  { %1519 = vmatprep.subr.bf16.mxu1 %v4425_v4  ;;  %v6710_v4 = vld [vmem:[#allocation10_spill] sm:$0xff] }
 0x199   :  { %1520 = vmatpush1.bf16.msra.mxu1 %v4439_v6  ;;  %v6711_v6 = vld [vmem:[#allocation11_spill] sm:$0xff] }
 0x19a   :  { %1521 = vmatprep.subr.bf16.mxu1 %v4444_v7  ;;  %v6712_v7 = vld [vmem:[#allocation12_spill] sm:$0xff] }
 0x19d   :  { %1522 = vmatpush1.bf16.msra.mxu1 %v4453_v8  ;;  %v6713_v8 = vld [vmem:[#allocation13_spill] sm:$0xff] }
 0x19e   :  { %1523 = vmatprep.subr.bf16.mxu1 %v4458_v9  ;;  %v6714_v9 = vld [vmem:[#allocation14_spill] sm:$0xff] }
 0x1a1   :  { %1524 = vmatpush1.bf16.msra.mxu1 %v4466_v10  ;;  %v6715_v10 = vld [vmem:[#allocation15_spill] sm:$0xff] }
 0x1a2   :  { %1525 = vmatprep.subr.bf16.mxu1 %v4471_v11  ;;  %v6716_v11 = vld [vmem:[#allocation16_spill] sm:$0xff] }
 0x1a5   :  { %1526 = vmatpush1.bf16.msra.mxu1 %v4478_v12  ;;  %v425_v12 = vsub.s32 2, %v4627_v59 }
 0x1a6   :  { %1527 = vmatprep.subr.bf16.mxu1 %v4483_v13  ;;  %v429_v13 = vsub.s32 3, %v4627_v59 }
 0x1a9   :  { %1528 = vmatpush1.bf16.msra.mxu1 %v4490_v14  ;;  %v156_v14 = vld [vmem:[%s6465_s6] sm:$0x7f] }
 0x1aa   :  { %1529 = vmatprep.subr.bf16.mxu1 %v4495_v15  ;;  %v6717_v15 = vld [vmem:[#allocation17_spill] sm:$0xff]  ;;  %v5120_v1 = vrot.slane %v156_v14, %v425_v12  ;;  %v5123_v3 = vrot.slane %v156_v14, %v4636_v41  ;;  %v5125_v5 = vrot.slane %v156_v14, %v429_v13  ;;  %v433_v12 = vsub.s32 4, %v4627_v59 }
 0x1ab   :  { %v437_v13 = vsub.s32 5, %v4627_v59 }
 0x1ad   :  { %1530 = vmatpush2.bf16.msra.mxu1 %v4502_v16  ;;  %v6718_v16 = vld [vmem:[#allocation18_spill] sm:$0xff] }
 0x1ae   :  { %1531 = vmatprep.subr.bf16.mxu1 %v4507_v17  ;;  %v6719_v17 = vld [vmem:[#allocation19_spill] sm:$0xff] }
 0x1af   :  { %v5118_v49 = vrot.slane %v156_v14, %v6719_v17 }
 0x1b1   :  { %1532 = vmatpush2.bf16.msra.mxu1 %v6705_v57  ;;  %6720 = vst [vmem:[#allocation5_spill] sm:$0xff] %v5118_v49  ;;  %v441_v57 = vsub.s32 6, %v4627_v59 }
 0x1b2   :  { %1533 = vmatprep.subr.bf16.mxu1 %v6706_v60 }
 0x1b5   :  { %1534 = vmatpush2.bf16.msra.mxu1 %v6707_v62  ;;  %v5132_v62 = vrot.slane %v156_v14, %v441_v57 }
 0x1b6   :  { %1535 = vmatprep.subr.bf16.mxu1 %v6708_v0 }
 0x1b9   :  { %1536 = vmatpush2.bf16.msra.mxu1 %v6709_v2 }
 0x1ba   :  { %1537 = vmatprep.subr.bf16.mxu1 %v6710_v4 }
 0x1bd   :  { %1538 = vmatpush2.bf16.msra.mxu1 %v6711_v6 }
 0x1be   :  { %1539 = vmatprep.subr.bf16.mxu1 %v6712_v7 }
 0x1c1   :  { %1540 = vmatpush2.bf16.msra.mxu1 %v6713_v8 }
 0x1c2   :  { %1541 = vmatprep.subr.bf16.mxu1 %v6714_v9 }
 0x1c5   :  { %1542 = vmatpush2.bf16.msra.mxu1 %v6715_v10 }
 0x1c6   :  { %1543 = vmatprep.subr.bf16.mxu1 %v6716_v11 }
 0x1c9   :  { %1544 = vmatpush2.bf16.msra.mxu1 %v6717_v15 }
 0x1ca   :  { %3464 = vmatprep.subr.bf16.mxu1 %v6718_v16 }
 0x1cc   :  { %v1060_v37 = vpop.f32.mrf.mxu1  ;;  %v1101_v38 = vpop.f32.mrf.mxu0 }
 0x1cd   :  { %v1061_v45 = vadd.f32 %v1060_v37, %v5118_v49  ;;  %v1102_v46 = vadd.f32 %v1101_v38, %v5120_v1  ;;  %v5138_v37 = vrot.slane %v156_v14, %v433_v12  ;;  %v5140_v38 = vrot.slane %v156_v14, %v437_v13  ;;  %v6723_v12 = vld [vmem:[#allocation22_spill] sm:$0xff]  ;;  %v6726_v13 = vld [vmem:[#allocation25_spill] sm:$0xff] }
 0x1ce   :  { %v1062_v40 = vpop.f32.mrf.mxu1  ;;  %v1103_v42 = vpop.f32.mrf.mxu0 }
 0x1cf   :  { %v1063_v19 = vadd.f32 %v1062_v40, %v5123_v3  ;;  %v1104_v48 = vadd.f32 %v1103_v42, %v5125_v5 }
 0x1d0   :  { %v1064_v50 = vpop.f32.mrf.mxu1  ;;  %v1105_v54 = vpop.f32.mrf.mxu0 }
 0x1d1   :  { %v3422_v55 = vpack.c.bf16 %v1063_v19, %v1061_v45  ;;  %v3423_v56 = vpack.c.bf16 %v1104_v48, %v1102_v46  ;;  %v1255_v54 = vld [vmem:[%s6463_s4] sm:$0x3] }
 0x1d2   :  { %v1065_v58 = vpop.f32.mrf.mxu1  ;;  %v1106_v61 = vpop.f32.mrf.mxu0  ;;  %v1260_v59 = vrot.slane %v1255_v54, %v6719_v17 }
 0x1d3   :  { %1218 = vst [vmem:[#allocation2] sm:$0xff] %v3422_v55  ;;  %1219 = vst [vmem:[#allocation2 + $0x8] sm:$0xff] %v3423_v56  ;;  %v1264_v55 = vrot.slane %v1255_v54, %v4636_v41  ;;  %v6738_v54 = vld [vmem:[#allocation37_spill] sm:$0xff] }
 0x1ec   :  { %v3458_v60 = vpop.f32.mrf.mxu0 }
 0x1ee   :  { %v3459_v0 = vpop.f32.mrf.mxu0 }
 0x1ef   :  { %v3460_v2 = vadd.f32 %v3459_v0, %v3458_v60 }
 0x1f0   :  { %v3461_v4 = vpop.f32.mrf.mxu0 }
 0x1f1   :  { %v1184_v6 = vadd.f32 %v3460_v2, %v5132_v62 }
 0x1f2   :  { %v3462_v7 = vpop.f32.mrf.mxu0 }
 0x1f3   :  { %v3425_v8 = vpack.c.bf16 %v1184_v6, %v1184_v6  ;;  %v6721_v7 = vld [vmem:[#allocation20_spill] sm:$0xff] }
 0x1f5   :  { %1222 = vst.msk [vmem:[#allocation2 + $0x18] sm:$0xf] %vm1221_vm0, %v3425_v8  ;;  %v6722_v8 = vld [vmem:[#allocation21_spill] sm:$0xff] }
 0x20c   :  { %v1142_v40 = vpop.f32.mrf.mxu1 }
 0x20d   :  { %v1143_v45 = vadd.f32 %v1142_v40, %v5138_v37  ;;  %v6727_v40 = vld [vmem:[#allocation26_spill] sm:$0xff] }
 0x20e   :  { %v1144_v42 = vpop.f32.mrf.mxu1 }
 0x20f   :  { %v1145_v46 = vadd.f32 %v1144_v42, %v5140_v38  ;;  %v6732_v42 = vld [vmem:[#allocation31_spill] sm:$0xff] }
 0x210   :  { %v1146_v19 = vpop.f32.mrf.mxu1 }
 0x211   :  { %v3424_v48 = vpack.c.bf16 %v1145_v46, %v1143_v45  ;;  %v6733_v45 = vld [vmem:[#allocation32_spill] sm:$0xff]  ;;  %v6734_v46 = vld [vmem:[#allocation33_spill] sm:$0xff]  ;;  %v6735_v19 = vld [vmem:[#allocation34_spill] sm:$0xff] }
 0x212   :  { %v1147_v50 = vpop.f32.mrf.mxu1 }
 0x213   :  { %1220 = vst [vmem:[#allocation2 + $0x10] sm:$0xff] %v3424_v48  ;;  %v6736_v48 = vld [vmem:[#allocation35_spill] sm:$0xff]  ;;  %v6737_v50 = vld [vmem:[#allocation36_spill] sm:$0xff] }
 0x24c   :  { %v1461_v14 = vpop.f32.mrf.mxu1 }
 0x24d   :  { %v1462_v56 = vadd.f32 %v1461_v14, %v1260_v59  ;;  %v6739_v59 = vld [vmem:[#allocation38_spill] sm:$0xff]  ;;  %v6741_v14 = vld [vmem:[#allocation40_spill] sm:$0xff] }
 0x24e   :  { %v1463_v58 = vpop.f32.mrf.mxu1 }
 0x24f   :  { %v1464_v61 = vadd.f32 %v1463_v58, %v1264_v55  ;;  %v1468_v57 = vmax.f32 %v1462_v56, 0.0  ;;  %v6740_v55 = vld [vmem:[#allocation39_spill] sm:$0xff]  ;;  %v6742_v56 = vld [vmem:[#allocation41_spill] sm:$0xff]  ;;  %v6743_v58 = vld [vmem:[#allocation42_spill] sm:$0xff] }
 0x250   :  { %v1465_v60 = vpop.f32.mrf.mxu1 }
 0x251   :  { %v1469_v0 = vmax.f32 %v1464_v61, 0.0  ;;  %v5151_v6 = vpack.c.bf16 %v1468_v57, %v1468_v57  ;;  %v6744_v61 = vld [vmem:[#allocation43_spill] sm:$0xff]  ;;  %v6745_v57 = vld [vmem:[#allocation46_spill] sm:$0xff]  ;;  %v6746_v60 = vld [vmem:[#allocation44_spill] sm:$0xff] }
 0x252   :  { %v1466_v2 = vpop.f32.mrf.mxu1 }
 0x253   :  { %v5149_v4 = vpack.c.bf16 %v1469_v0, %v1469_v0  ;;  %v6747_v0 = vld [vmem:[#allocation48_spill] sm:$0xff]  ;;  %v6748_v2 = vld [vmem:[#allocation45_spill] sm:$0xff] }
 0x255   :  { %1504 = vmatprep.mubr.bf16.mxu0 %v5149_v4  ;;  %1545 = vmatprep.mubr.bf16.mxu1 %v5149_v4 }
 0x256   :  { %1505 = vmatmul.mubr.bf16.vlgmr.msra.gmra.mxu0 %v5151_v6  ;;  %1546 = vmatmul.mubr.bf16.vlgmr.msra.gmra.mxu1 %v5151_v6 }
 0x257   :  { %1555 = vmatpush1.bf16.msra.mxu0 %v4645_v18  ;;  %3465 = vmatpush3.bf16.msra.mxu1 %v4650_v44  ;;  %v6724_v18 = vld [vmem:[#allocation23_spill] sm:$0xff]  ;;  %v6725_v44 = vld [vmem:[#allocation24_spill] sm:$0xff] }
 0x258   :  { %1586 = vmatprep.mubr.bf16.mxu0 %v5149_v4  ;;  %1627 = vmatprep.mubr.bf16.mxu1 %v5149_v4 }
 0x259   :  { %1556 = vmatprep.subr.bf16.mxu0 %v4659_v20  ;;  %3466 = vmatprep.subr.bf16.mxu1 %v4664_v23  ;;  %v6728_v20 = vld [vmem:[#allocation27_spill] sm:$0xff]  ;;  %v6729_v23 = vld [vmem:[#allocation28_spill] sm:$0xff] }
 0x25b   :  { %1557 = vmatpush1.bf16.msra.mxu0 %v4673_v25  ;;  %3467 = vmatpush3.bf16.msra.mxu1 %v4678_v27  ;;  %v6730_v25 = vld [vmem:[#allocation29_spill] sm:$0xff]  ;;  %v6731_v27 = vld [vmem:[#allocation30_spill] sm:$0xff] }
 0x25c   :  { %1558 = vmatprep.subr.bf16.mxu0 %v6721_v7  ;;  %3468 = vmatprep.subr.bf16.mxu1 %v6722_v8  ;;  %v6749_v7 = vld [vmem:[#allocation47_spill] sm:$0xff]  ;;  %v5200_v8 = vld [vmem:[%s6464_s5 + $0x150] ss:$28 sps:$4 sm:$0xff]  }
 0x25f   :  { %1559 = vmatpush1.bf16.msra.mxu0 %v6723_v12  ;;  %3469 = vmatpush3.bf16.msra.mxu1 %v6724_v18  ;;  %v5207_v12 = vld [vmem:[%s6464_s5 + $0x11c] ss:$28 sps:$4 sm:$0xff]  }
 0x260   :  { %1560 = vmatprep.subr.bf16.mxu0 %v6725_v44  ;;  %3470 = vmatprep.subr.bf16.mxu1 %v6726_v13  ;;  %v5214_v18 = vld [vmem:[%s6464_s5 + $0x118] ss:$28 sps:$4 sm:$0xff]   ;;  %v5221_v44 = vld [vmem:[%s6464_s5 + $0xe4] ss:$28 sps:$4 sm:$0xff]  }
 0x261   :  { %v5228_v13 = vld [vmem:[%s6464_s5 + $0xe0] ss:$28 sps:$4 sm:$0xff]  }
 0x263   :  { %1561 = vmatpush1.bf16.msra.mxu0 %v6727_v40  ;;  %3471 = vmatpush3.bf16.msra.mxu1 %v6728_v20  ;;  %v5235_v40 = vld [vmem:[%s6464_s5 + $0xac] ss:$28 sps:$4 sm:$0xff]  }
 0x264   :  { %1562 = vmatprep.subr.bf16.mxu0 %v6729_v23  ;;  %3472 = vmatprep.subr.bf16.mxu1 %v6730_v25  ;;  %v5242_v20 = vld [vmem:[%s6464_s5 + $0xa8] ss:$28 sps:$4 sm:$0xff]  }
 0x267   :  { %1563 = vmatpush1.bf16.msra.mxu0 %v6731_v27  ;;  %3473 = vmatpush3.bf16.msra.mxu1 %v6732_v42 }
 0x268   :  { %1564 = vmatprep.subr.bf16.mxu0 %v6733_v45  ;;  %3474 = vmatprep.subr.bf16.mxu1 %v6734_v46 }
 0x26b   :  { %1565 = vmatpush1.bf16.msra.mxu0 %v6735_v19  ;;  %3475 = vmatpush3.bf16.msra.mxu1 %v6736_v48 }
 0x26c   :  { %1566 = vmatprep.subr.bf16.mxu0 %v6737_v50  ;;  %3476 = vmatprep.subr.bf16.mxu1 %v6738_v54 }
 0x26f   :  { %1567 = vmatpush1.bf16.msra.mxu0 %v6739_v59  ;;  %3477 = vmatpush3.bf16.msra.mxu1 %v6740_v55 }
 0x270   :  { %1568 = vmatprep.subr.bf16.mxu0 %v6741_v14  ;;  %3478 = vmatprep.subr.bf16.mxu1 %v6742_v56 }
 0x273   :  { %1569 = vmatpush1.bf16.msra.mxu0 %v4819_v52  ;;  %3479 = vmatpush3.bf16.msra.mxu1 %v6743_v58 }
 0x274   :  { %1570 = vmatprep.subr.bf16.mxu0 %v6744_v61  ;;  %1920 = vmatprep.subr.bf16.mxu1 %v6745_v57 }
 0x276   :  { %1628 = vmatmul.mubr.bf16.vlgmr.msra.gmra.mxu1 %v5151_v6 }
 0x277   :  { %1571 = vmatpush2.bf16.msra.mxu0 %v6746_v60  ;;  %1921 = vmatpush1.bf16.msra.mxu1 %v6747_v0 }
 0x278   :  { %1572 = vmatprep.subr.bf16.mxu0 %v6748_v2  ;;  %1922 = vmatprep.subr.bf16.mxu1 %v4874_v31 }
 0x27b   :  { %1573 = vmatpush2.bf16.msra.mxu0 %v6749_v7  ;;  %1923 = vmatpush1.bf16.msra.mxu1 %v5200_v8 }
 0x27c   :  { %1574 = vmatprep.subr.bf16.mxu0 %v4869_v33  ;;  %1924 = vmatprep.subr.bf16.mxu1 %v5207_v12 }
 0x27f   :  { %1575 = vmatpush2.bf16.msra.mxu0 %v4881_v53  ;;  %1925 = vmatpush1.bf16.msra.mxu1 %v5214_v18 }
 0x280   :  { %1576 = vmatprep.subr.bf16.mxu0 %v4888_v36  ;;  %1926 = vmatprep.subr.bf16.mxu1 %v5221_v44 }
 0x283   :  { %1577 = vmatpush2.bf16.msra.mxu0 %v4895_v28  ;;  %1927 = vmatpush1.bf16.msra.mxu1 %v5228_v13 }
 0x284   :  { %1578 = vmatprep.subr.bf16.mxu0 %v4902_v21  ;;  %1928 = vmatprep.subr.bf16.mxu1 %v5235_v40  ;;  %v5249_v21 = vld [vmem:[%s6464_s5 + $0x74] ss:$28 sps:$4 sm:$0xff]  }
 0x287   :  { %1579 = vmatpush2.bf16.msra.mxu0 %v4909_v22  ;;  %1929 = vmatpush1.bf16.msra.mxu1 %v5242_v20  ;;  %v5256_v22 = vld [vmem:[%s6464_s5 + $0x70] ss:$28 sps:$4 sm:$0xff]  }
 0x288   :  { %1580 = vmatprep.subr.bf16.mxu0 %v4916_v24  ;;  %1930 = vmatprep.subr.bf16.mxu1 %v5249_v21  ;;  %6750 = vst [vmem:[#allocation6_spill] sm:$0xff] %v5256_v22  ;;  %v5263_v24 = vld [vmem:[%s6464_s5 + $0x3c] ss:$28 sps:$4 sm:$0xff]  }
 0x28b   :  { %1581 = vmatpush2.bf16.msra.mxu0 %v4923_v26  ;;  %1931 = vmatpush1.bf16.msra.mxu1 %v5256_v22  ;;  %v5270_v26 = vld [vmem:[%s6464_s5 + $0x38] ss:$28 sps:$4 sm:$0xff]   ;;  %v5280_v22 = vld [vmem:[%s6464_s5 + $0x4] ss:$28 sps:$4 sm:$0xff]  }
 0x28c   :  { %1582 = vmatprep.subr.bf16.mxu0 %v4930_v29  ;;  %1932 = vmatprep.subr.bf16.mxu1 %v5263_v24  ;;  %6751 = vst [vmem:[#allocation7_spill] sm:$0xff] %v5270_v26  ;;  %v3815_v29 = vld [vmem:[%s6462_s3 + $0x174] ss:$8 sps:$4 sm:$0xff]   ;;  %6752 = vst [vmem:[#allocation8_spill] sm:$0xff] %v5280_v22 }
 0x28f   :  { %1583 = vmatpush2.bf16.msra.mxu0 %v4937_v30  ;;  %1933 = vmatpush1.bf16.msra.mxu1 %v5270_v26  ;;  %v3813_v30 = vld [vmem:[%s6462_s3 + $0x170] ss:$8 sps:$4 sm:$0xff]   ;;  %v3818_v26 = vld [vmem:[%s6462_s3 + $0x164] ss:$8 sps:$4 sm:$0xff]  }
 0x290   :  { %1584 = vmatprep.subr.bf16.mxu0 %v4944_v32  ;;  %1934 = vmatprep.subr.bf16.mxu1 %v5280_v22  ;;  %v5290_v32 = vld [vmem:[%s6464_s5] ss:$28 sps:$4 sm:$0xff]   ;;  %v5313_v22 = vld [vmem:[%s6464_s5 + $0x348] ss:$28 sps:$4 sm:$0xff]  }
 0x291   :  { %6753 = vst [vmem:[#allocation9_spill] sm:$0xff] %v5290_v32  ;;  %6754 = vst [vmem:[#allocation10_spill] sm:$0xff] %v5313_v22 }
 0x293   :  { %1585 = vmatpush2.bf16.msra.mxu0 %v4951_v34  ;;  %1935 = vmatpush1.bf16.msra.mxu1 %v5290_v32  ;;  %v5299_v34 = vld [vmem:[%s6464_s5 + $0x34c] ss:$28 sps:$4 sm:$0xff]   ;;  %v3821_v32 = vld [vmem:[%s6462_s3 + $0x154] ss:$8 sps:$4 sm:$0xff]  }
 0x294   :  { %1875 = vmatprep.subr.bf16.mxu0 %v3815_v29  ;;  %1936 = vmatprep.subr.bf16.mxu1 %v5299_v34  ;;  %v3816_v29 = vld [vmem:[%s6462_s3 + $0x160] ss:$8 sps:$4 sm:$0xff]  }
 0x296   :  { %1587 = vmatmul.mubr.bf16.vlgmr.msra.gmra.mxu0 %v5151_v6 }
 0x297   :  { %1876 = vmatpush1.bf16.msra.mxu0 %v3813_v30  ;;  %1907 = vmatprep.mubr.bf16.mxu0 %v5149_v4  ;;  %v5319_v30 = vld [vmem:[%s6464_s5 + $0x314] ss:$28 sps:$4 sm:$0xff]   ;;  %v3824_v4 = vld [vmem:[%s6462_s3 + $0x144] ss:$8 sps:$4 sm:$0xff]  }
 0x298   :  { %1877 = vmatprep.subr.bf16.mxu0 %v3818_v26  ;;  %1937 = vmatpush2.bf16.msra.mxu1 %v5313_v22  ;;  %6755 = vst [vmem:[#allocation11_spill] sm:$0xff] %v5319_v30  ;;  %v3819_v26 = vld [vmem:[%s6462_s3 + $0x150] ss:$8 sps:$4 sm:$0xff]  }
 0x299   :  { %1938 = vmatprep.subr.bf16.mxu1 %v5319_v30  ;;  %v5331_v22 = vld [vmem:[%s6464_s5 + $0x310] ss:$28 sps:$4 sm:$0xff]   ;;  %v3827_v30 = vld [vmem:[%s6462_s3 + $0x134] ss:$8 sps:$4 sm:$0xff]  }
 0x29a   :  { %6756 = vst [vmem:[#allocation12_spill] sm:$0xff] %v5331_v22 }
 0x29b   :  { %1878 = vmatpush1.bf16.msra.mxu0 %v3816_v29  ;;  %v5337_v29 = vld [vmem:[%s6464_s5 + $0x2dc] ss:$28 sps:$4 sm:$0xff]  }
 0x29c   :  { %1879 = vmatprep.subr.bf16.mxu0 %v3821_v32  ;;  %1939 = vmatpush2.bf16.msra.mxu1 %v5331_v22  ;;  %6757 = vst [vmem:[#allocation13_spill] sm:$0xff] %v5337_v29  ;;  %v3822_v32 = vld [vmem:[%s6462_s3 + $0x140] ss:$8 sps:$4 sm:$0xff]   ;;  %v5349_v22 = vld [vmem:[%s6464_s5 + $0x2d8] ss:$28 sps:$4 sm:$0xff]  }
 0x29d   :  { %1940 = vmatprep.subr.bf16.mxu1 %v5337_v29  ;;  %6758 = vst [vmem:[#allocation14_spill] sm:$0xff] %v5349_v22  ;;  %v3830_v29 = vld [vmem:[%s6462_s3 + $0x124] ss:$8 sps:$4 sm:$0xff]  }
 0x29f   :  { %1880 = vmatpush1.bf16.msra.mxu0 %v3819_v26  ;;  %v5355_v26 = vld [vmem:[%s6464_s5 + $0x2a4] ss:$28 sps:$4 sm:$0xff]  }
 0x2a0   :  { %1881 = vmatprep.subr.bf16.mxu0 %v3824_v4  ;;  %1941 = vmatpush2.bf16.msra.mxu1 %v5349_v22  ;;  %6759 = vst [vmem:[#allocation15_spill] sm:$0xff] %v5355_v26  ;;  %v3825_v4 = vld [vmem:[%s6462_s3 + $0x130] ss:$8 sps:$4 sm:$0xff]   ;;  %v5367_v22 = vld [vmem:[%s6464_s5 + $0x2a0] ss:$28 sps:$4 sm:$0xff]  }
 0x2a1   :  { %1942 = vmatprep.subr.bf16.mxu1 %v5355_v26  ;;  %6760 = vst [vmem:[#allocation16_spill] sm:$0xff] %v5367_v22  ;;  %v3833_v26 = vld [vmem:[%s6462_s3 + $0x114] ss:$8 sps:$4 sm:$0xff]  }
 0x2a3   :  { %1882 = vmatpush1.bf16.msra.mxu0 %v3822_v32  ;;  %v5373_v32 = vld [vmem:[%s6464_s5 + $0x26c] ss:$28 sps:$4 sm:$0xff]  }
 0x2a4   :  { %1883 = vmatprep.subr.bf16.mxu0 %v3827_v30  ;;  %1943 = vmatpush2.bf16.msra.mxu1 %v5367_v22  ;;  %6761 = vst [vmem:[#allocation17_spill] sm:$0xff] %v5373_v32  ;;  %v3828_v30 = vld [vmem:[%s6462_s3 + $0x120] ss:$8 sps:$4 sm:$0xff]  }
 0x2a5   :  { %1944 = vmatprep.subr.bf16.mxu1 %v5373_v32  ;;  %v5385_v22 = vld [vmem:[%s6464_s5 + $0x268] ss:$28 sps:$4 sm:$0xff]  }
 0x2a6   :  { %6762 = vst [vmem:[#allocation18_spill] sm:$0xff] %v5385_v22  ;;  %v3836_v32 = vld [vmem:[%s6462_s3 + $0x104] ss:$8 sps:$4 sm:$0xff]  }
 0x2a7   :  { %1884 = vmatpush1.bf16.msra.mxu0 %v3825_v4  ;;  %v5391_v4 = vld [vmem:[%s6464_s5 + $0x234] ss:$28 sps:$4 sm:$0xff]  }
 0x2a8   :  { %1885 = vmatprep.subr.bf16.mxu0 %v3830_v29  ;;  %1945 = vmatpush2.bf16.msra.mxu1 %v5385_v22  ;;  %6763 = vst [vmem:[#allocation19_spill] sm:$0xff] %v5391_v4  ;;  %v3831_v29 = vld [vmem:[%s6462_s3 + $0x110] ss:$8 sps:$4 sm:$0xff]  }
 0x2a9   :  { %1946 = vmatprep.subr.bf16.mxu1 %v5391_v4  ;;  %v5403_v22 = vld [vmem:[%s6464_s5 + $0x230] ss:$28 sps:$4 sm:$0xff]  }
 0x2aa   :  { %6764 = vst [vmem:[#allocation20_spill] sm:$0xff] %v5403_v22 }
 0x2ab   :  { %1886 = vmatpush1.bf16.msra.mxu0 %v3828_v30  ;;  %v3834_v30 = vld [vmem:[%s6462_s3 + $0x100] ss:$8 sps:$4 sm:$0xff]  }
 0x2ac   :  { %1887 = vmatprep.subr.bf16.mxu0 %v3833_v26  ;;  %1947 = vmatpush2.bf16.msra.mxu1 %v5403_v22  ;;  %v3839_v26 = vld [vmem:[%s6462_s3 + $0x1f4] ss:$8 sps:$4 sm:$0xff]   ;;  %v3837_v22 = vld [vmem:[%s6462_s3 + $0x1f0] ss:$8 sps:$4 sm:$0xff]  }
 0x2ad   :  { %1948 = vmatprep.subr.bf16.mxu1 %v4570_v35  ;;  %v3842_v35 = vld [vmem:[%s6462_s3 + $0x1e4] ss:$8 sps:$4 sm:$0xff]  }
 0x2af   :  { %1888 = vmatpush1.bf16.msra.mxu0 %v3831_v29  ;;  %v3849_v29 = vld [vmem:[%s6462_s3 + $0x1b0] ss:$8 sps:$4 sm:$0xff]  }
 0x2b0   :  { %1889 = vmatprep.subr.bf16.mxu0 %v3836_v32  ;;  %1949 = vmatpush2.bf16.msra.mxu1 %v4580_v39  ;;  %v3840_v39 = vld [vmem:[%s6462_s3 + $0x1e0] ss:$8 sps:$4 sm:$0xff]   ;;  %v3843_v32 = vld [vmem:[%s6462_s3 + $0x1d0] ss:$8 sps:$4 sm:$0xff]  }
 0x2b1   :  { %1950 = vmatprep.subr.bf16.mxu1 %v4594_v43  ;;  %v3845_v43 = vld [vmem:[%s6462_s3 + $0x1d4] ss:$8 sps:$4 sm:$0xff]  }
 0x2b3   :  { %1890 = vmatpush1.bf16.msra.mxu0 %v3834_v30  ;;  %v3854_v30 = vld [vmem:[%s6462_s3 + $0x1a4] ss:$8 sps:$4 sm:$0xff]  }
 0x2b4   :  { %1891 = vmatprep.subr.bf16.mxu0 %v3839_v26  ;;  %1951 = vmatpush2.bf16.msra.mxu1 %v4604_v47  ;;  %v3848_v47 = vld [vmem:[%s6462_s3 + $0x1c4] ss:$8 sps:$4 sm:$0xff]   ;;  %v3852_v26 = vld [vmem:[%s6462_s3 + $0x1a0] ss:$8 sps:$4 sm:$0xff]  }
 0x2b5   :  { %2002 = vmatprep.subr.bf16.mxu1 %v4618_v51  ;;  %v3846_v51 = vld [vmem:[%s6462_s3 + $0x1c0] ss:$8 sps:$4 sm:$0xff]  }
 0x2b7   :  { %1892 = vmatpush2.bf16.msra.mxu0 %v3837_v22  ;;  %v3851_v22 = vld [vmem:[%s6462_s3 + $0x1b4] ss:$8 sps:$4 sm:$0xff]  }
 0x2b8   :  { %1893 = vmatprep.subr.bf16.mxu0 %v3842_v35  ;;  %v3857_v35 = vld [vmem:[%s6462_s3 + $0x194] ss:$8 sps:$4 sm:$0xff]  }
 0x2bb   :  { %1894 = vmatpush2.bf16.msra.mxu0 %v3840_v39  ;;  %v3855_v39 = vld [vmem:[%s6462_s3 + $0x190] ss:$8 sps:$4 sm:$0xff]  }
 0x2bc   :  { %1895 = vmatprep.subr.bf16.mxu0 %v3845_v43  ;;  %v3860_v43 = vld [vmem:[%s6462_s3 + $0x184] ss:$8 sps:$4 sm:$0xff]  }
 0x2bf   :  { %1896 = vmatpush2.bf16.msra.mxu0 %v3843_v32  ;;  %v3858_v32 = vld [vmem:[%s6462_s3 + $0x180] ss:$8 sps:$4 sm:$0xff]  }
 0x2c0   :  { %1897 = vmatprep.subr.bf16.mxu0 %v3848_v47  ;;  %v5467_v47 = vld [vmem:[%s6464_s5 + $0x190] ss:$28 sps:$4 sm:$0xff]  }
 0x2c1   :  { %6765 = vst [vmem:[#allocation21_spill] sm:$0xff] %v5467_v47 }
 0x2c3   :  { %1898 = vmatpush2.bf16.msra.mxu0 %v3846_v51  ;;  %v5473_v51 = vld [vmem:[%s6464_s5 + $0x15c] ss:$28 sps:$4 sm:$0xff]  }
 0x2c4   :  { %1899 = vmatprep.subr.bf16.mxu0 %v3851_v22  ;;  %6766 = vst [vmem:[#allocation22_spill] sm:$0xff] %v5473_v51  ;;  %v5479_v22 = vld [vmem:[%s6464_s5 + $0x158] ss:$28 sps:$4 sm:$0xff]  }
 0x2c5   :  { %6767 = vst [vmem:[#allocation23_spill] sm:$0xff] %v5479_v22 }
 0x2c7   :  { %1900 = vmatpush2.bf16.msra.mxu0 %v3849_v29  ;;  %v5491_v29 = vld [vmem:[%s6464_s5 + $0x120] ss:$28 sps:$4 sm:$0xff]  }
 0x2c8   :  { %1901 = vmatprep.subr.bf16.mxu0 %v3854_v30  ;;  %6769 = vst [vmem:[#allocation25_spill] sm:$0xff] %v5491_v29  ;;  %v5497_v30 = vld [vmem:[%s6464_s5 + $0xec] ss:$28 sps:$4 sm:$0xff]  }
 0x2c9   :  { %6770 = vst [vmem:[#allocation26_spill] sm:$0xff] %v5497_v30 }
 0x2cb   :  { %1902 = vmatpush2.bf16.msra.mxu0 %v3852_v26  ;;  %v5503_v26 = vld [vmem:[%s6464_s5 + $0xe8] ss:$28 sps:$4 sm:$0xff]  }
 0x2cc   :  { %1903 = vmatprep.subr.bf16.mxu0 %v3857_v35  ;;  %6771 = vst [vmem:[#allocation27_spill] sm:$0xff] %v5503_v26  ;;  %v5509_v35 = vld [vmem:[%s6464_s5 + $0xb4] ss:$28 sps:$4 sm:$0xff]  }
 0x2cd   :  { %6772 = vst [vmem:[#allocation28_spill] sm:$0xff] %v5509_v35 }
 0x2cf   :  { %1904 = vmatpush2.bf16.msra.mxu0 %v3855_v39  ;;  %v5515_v39 = vld [vmem:[%s6464_s5 + $0xb0] ss:$28 sps:$4 sm:$0xff]  }
 0x2d0   :  { %1905 = vmatprep.subr.bf16.mxu0 %v3860_v43  ;;  %6773 = vst [vmem:[#allocation29_spill] sm:$0xff] %v5515_v39  ;;  %v5521_v43 = vld [vmem:[%s6464_s5 + $0x7c] ss:$28 sps:$4 sm:$0xff]  }
 0x2d1   :  { %6774 = vst [vmem:[#allocation30_spill] sm:$0xff] %v5521_v43 }
 0x2d3   :  { %1906 = vmatpush2.bf16.msra.mxu0 %v3858_v32  ;;  %v5527_v32 = vld [vmem:[%s6464_s5 + $0x78] ss:$28 sps:$4 sm:$0xff]  }
 0x2d4   :  { %1961 = vmatprep.subr.bf16.mxu0 %v5076_v63  ;;  %6775 = vst [vmem:[#allocation31_spill] sm:$0xff] %v5527_v32 }
 0x2d6   :  { %1908 = vmatmul.mubr.bf16.vlgmr.msra.gmra.mxu0 %v5151_v6  ;;  %v5485_v6 = vld [vmem:[%s6464_s5 + $0x124] ss:$28 sps:$4 sm:$0xff]  }
 0x2d7   :  { %1962 = vmatpush1.bf16.msra.mxu0 %v5467_v47  ;;  %6768 = vst [vmem:[#allocation24_spill] sm:$0xff] %v5485_v6 }
 0x2d8   :  { %1963 = vmatprep.subr.bf16.mxu0 %v5473_v51 }
 0x2db   :  { %1964 = vmatpush1.bf16.msra.mxu0 %v5479_v22 }
 0x2dc   :  { %1965 = vmatprep.subr.bf16.mxu0 %v5485_v6 }
 0x2df   :  { %1966 = vmatpush1.bf16.msra.mxu0 %v5491_v29 }
 0x2e0   :  { %1967 = vmatprep.subr.bf16.mxu0 %v5497_v30 }
 0x2e3   :  { %1968 = vmatpush1.bf16.msra.mxu0 %v5503_v26 }
 0x2e4   :  { %1969 = vmatprep.subr.bf16.mxu0 %v5509_v35  ;;  %v5533_v35 = vld [vmem:[%s6464_s5 + $0x44] ss:$28 sps:$4 sm:$0xff]  }
 0x2e5   :  { %6776 = vst [vmem:[#allocation32_spill] sm:$0xff] %v5533_v35 }
 0x2e7   :  { %1970 = vmatpush1.bf16.msra.mxu0 %v5515_v39  ;;  %v5539_v39 = vld [vmem:[%s6464_s5 + $0x40] ss:$28 sps:$4 sm:$0xff]  }
 0x2e8   :  { %1971 = vmatprep.subr.bf16.mxu0 %v5521_v43  ;;  %6777 = vst [vmem:[#allocation33_spill] sm:$0xff] %v5539_v39  ;;  %v5545_v43 = vld [vmem:[%s6464_s5 + $0xc] ss:$28 sps:$4 sm:$0xff]  }
 0x2e9   :  { %6778 = vst [vmem:[#allocation34_spill] sm:$0xff] %v5545_v43 }
 0x2eb   :  { %1972 = vmatpush1.bf16.msra.mxu0 %v5527_v32  ;;  %v5551_v32 = vld [vmem:[%s6464_s5 + $0x8] ss:$28 sps:$4 sm:$0xff]  }
 0x2ec   :  { %1973 = vmatprep.subr.bf16.mxu0 %v5533_v35  ;;  %6779 = vst [vmem:[#allocation35_spill] sm:$0xff] %v5551_v32  ;;  %v5557_v35 = vld [vmem:[%s6464_s5 + $0x354] ss:$28 sps:$4 sm:$0xff]  }
 0x2ed   :  { %6780 = vst [vmem:[#allocation36_spill] sm:$0xff] %v5557_v35 }
 0x2ef   :  { %1974 = vmatpush1.bf16.msra.mxu0 %v5539_v39  ;;  %v5563_v39 = vld [vmem:[%s6464_s5 + $0x350] ss:$28 sps:$4 sm:$0xff]  }
 0x2f0   :  { %1975 = vmatprep.subr.bf16.mxu0 %v5545_v43  ;;  %6781 = vst [vmem:[#allocation37_spill] sm:$0xff] %v5563_v39  ;;  %v5569_v43 = vld [vmem:[%s6464_s5 + $0x31c] ss:$28 sps:$4 sm:$0xff]  }
 0x2f1   :  { %6782 = vst [vmem:[#allocation38_spill] sm:$0xff] %v5569_v43 }
 0x2f3   :  { %1976 = vmatpush1.bf16.msra.mxu0 %v5551_v32  ;;  %v5575_v32 = vld [vmem:[%s6464_s5 + $0x318] ss:$28 sps:$4 sm:$0xff]  }
 0x2f4   :  { %1977 = vmatprep.subr.bf16.mxu0 %v5557_v35  ;;  %6783 = vst [vmem:[#allocation39_spill] sm:$0xff] %v5575_v32  ;;  %v5581_v35 = vld [vmem:[%s6464_s5 + $0x2e4] ss:$28 sps:$4 sm:$0xff]  }
 0x2f5   :  { %6784 = vst [vmem:[#allocation40_spill] sm:$0xff] %v5581_v35 }
 0x2f7   :  { %1978 = vmatpush2.bf16.msra.mxu0 %v5563_v39  ;;  %v5587_v39 = vld [vmem:[%s6464_s5 + $0x2e0] ss:$28 sps:$4 sm:$0xff]  }
 0x2f8   :  { %1979 = vmatprep.subr.bf16.mxu0 %v5569_v43  ;;  %6785 = vst [vmem:[#allocation41_spill] sm:$0xff] %v5587_v39  ;;  %v5593_v43 = vld [vmem:[%s6464_s5 + $0x2ac] ss:$28 sps:$4 sm:$0xff]  }
 0x2f9   :  { %6786 = vst [vmem:[#allocation42_spill] sm:$0xff] %v5593_v43 }
 0x2fb   :  { %1980 = vmatpush2.bf16.msra.mxu0 %v5575_v32  ;;  %v5599_v32 = vld [vmem:[%s6464_s5 + $0x2a8] ss:$28 sps:$4 sm:$0xff]  }
 0x2fc   :  { %1981 = vmatprep.subr.bf16.mxu0 %v5581_v35  ;;  %6787 = vst [vmem:[#allocation43_spill] sm:$0xff] %v5599_v32  ;;  %v5605_v35 = vld [vmem:[%s6464_s5 + $0x274] ss:$28 sps:$4 sm:$0xff]  }
 0x2fd   :  { %6788 = vst [vmem:[#allocation46_spill] sm:$0xff] %v5605_v35 }
 0x2ff   :  { %1982 = vmatpush2.bf16.msra.mxu0 %v5587_v39  ;;  %v5611_v39 = vld [vmem:[%s6464_s5 + $0x270] ss:$28 sps:$4 sm:$0xff]  }
 0x300   :  { %1983 = vmatprep.subr.bf16.mxu0 %v5593_v43  ;;  %6789 = vst [vmem:[#allocation44_spill] sm:$0xff] %v5611_v39  ;;  %v5617_v43 = vld [vmem:[%s6464_s5 + $0x23c] ss:$28 sps:$4 sm:$0xff]  }
 0x301   :  { %6790 = vst [vmem:[#allocation48_spill] sm:$0xff] %v5617_v43 }
 0x303   :  { %1984 = vmatpush2.bf16.msra.mxu0 %v5599_v32  ;;  %v5623_v32 = vld [vmem:[%s6464_s5 + $0x238] ss:$28 sps:$4 sm:$0xff]  }
 0x304   :  { %1985 = vmatprep.subr.bf16.mxu0 %v5605_v35  ;;  %6791 = vst [vmem:[#allocation45_spill] sm:$0xff] %v5623_v32 }
 0x307   :  { %1986 = vmatpush2.bf16.msra.mxu0 %v5611_v39 }
 0x308   :  { %1987 = vmatprep.subr.bf16.mxu0 %v5617_v43 }
 0x30b   :  { %1988 = vmatpush2.bf16.msra.mxu0 %v5623_v32 }
 0x30c   :  { %1989 = vmatprep.subr.bf16.mxu0 %v6714_v9 }
 0x30f   :  { %1990 = vmatpush2.bf16.msra.mxu0 %v6715_v10 }
 0x310   :  { %1991 = vmatprep.subr.bf16.mxu0 %v6716_v11 }
 0x313   :  { %1992 = vmatpush2.bf16.msra.mxu0 %v6717_v15 }
 0x314   :  { %3486 = vmatprep.subr.bf16.mxu0 %v6718_v16 }
 0x316   :  { %v1506_v39 = vpop.f32.mrf.mxu0  ;;  %v1547_v35 = vpop.f32.mrf.mxu1 }
 0x317   :  { %v1507_v30 = vadd.f32 %v1506_v39, %v5118_v49  ;;  %v1548_v29 = vadd.f32 %v1547_v35, %v5120_v1 }
 0x318   :  { %v1508_v43 = vpop.f32.mrf.mxu0  ;;  %v1549_v26 = vpop.f32.mrf.mxu1 }
 0x319   :  { %v1509_v32 = vadd.f32 %v1508_v43, %v5123_v3  ;;  %v1550_v9 = vadd.f32 %v1549_v26, %v5125_v5 }
 0x31a   :  { %v1510_v6 = vpop.f32.mrf.mxu0  ;;  %v1551_v10 = vpop.f32.mrf.mxu1 }
 0x31b   :  { %v3426_v22 = vpack.c.bf16 %v1509_v32, %v1507_v30  ;;  %v3427_v11 = vpack.c.bf16 %v1550_v9, %v1548_v29 }
 0x31c   :  { %v1511_v51 = vpop.f32.mrf.mxu0  ;;  %v1552_v15 = vpop.f32.mrf.mxu1 }
 0x31d   :  { %1665 = vst [vmem:[#allocation2 + $0x1c] sm:$0xff] %v3426_v22  ;;  %1666 = vst [vmem:[#allocation2 + $0x24] sm:$0xff] %v3427_v11 }
 0x336   :  { %v3480_v16 = vpop.f32.mrf.mxu1 }
 0x338   :  { %v3481_v47 = vpop.f32.mrf.mxu1 }
 0x339   :  { %v3482_v63 = vadd.f32 %v3481_v47, %v3480_v16 }
 0x33a   :  { %v3483_v4 = vpop.f32.mrf.mxu1 }
 0x33b   :  { %v1630_v39 = vadd.f32 %v3482_v63, %v5132_v62  ;;  %v3247_v4 = vld [vmem:[%s6463_s4 + $0x2] sm:$0x3] }
 0x33c   :  { %v3484_v49 = vpop.f32.mrf.mxu1  ;;  %v1708_v63 = vrot.slane %v3247_v4, %v6719_v17 }
 0x33d   :  { %v3429_v35 = vpack.c.bf16 %v1630_v39, %v1630_v39  ;;  %v1712_v49 = vrot.slane %v3247_v4, %v4636_v41  ;;  %v5693_v4 = vld [vmem:[%s6464_s5 + $0x12c] ss:$28 sps:$4 sm:$0xff]  }
 0x33f   :  { %1668 = vst.msk [vmem:[#allocation2 + $0x34] sm:$0xf] %vm1221_vm0, %v3429_v35 }
 0x356   :  { %v1588_v43 = vpop.f32.mrf.mxu0 }
 0x357   :  { %v1589_v6 = vadd.f32 %v1588_v43, %v5138_v37 }
 0x358   :  { %v1590_v26 = vpop.f32.mrf.mxu0 }
 0x359   :  { %v1591_v29 = vadd.f32 %v1590_v26, %v5140_v38  ;;  %v5655_v26 = vld [vmem:[%s6464_s5 + $0x198] ss:$28 sps:$4 sm:$0xff]  }
 0x35a   :  { %v1592_v51 = vpop.f32.mrf.mxu0 }
 0x35b   :  { %v3428_v30 = vpack.c.bf16 %v1591_v29, %v1589_v6  ;;  %v5661_v6 = vld [vmem:[%s6464_s5 + $0x1a0] ss:$28 sps:$4 sm:$0xff]   ;;  %v5675_v51 = vld [vmem:[%s6464_s5 + $0x328] ss:$28 sps:$4 sm:$0xff]  }
 0x35c   :  { %v1593_v22 = vpop.f32.mrf.mxu0  ;;  %v5669_v29 = vld [vmem:[%s6464_s5 + $0x164] ss:$28 sps:$4 sm:$0xff]  }
 0x35d   :  { %1667 = vst [vmem:[#allocation2 + $0x2c] sm:$0xff] %v3428_v30  ;;  %v5681_v30 = vld [vmem:[%s6464_s5 + $0x160] ss:$28 sps:$4 sm:$0xff]   ;;  %v5687_v22 = vld [vmem:[%s6464_s5 + $0x168] ss:$28 sps:$4 sm:$0xff]  }
 0x396   :  { %v1909_v47 = vpop.f32.mrf.mxu0 }
 0x397   :  { %v1910_v32 = vadd.f32 %v1909_v47, %v1708_v63  ;;  %v5699_v63 = vld [vmem:[%s6464_s5 + $0x2f0] ss:$28 sps:$4 sm:$0xff]  }
 0x398   :  { %v1911_v9 = vpop.f32.mrf.mxu0  ;;  %v5711_v47 = vld [vmem:[%s6464_s5 + $0x130] ss:$28 sps:$4 sm:$0xff]  }
 0x399   :  { %v1912_v10 = vadd.f32 %v1911_v9, %v1712_v49  ;;  %v1916_v11 = vmax.f32 %v1910_v32, 0.0  ;;  %v5705_v49 = vld [vmem:[%s6464_s5 + $0x128] ss:$28 sps:$4 sm:$0xff]   ;;  %v5717_v32 = vld [vmem:[%s6464_s5 + $0xf4] ss:$28 sps:$4 sm:$0xff]  }
 0x39a   :  { %v1913_v15 = vpop.f32.mrf.mxu0  ;;  %v5723_v9 = vld [vmem:[%s6464_s5 + $0x2b8] ss:$28 sps:$4 sm:$0xff]  }
 0x39b   :  { %v1917_v16 = vmax.f32 %v1912_v10, 0.0  ;;  %v5646_v43 = vpack.c.bf16 %v1916_v11, %v1916_v11  ;;  %v5729_v10 = vld [vmem:[%s6464_s5 + $0xf0] ss:$28 sps:$4 sm:$0xff]   ;;  %v5735_v11 = vld [vmem:[%s6464_s5 + $0xf8] ss:$28 sps:$4 sm:$0xff]  }
 0x39c   :  { %v1914_v39 = vpop.f32.mrf.mxu0  ;;  %v3873_v15 = vld [vmem:[%s6462_s3 + $0x230] ss:$8 sps:$4 sm:$0xff]  }
 0x39d   :  { %v5644_v35 = vpack.c.bf16 %v1917_v16, %v1917_v16  ;;  %v3878_v16 = vld [vmem:[%s6462_s3 + $0x224] ss:$8 sps:$4 sm:$0xff]  }
 0x39e   :  { %v6810_v39 = vld [vmem:[#allocation16_spill] sm:$0xff] }
 0x39f   :  { %1952 = vmatprep.mubr.bf16.mxu1 %v5644_v35  ;;  %1993 = vmatprep.mubr.bf16.mxu0 %v5644_v35 }
 0x3a0   :  { %1953 = vmatmul.mubr.bf16.vlgmr.msra.gmra.mxu1 %v5646_v43  ;;  %1994 = vmatmul.mubr.bf16.vlgmr.msra.gmra.mxu0 %v5646_v43 }
 0x3a1   :  { %2003 = vmatpush1.bf16.msra.mxu1 %v5655_v26  ;;  %3487 = vmatpush3.bf16.msra.mxu0 %v5661_v6 }
 0x3a2   :  { %2034 = vmatprep.mubr.bf16.mxu1 %v5644_v35  ;;  %2075 = vmatprep.mubr.bf16.mxu0 %v5644_v35 }
 0x3a3   :  { %2004 = vmatprep.subr.bf16.mxu1 %v5669_v29  ;;  %3488 = vmatprep.subr.bf16.mxu0 %v5675_v51 }
 0x3a5   :  { %2005 = vmatpush1.bf16.msra.mxu1 %v5681_v30  ;;  %3489 = vmatpush3.bf16.msra.mxu0 %v5687_v22 }
 0x3a6   :  { %2006 = vmatprep.subr.bf16.mxu1 %v5693_v4  ;;  %3490 = vmatprep.subr.bf16.mxu0 %v5699_v63 }
 0x3a9   :  { %2007 = vmatpush1.bf16.msra.mxu1 %v5705_v49  ;;  %3491 = vmatpush3.bf16.msra.mxu0 %v5711_v47 }
 0x3aa   :  { %2008 = vmatprep.subr.bf16.mxu1 %v5717_v32  ;;  %3492 = vmatprep.subr.bf16.mxu0 %v5723_v9 }
 0x3ad   :  { %2009 = vmatpush1.bf16.msra.mxu1 %v5729_v10  ;;  %3493 = vmatpush3.bf16.msra.mxu0 %v5735_v11 }
 0x3ae   :  { %2010 = vmatprep.subr.bf16.mxu1 %v6729_v23  ;;  %3494 = vmatprep.subr.bf16.mxu0 %v6730_v25  ;;  %v6797_v23 = vld [vmem:[#allocation53_spill] sm:$0xff]  ;;  %v6799_v25 = vld [vmem:[#allocation7_spill] sm:$0xff] }
 0x3b1   :  { %2011 = vmatpush1.bf16.msra.mxu1 %v6731_v27  ;;  %3495 = vmatpush3.bf16.msra.mxu0 %v6732_v42  ;;  %v6800_v27 = vld [vmem:[#allocation55_spill] sm:$0xff] }
 0x3b2   :  { %2012 = vmatprep.subr.bf16.mxu1 %v6733_v45  ;;  %3496 = vmatprep.subr.bf16.mxu0 %v6734_v46  ;;  %v3863_v42 = vld [vmem:[%s6462_s3 + $0x274] ss:$8 sps:$4 sm:$0xff]   ;;  %v6801_v45 = vld [vmem:[#allocation8_spill] sm:$0xff] }
 0x3b3   :  { %v6802_v46 = vld [vmem:[#allocation56_spill] sm:$0xff] }
 0x3b5   :  { %2013 = vmatpush1.bf16.msra.mxu1 %v6735_v19  ;;  %3497 = vmatpush3.bf16.msra.mxu0 %v6736_v48  ;;  %v3861_v19 = vld [vmem:[%s6462_s3 + $0x270] ss:$8 sps:$4 sm:$0xff]  }
 0x3b6   :  { %2014 = vmatprep.subr.bf16.mxu1 %v6737_v50  ;;  %3498 = vmatprep.subr.bf16.mxu0 %v6738_v54  ;;  %v6803_v48 = vld [vmem:[#allocation9_spill] sm:$0xff]  ;;  %v3864_v54 = vld [vmem:[%s6462_s3 + $0x260] ss:$8 sps:$4 sm:$0xff]  }
 0x3b7   :  { %v3866_v50 = vld [vmem:[%s6462_s3 + $0x264] ss:$8 sps:$4 sm:$0xff]  }
 0x3b9   :  { %2015 = vmatpush1.bf16.msra.mxu1 %v6739_v59  ;;  %3499 = vmatpush3.bf16.msra.mxu0 %v6740_v55  ;;  %v3869_v59 = vld [vmem:[%s6462_s3 + $0x254] ss:$8 sps:$4 sm:$0xff]  }
 0x3ba   :  { %2016 = vmatprep.subr.bf16.mxu1 %v6741_v14  ;;  %3500 = vmatprep.subr.bf16.mxu0 %v6742_v56  ;;  %v6804_v55 = vld [vmem:[#allocation10_spill] sm:$0xff]  ;;  %v6805_v14 = vld [vmem:[#allocation11_spill] sm:$0xff] }
 0x3bb   :  { %v3867_v56 = vld [vmem:[%s6462_s3 + $0x250] ss:$8 sps:$4 sm:$0xff]  }
 0x3bd   :  { %2017 = vmatpush1.bf16.msra.mxu1 %v4819_v52  ;;  %3501 = vmatpush3.bf16.msra.mxu0 %v6743_v58  ;;  %v6793_v52 = vld [vmem:[#allocation50_spill] sm:$0xff]  ;;  %v3872_v58 = vld [vmem:[%s6462_s3 + $0x244] ss:$8 sps:$4 sm:$0xff]  }
 0x3be   :  { %2018 = vmatprep.subr.bf16.mxu1 %v6744_v61  ;;  %2368 = vmatprep.subr.bf16.mxu0 %v6745_v57  ;;  %v6806_v61 = vld [vmem:[#allocation12_spill] sm:$0xff]  ;;  %v6807_v57 = vld [vmem:[#allocation13_spill] sm:$0xff] }
 0x3c0   :  { %2076 = vmatmul.mubr.bf16.vlgmr.msra.gmra.mxu0 %v5646_v43 }
 0x3c1   :  { %2019 = vmatpush2.bf16.msra.mxu1 %v6746_v60  ;;  %2369 = vmatpush1.bf16.msra.mxu0 %v6747_v0  ;;  %v3870_v60 = vld [vmem:[%s6462_s3 + $0x240] ss:$8 sps:$4 sm:$0xff]   ;;  %v3875_v0 = vld [vmem:[%s6462_s3 + $0x234] ss:$8 sps:$4 sm:$0xff]  }
 0x3c2   :  { %2020 = vmatprep.subr.bf16.mxu1 %v6748_v2  ;;  %2370 = vmatprep.subr.bf16.mxu0 %v4874_v31  ;;  %v6792_v31 = vld [vmem:[#allocation49_spill] sm:$0xff]  ;;  %v6808_v2 = vld [vmem:[#allocation14_spill] sm:$0xff] }
 0x3c5   :  { %2021 = vmatpush2.bf16.msra.mxu1 %v6749_v7  ;;  %2371 = vmatpush1.bf16.msra.mxu0 %v5200_v8  ;;  %v6809_v7 = vld [vmem:[#allocation15_spill] sm:$0xff] }
 0x3c6   :  { %2022 = vmatprep.subr.bf16.mxu1 %v4869_v33  ;;  %2372 = vmatprep.subr.bf16.mxu0 %v5207_v12  ;;  %v6794_v33 = vld [vmem:[#allocation51_spill] sm:$0xff] }
 0x3c9   :  { %2023 = vmatpush2.bf16.msra.mxu1 %v4881_v53  ;;  %2373 = vmatpush1.bf16.msra.mxu0 %v5214_v18  ;;  %v6795_v53 = vld [vmem:[#allocation52_spill] sm:$0xff] }
 0x3ca   :  { %2024 = vmatprep.subr.bf16.mxu1 %v4888_v36  ;;  %2374 = vmatprep.subr.bf16.mxu0 %v5221_v44  ;;  %v6796_v36 = vld [vmem:[#allocation6_spill] sm:$0xff] }
 0x3cd   :  { %2025 = vmatpush2.bf16.msra.mxu1 %v4895_v28  ;;  %2375 = vmatpush1.bf16.msra.mxu0 %v5228_v13  ;;  %v6798_v28 = vld [vmem:[#allocation54_spill] sm:$0xff] }
 0x3ce   :  { %2026 = vmatprep.subr.bf16.mxu1 %v6792_v31  ;;  %2376 = vmatprep.subr.bf16.mxu0 %v5235_v40  ;;  %v3876_v31 = vld [vmem:[%s6462_s3 + $0x220] ss:$8 sps:$4 sm:$0xff]  }
 0x3d1   :  { %2027 = vmatpush2.bf16.msra.mxu1 %v6793_v52  ;;  %2377 = vmatpush1.bf16.msra.mxu0 %v5242_v20  ;;  %v3881_v52 = vld [vmem:[%s6462_s3 + $0x214] ss:$8 sps:$4 sm:$0xff]  }
 0x3d2   :  { %2028 = vmatprep.subr.bf16.mxu1 %v6794_v33  ;;  %2378 = vmatprep.subr.bf16.mxu0 %v5249_v21  ;;  %v6812_v33 = vld [vmem:[#allocation18_spill] sm:$0xff] }
 0x3d5   :  { %2029 = vmatpush2.bf16.msra.mxu1 %v6795_v53  ;;  %2379 = vmatpush1.bf16.msra.mxu0 %v6796_v36  ;;  %v6813_v53 = vld [vmem:[#allocation19_spill] sm:$0xff] }
 0x3d6   :  { %2030 = vmatprep.subr.bf16.mxu1 %v6797_v23  ;;  %2380 = vmatprep.subr.bf16.mxu0 %v5263_v24  ;;  %v3879_v23 = vld [vmem:[%s6462_s3 + $0x210] ss:$8 sps:$4 sm:$0xff]  }
 0x3d9   :  { %2031 = vmatpush2.bf16.msra.mxu1 %v6798_v28  ;;  %2381 = vmatpush1.bf16.msra.mxu0 %v6799_v25  ;;  %v3884_v28 = vld [vmem:[%s6462_s3 + $0x204] ss:$8 sps:$4 sm:$0xff]  }
 0x3da   :  { %2032 = vmatprep.subr.bf16.mxu1 %v6800_v27  ;;  %2382 = vmatprep.subr.bf16.mxu0 %v6801_v45  ;;  %v6814_v27 = vld [vmem:[#allocation20_spill] sm:$0xff] }
 0x3dd   :  { %2033 = vmatpush2.bf16.msra.mxu1 %v6802_v46  ;;  %2383 = vmatpush1.bf16.msra.mxu0 %v6803_v48  ;;  %v3882_v46 = vld [vmem:[%s6462_s3 + $0x200] ss:$8 sps:$4 sm:$0xff]  }
 0x3de   :  { %2323 = vmatprep.subr.bf16.mxu1 %v3863_v42  ;;  %2384 = vmatprep.subr.bf16.mxu0 %v5299_v34  ;;  %v5849_v42 = vld [vmem:[%s6464_s5 + $0x1fc] ss:$28 sps:$4 sm:$0xff]  }
 0x3df   :  { %6815 = vst [vmem:[#allocation47_spill] sm:$0xff] %v5849_v42 }
 0x3e0   :  { %2035 = vmatmul.mubr.bf16.vlgmr.msra.gmra.mxu1 %v5646_v43 }
 0x3e1   :  { %2324 = vmatpush1.bf16.msra.mxu1 %v3861_v19  ;;  %2355 = vmatprep.mubr.bf16.mxu1 %v5644_v35  ;;  %v6811_v35 = vld [vmem:[#allocation17_spill] sm:$0xff]  ;;  %v3887_v19 = vld [vmem:[%s6462_s3 + $0x2f4] ss:$8 sps:$4 sm:$0xff]  }
 0x3e2   :  { %2325 = vmatprep.subr.bf16.mxu1 %v3866_v50  ;;  %2385 = vmatpush2.bf16.msra.mxu0 %v6804_v55  ;;  %v5861_v50 = vld [vmem:[%s6464_s5 + $0x1f8] ss:$28 sps:$4 sm:$0xff]  }
 0x3e3   :  { %2386 = vmatprep.subr.bf16.mxu0 %v6805_v14  ;;  %6816 = vst [vmem:[#allocation49_spill] sm:$0xff] %v5861_v50 }
 0x3e5   :  { %2326 = vmatpush1.bf16.msra.mxu1 %v3864_v54  ;;  %v5867_v54 = vld [vmem:[%s6464_s5 + $0x1c4] ss:$28 sps:$4 sm:$0xff]  }
 0x3e6   :  { %2327 = vmatprep.subr.bf16.mxu1 %v3869_v59  ;;  %2387 = vmatpush2.bf16.msra.mxu0 %v6806_v61  ;;  %6817 = vst [vmem:[#allocation50_spill] sm:$0xff] %v5867_v54  ;;  %v3885_v59 = vld [vmem:[%s6462_s3 + $0x2f0] ss:$8 sps:$4 sm:$0xff]  }
 0x3e7   :  { %2388 = vmatprep.subr.bf16.mxu0 %v6807_v57 }
 0x3e9   :  { %2328 = vmatpush1.bf16.msra.mxu1 %v3867_v56  ;;  %v3890_v56 = vld [vmem:[%s6462_s3 + $0x2e4] ss:$8 sps:$4 sm:$0xff]  }
 0x3ea   :  { %2329 = vmatprep.subr.bf16.mxu1 %v3872_v58  ;;  %2389 = vmatpush2.bf16.msra.mxu0 %v6808_v2  ;;  %v5879_v58 = vld [vmem:[%s6464_s5 + $0x1c0] ss:$28 sps:$4 sm:$0xff]  }
 0x3eb   :  { %2390 = vmatprep.subr.bf16.mxu0 %v6809_v7  ;;  %6818 = vst [vmem:[#allocation51_spill] sm:$0xff] %v5879_v58 }
 0x3ed   :  { %2330 = vmatpush1.bf16.msra.mxu1 %v3870_v60  ;;  %v5885_v60 = vld [vmem:[%s6464_s5 + $0x19c] ss:$28 sps:$4 sm:$0xff]  }
 0x3ee   :  { %2331 = vmatprep.subr.bf16.mxu1 %v3875_v0  ;;  %2391 = vmatpush2.bf16.msra.mxu0 %v6810_v39  ;;  %6819 = vst [vmem:[#allocation52_spill] sm:$0xff] %v5885_v60  ;;  %v3888_v0 = vld [vmem:[%s6462_s3 + $0x2e0] ss:$8 sps:$4 sm:$0xff]  }
 0x3ef   :  { %2392 = vmatprep.subr.bf16.mxu0 %v6811_v35 }
 0x3f1   :  { %2332 = vmatpush1.bf16.msra.mxu1 %v3873_v15  ;;  %v3893_v15 = vld [vmem:[%s6462_s3 + $0x2d4] ss:$8 sps:$4 sm:$0xff]  }
 0x3f2   :  { %2333 = vmatprep.subr.bf16.mxu1 %v3878_v16  ;;  %2393 = vmatpush2.bf16.msra.mxu0 %v6812_v33  ;;  %v3891_v16 = vld [vmem:[%s6462_s3 + $0x2d0] ss:$8 sps:$4 sm:$0xff]  }
 0x3f3   :  { %2394 = vmatprep.subr.bf16.mxu0 %v6813_v53 }
 0x3f5   :  { %2334 = vmatpush1.bf16.msra.mxu1 %v3876_v31  ;;  %v3896_v31 = vld [vmem:[%s6462_s3 + $0x2c4] ss:$8 sps:$4 sm:$0xff]  }
 0x3f6   :  { %2335 = vmatprep.subr.bf16.mxu1 %v3881_v52  ;;  %2395 = vmatpush2.bf16.msra.mxu0 %v6814_v27  ;;  %v3894_v52 = vld [vmem:[%s6462_s3 + $0x2c0] ss:$8 sps:$4 sm:$0xff]  }
 0x3f7   :  { %2396 = vmatprep.subr.bf16.mxu0 %v5849_v42 }
 0x3f9   :  { %2336 = vmatpush1.bf16.msra.mxu1 %v3879_v23  ;;  %v3899_v23 = vld [vmem:[%s6462_s3 + $0x2b4] ss:$8 sps:$4 sm:$0xff]  }
 0x3fa   :  { %2337 = vmatprep.subr.bf16.mxu1 %v3884_v28  ;;  %2397 = vmatpush2.bf16.msra.mxu0 %v5861_v50  ;;  %v3897_v28 = vld [vmem:[%s6462_s3 + $0x2b0] ss:$8 sps:$4 sm:$0xff]  }
 0x3fb   :  { %2398 = vmatprep.subr.bf16.mxu0 %v5867_v54 }
 0x3fd   :  { %2338 = vmatpush1.bf16.msra.mxu1 %v3882_v46  ;;  %v3902_v46 = vld [vmem:[%s6462_s3 + $0x2a4] ss:$8 sps:$4 sm:$0xff]  }
 0x3fe   :  { %2339 = vmatprep.subr.bf16.mxu1 %v3887_v19  ;;  %2399 = vmatpush2.bf16.msra.mxu0 %v5879_v58  ;;  %v3900_v19 = vld [vmem:[%s6462_s3 + $0x2a0] ss:$8 sps:$4 sm:$0xff]  }
 0x3ff   :  { %2450 = vmatprep.subr.bf16.mxu0 %v5885_v60 }
 0x401   :  { %2340 = vmatpush2.bf16.msra.mxu1 %v3885_v59  ;;  %v3905_v59 = vld [vmem:[%s6462_s3 + $0x294] ss:$8 sps:$4 sm:$0xff]  }
 0x402   :  { %2341 = vmatprep.subr.bf16.mxu1 %v3890_v56  ;;  %v3903_v56 = vld [vmem:[%s6462_s3 + $0x290] ss:$8 sps:$4 sm:$0xff]  }
 0x405   :  { %2342 = vmatpush2.bf16.msra.mxu1 %v3888_v0  ;;  %v3908_v0 = vld [vmem:[%s6462_s3 + $0x284] ss:$8 sps:$4 sm:$0xff]  }
 0x406   :  { %2343 = vmatprep.subr.bf16.mxu1 %v3893_v15  ;;  %v3906_v15 = vld [vmem:[%s6462_s3 + $0x280] ss:$8 sps:$4 sm:$0xff]  }
 0x409   :  { %2344 = vmatpush2.bf16.msra.mxu1 %v3891_v16  ;;  %v6820_v16 = vld [vmem:[#allocation57_spill] sm:$0xff] }
 0x40a   :  { %2345 = vmatprep.subr.bf16.mxu1 %v3896_v31  ;;  %v6821_v31 = vld [vmem:[#allocation21_spill] sm:$0xff] }
 0x40d   :  { %2346 = vmatpush2.bf16.msra.mxu1 %v3894_v52  ;;  %v6822_v52 = vld [vmem:[#allocation22_spill] sm:$0xff] }
 0x40e   :  { %2347 = vmatprep.subr.bf16.mxu1 %v3899_v23  ;;  %v6823_v23 = vld [vmem:[#allocation23_spill] sm:$0xff] }
 0x411   :  { %2348 = vmatpush2.bf16.msra.mxu1 %v3897_v28  ;;  %v6824_v28 = vld [vmem:[#allocation24_spill] sm:$0xff] }
 0x412   :  { %2349 = vmatprep.subr.bf16.mxu1 %v3902_v46  ;;  %v6825_v46 = vld [vmem:[#allocation25_spill] sm:$0xff] }
 0x415   :  { %2350 = vmatpush2.bf16.msra.mxu1 %v3900_v19  ;;  %v6826_v19 = vld [vmem:[#allocation26_spill] sm:$0xff] }
 0x416   :  { %2351 = vmatprep.subr.bf16.mxu1 %v3905_v59  ;;  %v6827_v59 = vld [vmem:[#allocation27_spill] sm:$0xff] }
 0x419   :  { %2352 = vmatpush2.bf16.msra.mxu1 %v3903_v56  ;;  %v6828_v56 = vld [vmem:[#allocation28_spill] sm:$0xff] }
 0x41a   :  { %2353 = vmatprep.subr.bf16.mxu1 %v3908_v0  ;;  %v6829_v0 = vld [vmem:[#allocation29_spill] sm:$0xff] }
 0x41d   :  { %2354 = vmatpush2.bf16.msra.mxu1 %v3906_v15  ;;  %v6830_v15 = vld [vmem:[#allocation30_spill] sm:$0xff] }
 0x41e   :  { %2409 = vmatprep.subr.bf16.mxu1 %v6820_v16  ;;  %v6832_v16 = vld [vmem:[#allocation32_spill] sm:$0xff] }
 0x420   :  { %2356 = vmatmul.mubr.bf16.vlgmr.msra.gmra.mxu1 %v5646_v43  ;;  %v6831_v43 = vld [vmem:[#allocation31_spill] sm:$0xff] }
 0x421   :  { %2410 = vmatpush1.bf16.msra.mxu1 %v6821_v31 }
 0x422   :  { %2411 = vmatprep.subr.bf16.mxu1 %v6822_v52  ;;  %v6833_v52 = vld [vmem:[#allocation33_spill] sm:$0xff] }
 0x425   :  { %2412 = vmatpush1.bf16.msra.mxu1 %v6823_v23  ;;  %v6834_v23 = vld [vmem:[#allocation34_spill] sm:$0xff] }
 0x426   :  { %2413 = vmatprep.subr.bf16.mxu1 %v6824_v28  ;;  %v6835_v28 = vld [vmem:[#allocation35_spill] sm:$0xff] }
 0x429   :  { %2414 = vmatpush1.bf16.msra.mxu1 %v6825_v46  ;;  %v6836_v46 = vld [vmem:[#allocation36_spill] sm:$0xff] }
 0x42a   :  { %2415 = vmatprep.subr.bf16.mxu1 %v6826_v19  ;;  %v6837_v19 = vld [vmem:[#allocation37_spill] sm:$0xff] }
 0x42d   :  { %2416 = vmatpush1.bf16.msra.mxu1 %v6827_v59  ;;  %v6838_v59 = vld [vmem:[#allocation38_spill] sm:$0xff] }
 0x42e   :  { %2417 = vmatprep.subr.bf16.mxu1 %v6828_v56  ;;  %v6839_v56 = vld [vmem:[#allocation39_spill] sm:$0xff] }
 0x431   :  { %2418 = vmatpush1.bf16.msra.mxu1 %v6829_v0  ;;  %v6840_v0 = vld [vmem:[#allocation40_spill] sm:$0xff] }
 0x432   :  { %2419 = vmatprep.subr.bf16.mxu1 %v6830_v15  ;;  %v6841_v15 = vld [vmem:[#allocation41_spill] sm:$0xff] }
 0x435   :  { %2420 = vmatpush1.bf16.msra.mxu1 %v6831_v43  ;;  %v6842_v43 = vld [vmem:[#allocation42_spill] sm:$0xff] }
 0x436   :  { %2421 = vmatprep.subr.bf16.mxu1 %v6832_v16  ;;  %v6843_v16 = vld [vmem:[#allocation43_spill] sm:$0xff] }
 0x439   :  { %2422 = vmatpush1.bf16.msra.mxu1 %v6833_v52  ;;  %v6844_v52 = vld [vmem:[#allocation46_spill] sm:$0xff] }
 0x43a   :  { %2423 = vmatprep.subr.bf16.mxu1 %v6834_v23  ;;  %v6845_v23 = vld [vmem:[#allocation44_spill] sm:$0xff] }
 0x43d   :  { %2424 = vmatpush1.bf16.msra.mxu1 %v6835_v28  ;;  %v6846_v28 = vld [vmem:[#allocation48_spill] sm:$0xff] }
 0x43e   :  { %2425 = vmatprep.subr.bf16.mxu1 %v6836_v46  ;;  %v6847_v46 = vld [vmem:[#allocation45_spill] sm:$0xff] }
 0x441   :  { %2426 = vmatpush2.bf16.msra.mxu1 %v6837_v19 }
 0x442   :  { %2427 = vmatprep.subr.bf16.mxu1 %v6838_v59 }
 0x445   :  { %2428 = vmatpush2.bf16.msra.mxu1 %v6839_v56  ;;  %v5959_v56 = vld [vmem:[%s6464_s5 + $0x204] ss:$28 sps:$4 sm:$0xff]  }
 0x446   :  { %2429 = vmatprep.subr.bf16.mxu1 %v6840_v0  ;;  %6848 = vst [vmem:[#allocation6_spill] sm:$0xff] %v5959_v56 }
 0x449   :  { %2430 = vmatpush2.bf16.msra.mxu1 %v6841_v15  ;;  %v6853_v15 = vld [vmem:[#allocation5_spill] sm:$0xff] }
 0x44a   :  { %2431 = vmatprep.subr.bf16.mxu1 %v6842_v43  ;;  %v5965_v43 = vld [vmem:[%s6464_s5 + $0x200] ss:$28 sps:$4 sm:$0xff]  }
 0x44b   :  { %6849 = vst [vmem:[#allocation53_spill] sm:$0xff] %v5965_v43 }
 0x44d   :  { %2432 = vmatpush2.bf16.msra.mxu1 %v6843_v16 }
 0x44e   :  { %2433 = vmatprep.subr.bf16.mxu1 %v6844_v52 }
 0x451   :  { %2434 = vmatpush2.bf16.msra.mxu1 %v6845_v23 }
 0x452   :  { %2435 = vmatprep.subr.bf16.mxu1 %v6846_v28  ;;  %v5971_v28 = vld [vmem:[%s6464_s5 + $0x1cc] ss:$28 sps:$4 sm:$0xff]  }
 0x453   :  { %6850 = vst [vmem:[#allocation54_spill] sm:$0xff] %v5971_v28 }
 0x455   :  { %2436 = vmatpush2.bf16.msra.mxu1 %v6847_v46  ;;  %v5977_v46 = vld [vmem:[%s6464_s5 + $0x1c8] ss:$28 sps:$4 sm:$0xff]  }
 0x456   :  { %2437 = vmatprep.subr.bf16.mxu1 %v5959_v56  ;;  %6851 = vst [vmem:[#allocation7_spill] sm:$0xff] %v5977_v46  ;;  %v5983_v56 = vld [vmem:[%s6464_s5 + $0x360] ss:$28 sps:$4 sm:$0xff]  }
 0x457   :  { %6852 = vst [vmem:[#allocation55_spill] sm:$0xff] %v5983_v56 }
 0x459   :  { %2438 = vmatpush2.bf16.msra.mxu1 %v5965_v43 }
 0x45a   :  { %2439 = vmatprep.subr.bf16.mxu1 %v5971_v28 }
 0x45d   :  { %2440 = vmatpush2.bf16.msra.mxu1 %v5977_v46 }
 0x45e   :  { %3508 = vmatprep.subr.bf16.mxu1 %v5983_v56 }
 0x460   :  { %v1954_v43 = vpop.f32.mrf.mxu1  ;;  %v1995_v23 = vpop.f32.mrf.mxu0 }
 0x461   :  { %v1955_v28 = vadd.f32 %v1954_v43, %v6853_v15  ;;  %v1996_v0 = vadd.f32 %v1995_v23, %v5120_v1 }
 0x462   :  { %v1956_v52 = vpop.f32.mrf.mxu1  ;;  %v1997_v16 = vpop.f32.mrf.mxu0 }
 0x463   :  { %v1957_v59 = vadd.f32 %v1956_v52, %v5123_v3  ;;  %v1998_v19 = vadd.f32 %v1997_v16, %v5125_v5 }
 0x464   :  { %v1958_v46 = vpop.f32.mrf.mxu1  ;;  %v1999_v31 = vpop.f32.mrf.mxu0 }
 0x465   :  { %v3430_v60 = vpack.c.bf16 %v1957_v59, %v1955_v28  ;;  %v3431_v58 = vpack.c.bf16 %v1998_v19, %v1996_v0 }
 0x466   :  { %v1959_v54 = vpop.f32.mrf.mxu1  ;;  %v2000_v50 = vpop.f32.mrf.mxu0 }
 0x467   :  { %2113 = vst [vmem:[#allocation2 + $0x38] sm:$0xff] %v3430_v60  ;;  %2114 = vst [vmem:[#allocation2 + $0x40] sm:$0xff] %v3431_v58 }
 0x480   :  { %v3502_v56 = vpop.f32.mrf.mxu0 }
 0x482   :  { %v3503_v42 = vpop.f32.mrf.mxu0 }
 0x483   :  { %v3504_v27 = vadd.f32 %v3503_v42, %v3502_v56 }
 0x484   :  { %v3505_v53 = vpop.f32.mrf.mxu0 }
 0x485   :  { %v2078_v43 = vadd.f32 %v3504_v27, %v5132_v62  ;;  %v3316_v53 = vld [vmem:[%s6463_s4 + $0x4] sm:$0x3] }
 0x486   :  { %v3506_v15 = vpop.f32.mrf.mxu0  ;;  %v2156_v27 = vrot.slane %v3316_v53, %v6719_v17  ;;  %v2160_v42 = vrot.slane %v3316_v53, %v4636_v41  ;;  %v6062_v53 = vld [vmem:[%s6464_s5 + $0x80] ss:$28 sps:$4 sm:$0xff]  }
 0x487   :  { %v3433_v23 = vpack.c.bf16 %v2078_v43, %v2078_v43 }
 0x489   :  { %2116 = vst.msk [vmem:[#allocation2 + $0x50] sm:$0xf] %vm1221_vm0, %v3433_v23 }
 0x4a0   :  { %v2036_v52 = vpop.f32.mrf.mxu1 }
 0x4a1   :  { %v2037_v31 = vadd.f32 %v2036_v52, %v5138_v37 }
 0x4a2   :  { %v2038_v16 = vpop.f32.mrf.mxu1 }
 0x4a3   :  { %v2039_v28 = vadd.f32 %v2038_v16, %v5140_v38  ;;  %v6026_v16 = vld [vmem:[%s6464_s5 + $0xbc] ss:$28 sps:$4 sm:$0xff]  }
 0x4a4   :  { %v2040_v54 = vpop.f32.mrf.mxu1 }
 0x4a5   :  { %v3432_v50 = vpack.c.bf16 %v2039_v28, %v2037_v31  ;;  %v6032_v31 = vld [vmem:[%s6464_s5 + $0x280] ss:$28 sps:$4 sm:$0xff]   ;;  %v6038_v28 = vld [vmem:[%s6464_s5 + $0xb8] ss:$28 sps:$4 sm:$0xff]  }
 0x4a6   :  { %v2041_v60 = vpop.f32.mrf.mxu1  ;;  %v6044_v54 = vld [vmem:[%s6464_s5 + $0xc0] ss:$28 sps:$4 sm:$0xff]  }
 0x4a7   :  { %2115 = vst [vmem:[#allocation2 + $0x48] sm:$0xff] %v3432_v50  ;;  %v6050_v50 = vld [vmem:[%s6464_s5 + $0x84] ss:$28 sps:$4 sm:$0xff]  }
 0x4a8   :  { %v6056_v60 = vld [vmem:[%s6464_s5 + $0x248] ss:$28 sps:$4 sm:$0xff]  }
 0x4e0   :  { %v2357_v58 = vpop.f32.mrf.mxu1 }
 0x4e1   :  { %v2358_v46 = vadd.f32 %v2357_v58, %v2156_v27  ;;  %v6068_v27 = vld [vmem:[%s6464_s5 + $0x88] ss:$28 sps:$4 sm:$0xff]   ;;  %v6080_v58 = vld [vmem:[%s6464_s5 + $0x210] ss:$28 sps:$4 sm:$0xff]  }
 0x4e2   :  { %v2359_v19 = vpop.f32.mrf.mxu1 }
 0x4e3   :  { %v2360_v59 = vadd.f32 %v2359_v19, %v2160_v42  ;;  %v2364_v56 = vmax.f32 %v2358_v46, 0.0  ;;  %v6074_v42 = vld [vmem:[%s6464_s5 + $0x4c] ss:$28 sps:$4 sm:$0xff]  }
 0x4e4   :  { %v2361_v0 = vpop.f32.mrf.mxu1  ;;  %v6086_v46 = vld [vmem:[%s6464_s5 + $0x48] ss:$28 sps:$4 sm:$0xff]   ;;  %v6092_v19 = vld [vmem:[%s6464_s5 + $0x50] ss:$28 sps:$4 sm:$0xff]  }
 0x4e5   :  { %v2365_v15 = vmax.f32 %v2360_v59, 0.0  ;;  %v6001_v52 = vpack.c.bf16 %v2364_v56, %v2364_v56  ;;  %v6098_v59 = vld [vmem:[%s6464_s5 + $0x14] ss:$28 sps:$4 sm:$0xff]  }
 0x4e6   :  { %v2362_v43 = vpop.f32.mrf.mxu1  ;;  %v6104_v56 = vld [vmem:[%s6464_s5 + $0x1d8] ss:$28 sps:$4 sm:$0xff]   ;;  %v6110_v0 = vld [vmem:[%s6464_s5 + $0x10] ss:$28 sps:$4 sm:$0xff]  }
 0x4e7   :  { %v5999_v23 = vpack.c.bf16 %v2365_v15, %v2365_v15  ;;  %6854 = vst [vmem:[#allocation8_spill] sm:$0xff] %v6104_v56  ;;  %6855 = vst [vmem:[#allocation56_spill] sm:$0xff] %v6110_v0  ;;  %v6116_v15 = vld [vmem:[%s6464_s5 + $0x18] ss:$28 sps:$4 sm:$0xff]  }
 0x4e8   :  { %6856 = vst [vmem:[#allocation9_spill] sm:$0xff] %v6116_v15  ;;  %v6122_v43 = vld [vmem:[%s6464_s5 + $0x35c] ss:$28 sps:$4 sm:$0xff]  }
 0x4e9   :  { %2400 = vmatprep.mubr.bf16.mxu0 %v5999_v23  ;;  %2441 = vmatprep.mubr.bf16.mxu1 %v5999_v23  ;;  %6857 = vst [vmem:[#allocation10_spill] sm:$0xff] %v6122_v43 }
 0x4ea   :  { %2401 = vmatmul.mubr.bf16.vlgmr.msra.gmra.mxu0 %v6001_v52  ;;  %2442 = vmatmul.mubr.bf16.vlgmr.msra.gmra.mxu1 %v6001_v52 }
 0x4eb   :  { %2451 = vmatpush1.bf16.msra.mxu0 %v5655_v26  ;;  %3509 = vmatpush3.bf16.msra.mxu1 %v5661_v6 }
 0x4ec   :  { %2482 = vmatprep.mubr.bf16.mxu0 %v5999_v23  ;;  %2523 = vmatprep.mubr.bf16.mxu1 %v5999_v23 }
 0x4ed   :  { %2452 = vmatprep.subr.bf16.mxu0 %v5669_v29  ;;  %3510 = vmatprep.subr.bf16.mxu1 %v5675_v51 }
 0x4ef   :  { %2453 = vmatpush1.bf16.msra.mxu0 %v5681_v30  ;;  %3511 = vmatpush3.bf16.msra.mxu1 %v5687_v22 }
 0x4f0   :  { %2454 = vmatprep.subr.bf16.mxu0 %v5693_v4  ;;  %3512 = vmatprep.subr.bf16.mxu1 %v5699_v63 }
 0x4f3   :  { %2455 = vmatpush1.bf16.msra.mxu0 %v5705_v49  ;;  %3513 = vmatpush3.bf16.msra.mxu1 %v5711_v47 }
 0x4f4   :  { %2456 = vmatprep.subr.bf16.mxu0 %v5717_v32  ;;  %3514 = vmatprep.subr.bf16.mxu1 %v5723_v9 }
 0x4f7   :  { %2457 = vmatpush1.bf16.msra.mxu0 %v5729_v10  ;;  %3515 = vmatpush3.bf16.msra.mxu1 %v5735_v11 }
 0x4f8   :  { %2458 = vmatprep.subr.bf16.mxu0 %v6026_v16  ;;  %3516 = vmatprep.subr.bf16.mxu1 %v6032_v31 }
 0x4fb   :  { %2459 = vmatpush1.bf16.msra.mxu0 %v6038_v28  ;;  %3517 = vmatpush3.bf16.msra.mxu1 %v6044_v54 }
 0x4fc   :  { %2460 = vmatprep.subr.bf16.mxu0 %v6050_v50  ;;  %3518 = vmatprep.subr.bf16.mxu1 %v6056_v60 }
 0x4ff   :  { %2461 = vmatpush1.bf16.msra.mxu0 %v6062_v53  ;;  %3519 = vmatpush3.bf16.msra.mxu1 %v6068_v27 }
 0x500   :  { %2462 = vmatprep.subr.bf16.mxu0 %v6074_v42  ;;  %3520 = vmatprep.subr.bf16.mxu1 %v6080_v58 }
 0x503   :  { %2463 = vmatpush1.bf16.msra.mxu0 %v6086_v46  ;;  %3521 = vmatpush3.bf16.msra.mxu1 %v6092_v19 }
 0x504   :  { %2464 = vmatprep.subr.bf16.mxu0 %v6098_v59  ;;  %3522 = vmatprep.subr.bf16.mxu1 %v6104_v56  ;;  %v4054_v56 = vld [vmem:[%s6464_s5 + $0x18c] ss:$28 sps:$4 sm:$0xff]  }
 0x507   :  { %2465 = vmatpush1.bf16.msra.mxu0 %v6110_v0  ;;  %3523 = vmatpush3.bf16.msra.mxu1 %v6116_v15  ;;  %v6132_v0 = vld [vmem:[%s6464_s5 + $0x358] ss:$28 sps:$4 sm:$0xff]   ;;  %v4056_v15 = vld [vmem:[%s6464_s5 + $0x188] ss:$28 sps:$4 sm:$0xff]  }
 0x508   :  { %2466 = vmatprep.subr.bf16.mxu0 %v6122_v43  ;;  %2816 = vmatprep.subr.bf16.mxu1 %v4054_v56  ;;  %6858 = vst [vmem:[#allocation11_spill] sm:$0xff] %v6132_v0  ;;  %v6141_v43 = vld [vmem:[%s6464_s5 + $0x324] ss:$28 sps:$4 sm:$0xff]   ;;  %v4058_v56 = vld [vmem:[%s6464_s5 + $0x154] ss:$28 sps:$4 sm:$0xff]  }
 0x50a   :  { %2524 = vmatmul.mubr.bf16.vlgmr.msra.gmra.mxu1 %v6001_v52 }
 0x50b   :  { %2467 = vmatpush2.bf16.msra.mxu0 %v6132_v0  ;;  %2817 = vmatpush1.bf16.msra.mxu1 %v4056_v15  ;;  %v6150_v0 = vld [vmem:[%s6464_s5 + $0x320] ss:$28 sps:$4 sm:$0xff]   ;;  %v6157_v15 = vld [vmem:[%s6464_s5 + $0x2ec] ss:$28 sps:$4 sm:$0xff]  }
 0x50c   :  { %2468 = vmatprep.subr.bf16.mxu0 %v6141_v43  ;;  %2818 = vmatprep.subr.bf16.mxu1 %v4058_v56  ;;  %v6164_v56 = vld [vmem:[%s6464_s5 + $0x2e8] ss:$28 sps:$4 sm:$0xff]  }
 0x50f   :  { %2469 = vmatpush2.bf16.msra.mxu0 %v6150_v0  ;;  %2819 = vmatpush1.bf16.msra.mxu1 %v5200_v8  ;;  %v6171_v8 = vld [vmem:[%s6464_s5 + $0x2b4] ss:$28 sps:$4 sm:$0xff]  }
 0x510   :  { %2470 = vmatprep.subr.bf16.mxu0 %v6157_v15  ;;  %2820 = vmatprep.subr.bf16.mxu1 %v5207_v12  ;;  %v6178_v12 = vld [vmem:[%s6464_s5 + $0x2b0] ss:$28 sps:$4 sm:$0xff]  }
 0x513   :  { %2471 = vmatpush2.bf16.msra.mxu0 %v6164_v56  ;;  %2821 = vmatpush1.bf16.msra.mxu1 %v5214_v18  ;;  %v6185_v18 = vld [vmem:[%s6464_s5 + $0x27c] ss:$28 sps:$4 sm:$0xff]  }
 0x514   :  { %2472 = vmatprep.subr.bf16.mxu0 %v6171_v8  ;;  %2822 = vmatprep.subr.bf16.mxu1 %v5221_v44  ;;  %v6192_v44 = vld [vmem:[%s6464_s5 + $0x278] ss:$28 sps:$4 sm:$0xff]  }
 0x517   :  { %2473 = vmatpush2.bf16.msra.mxu0 %v6178_v12  ;;  %2823 = vmatpush1.bf16.msra.mxu1 %v5228_v13  ;;  %v6199_v13 = vld [vmem:[%s6464_s5 + $0x244] ss:$28 sps:$4 sm:$0xff]  }
 0x518   :  { %2474 = vmatprep.subr.bf16.mxu0 %v6185_v18  ;;  %2824 = vmatprep.subr.bf16.mxu1 %v5235_v40  ;;  %v6206_v40 = vld [vmem:[%s6464_s5 + $0x240] ss:$28 sps:$4 sm:$0xff]  }
 0x51b   :  { %2475 = vmatpush2.bf16.msra.mxu0 %v6192_v44  ;;  %2825 = vmatpush1.bf16.msra.mxu1 %v5242_v20  ;;  %v6213_v20 = vld [vmem:[%s6464_s5 + $0x20c] ss:$28 sps:$4 sm:$0xff]  }
 0x51c   :  { %2476 = vmatprep.subr.bf16.mxu0 %v6199_v13  ;;  %2826 = vmatprep.subr.bf16.mxu1 %v5249_v21  ;;  %6859 = vst [vmem:[#allocation12_spill] sm:$0xff] %v6213_v20  ;;  %v6220_v21 = vld [vmem:[%s6464_s5 + $0x208] ss:$28 sps:$4 sm:$0xff]  }
 0x51d   :  { %6860 = vst [vmem:[#allocation13_spill] sm:$0xff] %v6220_v21 }
 0x51f   :  { %2477 = vmatpush2.bf16.msra.mxu0 %v6206_v40  ;;  %2827 = vmatpush1.bf16.msra.mxu1 %v6796_v36  ;;  %v6227_v36 = vld [vmem:[%s6464_s5 + $0x1d4] ss:$28 sps:$4 sm:$0xff]  }
 0x520   :  { %2478 = vmatprep.subr.bf16.mxu0 %v6213_v20  ;;  %2828 = vmatprep.subr.bf16.mxu1 %v5263_v24  ;;  %6861 = vst [vmem:[#allocation14_spill] sm:$0xff] %v6227_v36  ;;  %v3911_v24 = vld [vmem:[%s6462_s3 + $0x374] ss:$8 sps:$4 sm:$0xff]   ;;  %v6237_v20 = vld [vmem:[%s6464_s5 + $0x1d0] ss:$28 sps:$4 sm:$0xff]  }
 0x521   :  { %6862 = vst [vmem:[#allocation15_spill] sm:$0xff] %v6237_v20 }
 0x523   :  { %2479 = vmatpush2.bf16.msra.mxu0 %v6220_v21  ;;  %2829 = vmatpush1.bf16.msra.mxu1 %v6799_v25  ;;  %v3909_v25 = vld [vmem:[%s6462_s3 + $0x370] ss:$8 sps:$4 sm:$0xff]  }
 0x524   :  { %2480 = vmatprep.subr.bf16.mxu0 %v6227_v36  ;;  %2830 = vmatprep.subr.bf16.mxu1 %v6801_v45  ;;  %v3914_v36 = vld [vmem:[%s6462_s3 + $0x364] ss:$8 sps:$4 sm:$0xff]   ;;  %v3912_v45 = vld [vmem:[%s6462_s3 + $0x360] ss:$8 sps:$4 sm:$0xff]  }
 0x527   :  { %2481 = vmatpush2.bf16.msra.mxu0 %v6237_v20  ;;  %2831 = vmatpush1.bf16.msra.mxu1 %v6803_v48  ;;  %v3917_v48 = vld [vmem:[%s6462_s3 + $0x354] ss:$8 sps:$4 sm:$0xff]  }
 0x528   :  { %2771 = vmatprep.subr.bf16.mxu0 %v3911_v24  ;;  %2832 = vmatprep.subr.bf16.mxu1 %v5299_v34  ;;  %v3915_v34 = vld [vmem:[%s6462_s3 + $0x350] ss:$8 sps:$4 sm:$0xff]   ;;  %v6864_v24 = vld [vmem:[#allocation20_spill] sm:$0xff] }
 0x52a   :  { %2483 = vmatmul.mubr.bf16.vlgmr.msra.gmra.mxu0 %v6001_v52 }
 0x52b   :  { %2772 = vmatpush1.bf16.msra.mxu0 %v3909_v25  ;;  %2803 = vmatprep.mubr.bf16.mxu0 %v5999_v23  ;;  %v3920_v23 = vld [vmem:[%s6462_s3 + $0x344] ss:$8 sps:$4 sm:$0xff]   ;;  %v6865_v25 = vld [vmem:[#allocation47_spill] sm:$0xff] }
 0x52c   :  { %2773 = vmatprep.subr.bf16.mxu0 %v3914_v36  ;;  %2833 = vmatpush2.bf16.msra.mxu1 %v6804_v55  ;;  %v3918_v55 = vld [vmem:[%s6462_s3 + $0x340] ss:$8 sps:$4 sm:$0xff]  }
 0x52d   :  { %2834 = vmatprep.subr.bf16.mxu1 %v6805_v14  ;;  %v3923_v14 = vld [vmem:[%s6462_s3 + $0x334] ss:$8 sps:$4 sm:$0xff]  }
 0x52e   :  { %v6863_v36 = vld [vmem:[#allocation19_spill] sm:$0xff] }
 0x52f   :  { %2774 = vmatpush1.bf16.msra.mxu0 %v3912_v45  ;;  %v3935_v45 = vld [vmem:[%s6462_s3 + $0x3f4] ss:$8 sps:$4 sm:$0xff]  }
 0x530   :  { %2775 = vmatprep.subr.bf16.mxu0 %v3917_v48  ;;  %2835 = vmatpush2.bf16.msra.mxu1 %v6806_v61  ;;  %v3921_v61 = vld [vmem:[%s6462_s3 + $0x330] ss:$8 sps:$4 sm:$0xff]  }
 0x531   :  { %2836 = vmatprep.subr.bf16.mxu1 %v6807_v57  ;;  %v3926_v57 = vld [vmem:[%s6462_s3 + $0x324] ss:$8 sps:$4 sm:$0xff]  }
 0x532   :  { %v6866_v48 = vld [vmem:[#allocation49_spill] sm:$0xff] }
 0x533   :  { %2776 = vmatpush1.bf16.msra.mxu0 %v3915_v34  ;;  %v6867_v34 = vld [vmem:[#allocation50_spill] sm:$0xff] }
 0x534   :  { %2777 = vmatprep.subr.bf16.mxu0 %v3920_v23  ;;  %2837 = vmatpush2.bf16.msra.mxu1 %v6808_v2  ;;  %v3924_v2 = vld [vmem:[%s6462_s3 + $0x320] ss:$8 sps:$4 sm:$0xff]   ;;  %v3933_v23 = vld [vmem:[%s6462_s3 + $0x3f0] ss:$8 sps:$4 sm:$0xff]  }
 0x535   :  { %2838 = vmatprep.subr.bf16.mxu1 %v6809_v7  ;;  %v3929_v7 = vld [vmem:[%s6462_s3 + $0x314] ss:$8 sps:$4 sm:$0xff]  }
 0x537   :  { %2778 = vmatpush1.bf16.msra.mxu0 %v3918_v55  ;;  %v3938_v55 = vld [vmem:[%s6462_s3 + $0x3e4] ss:$8 sps:$4 sm:$0xff]  }
 0x538   :  { %2779 = vmatprep.subr.bf16.mxu0 %v3923_v14  ;;  %2839 = vmatpush2.bf16.msra.mxu1 %v6810_v39  ;;  %v3927_v39 = vld [vmem:[%s6462_s3 + $0x310] ss:$8 sps:$4 sm:$0xff]   ;;  %v6868_v14 = vld [vmem:[#allocation51_spill] sm:$0xff] }
 0x539   :  { %2840 = vmatprep.subr.bf16.mxu1 %v6811_v35  ;;  %v3932_v35 = vld [vmem:[%s6462_s3 + $0x304] ss:$8 sps:$4 sm:$0xff]  }
 0x53b   :  { %2780 = vmatpush1.bf16.msra.mxu0 %v3921_v61  ;;  %v6869_v61 = vld [vmem:[#allocation52_spill] sm:$0xff] }
 0x53c   :  { %2781 = vmatprep.subr.bf16.mxu0 %v3926_v57  ;;  %2841 = vmatpush2.bf16.msra.mxu1 %v6812_v33  ;;  %v3930_v33 = vld [vmem:[%s6462_s3 + $0x300] ss:$8 sps:$4 sm:$0xff]  }
 0x53d   :  { %2842 = vmatprep.subr.bf16.mxu1 %v6863_v36  ;;  %v3936_v57 = vld [vmem:[%s6462_s3 + $0x3e0] ss:$8 sps:$4 sm:$0xff]   ;;  %v3944_v36 = vld [vmem:[%s6462_s3 + $0x3c4] ss:$8 sps:$4 sm:$0xff]  }
 0x53f   :  { %2782 = vmatpush1.bf16.msra.mxu0 %v3924_v2  ;;  %v3941_v2 = vld [vmem:[%s6462_s3 + $0x3d4] ss:$8 sps:$4 sm:$0xff]  }
 0x540   :  { %2783 = vmatprep.subr.bf16.mxu0 %v3929_v7  ;;  %2843 = vmatpush2.bf16.msra.mxu1 %v6864_v24  ;;  %v3939_v7 = vld [vmem:[%s6462_s3 + $0x3d0] ss:$8 sps:$4 sm:$0xff]  }
 0x541   :  { %2844 = vmatprep.subr.bf16.mxu1 %v6865_v25  ;;  %v3945_v24 = vld [vmem:[%s6462_s3 + $0x3b0] ss:$8 sps:$4 sm:$0xff]   ;;  %v3950_v25 = vld [vmem:[%s6462_s3 + $0x3a4] ss:$8 sps:$4 sm:$0xff]  }
 0x543   :  { %2784 = vmatpush1.bf16.msra.mxu0 %v3927_v39  ;;  %v3942_v39 = vld [vmem:[%s6462_s3 + $0x3c0] ss:$8 sps:$4 sm:$0xff]  }
 0x544   :  { %2785 = vmatprep.subr.bf16.mxu0 %v3932_v35  ;;  %2845 = vmatpush2.bf16.msra.mxu1 %v6866_v48  ;;  %v3947_v35 = vld [vmem:[%s6462_s3 + $0x3b4] ss:$8 sps:$4 sm:$0xff]   ;;  %v3951_v48 = vld [vmem:[%s6462_s3 + $0x390] ss:$8 sps:$4 sm:$0xff]  }
 0x545   :  { %2846 = vmatprep.subr.bf16.mxu1 %v6867_v34  ;;  %v3956_v34 = vld [vmem:[%s6462_s3 + $0x384] ss:$8 sps:$4 sm:$0xff]  }
 0x547   :  { %2786 = vmatpush1.bf16.msra.mxu0 %v3930_v33  ;;  %v3948_v33 = vld [vmem:[%s6462_s3 + $0x3a0] ss:$8 sps:$4 sm:$0xff]  }
 0x548   :  { %2787 = vmatprep.subr.bf16.mxu0 %v3935_v45  ;;  %2847 = vmatpush2.bf16.msra.mxu1 %v6868_v14  ;;  %v3953_v45 = vld [vmem:[%s6462_s3 + $0x394] ss:$8 sps:$4 sm:$0xff]   ;;  %v6870_v14 = vld [vmem:[#allocation21_spill] sm:$0xff] }
 0x549   :  { %2898 = vmatprep.subr.bf16.mxu1 %v6869_v61  ;;  %v6871_v61 = vld [vmem:[#allocation22_spill] sm:$0xff] }
 0x54b   :  { %2788 = vmatpush2.bf16.msra.mxu0 %v3933_v23  ;;  %v3954_v23 = vld [vmem:[%s6462_s3 + $0x380] ss:$8 sps:$4 sm:$0xff]  }
 0x54c   :  { %2789 = vmatprep.subr.bf16.mxu0 %v3938_v55  ;;  %v4072_v55 = vld [vmem:[%s6464_s5 + $0x194] ss:$28 sps:$4 sm:$0xff]  }
 0x54f   :  { %2790 = vmatpush2.bf16.msra.mxu0 %v3936_v57  ;;  %v6872_v57 = vld [vmem:[#allocation23_spill] sm:$0xff] }
 0x550   :  { %2791 = vmatprep.subr.bf16.mxu0 %v3941_v2  ;;  %v6873_v2 = vld [vmem:[#allocation24_spill] sm:$0xff] }
 0x553   :  { %2792 = vmatpush2.bf16.msra.mxu0 %v3939_v7  ;;  %v6874_v7 = vld [vmem:[#allocation25_spill] sm:$0xff] }
 0x554   :  { %2793 = vmatprep.subr.bf16.mxu0 %v3944_v36  ;;  %v6875_v36 = vld [vmem:[#allocation26_spill] sm:$0xff] }
 0x557   :  { %2794 = vmatpush2.bf16.msra.mxu0 %v3942_v39  ;;  %v6876_v39 = vld [vmem:[#allocation27_spill] sm:$0xff] }
 0x558   :  { %2795 = vmatprep.subr.bf16.mxu0 %v3947_v35  ;;  %v6877_v35 = vld [vmem:[#allocation28_spill] sm:$0xff] }
 0x55b   :  { %2796 = vmatpush2.bf16.msra.mxu0 %v3945_v24  ;;  %v6878_v24 = vld [vmem:[#allocation29_spill] sm:$0xff] }
 0x55c   :  { %2797 = vmatprep.subr.bf16.mxu0 %v3950_v25  ;;  %v6879_v25 = vld [vmem:[#allocation30_spill] sm:$0xff] }
 0x55f   :  { %2798 = vmatpush2.bf16.msra.mxu0 %v3948_v33  ;;  %v6881_v33 = vld [vmem:[#allocation32_spill] sm:$0xff] }
 0x560   :  { %2799 = vmatprep.subr.bf16.mxu0 %v3953_v45  ;;  %v6882_v45 = vld [vmem:[#allocation33_spill] sm:$0xff] }
 0x563   :  { %2800 = vmatpush2.bf16.msra.mxu0 %v3951_v48  ;;  %v6883_v48 = vld [vmem:[#allocation34_spill] sm:$0xff] }
 0x564   :  { %2801 = vmatprep.subr.bf16.mxu0 %v3956_v34  ;;  %v6884_v34 = vld [vmem:[#allocation35_spill] sm:$0xff] }
 0x567   :  { %2802 = vmatpush2.bf16.msra.mxu0 %v3954_v23  ;;  %v6885_v23 = vld [vmem:[#allocation36_spill] sm:$0xff] }
 0x568   :  { %2857 = vmatprep.subr.bf16.mxu0 %v4072_v55  ;;  %v6886_v55 = vld [vmem:[#allocation37_spill] sm:$0xff] }
 0x56a   :  { %2804 = vmatmul.mubr.bf16.vlgmr.msra.gmra.mxu0 %v6001_v52  ;;  %v6880_v52 = vld [vmem:[#allocation31_spill] sm:$0xff] }
 0x56b   :  { %2858 = vmatpush1.bf16.msra.mxu0 %v6870_v14  ;;  %v6887_v14 = vld [vmem:[#allocation38_spill] sm:$0xff] }
 0x56c   :  { %2859 = vmatprep.subr.bf16.mxu0 %v6871_v61  ;;  %v6888_v61 = vld [vmem:[#allocation39_spill] sm:$0xff] }
 0x56f   :  { %2860 = vmatpush1.bf16.msra.mxu0 %v6872_v57  ;;  %v6889_v57 = vld [vmem:[#allocation40_spill] sm:$0xff] }
 0x570   :  { %2861 = vmatprep.subr.bf16.mxu0 %v6873_v2  ;;  %v6890_v2 = vld [vmem:[#allocation41_spill] sm:$0xff] }
 0x573   :  { %2862 = vmatpush1.bf16.msra.mxu0 %v6874_v7  ;;  %v6891_v7 = vld [vmem:[#allocation42_spill] sm:$0xff] }
 0x574   :  { %2863 = vmatprep.subr.bf16.mxu0 %v6875_v36  ;;  %v6892_v36 = vld [vmem:[#allocation43_spill] sm:$0xff] }
 0x577   :  { %2864 = vmatpush1.bf16.msra.mxu0 %v6876_v39  ;;  %v6893_v39 = vld [vmem:[#allocation46_spill] sm:$0xff] }
 0x578   :  { %2865 = vmatprep.subr.bf16.mxu0 %v6877_v35  ;;  %v6894_v35 = vld [vmem:[#allocation44_spill] sm:$0xff] }
 0x57b   :  { %2866 = vmatpush1.bf16.msra.mxu0 %v6878_v24  ;;  %v6895_v24 = vld [vmem:[#allocation48_spill] sm:$0xff] }
 0x57c   :  { %2867 = vmatprep.subr.bf16.mxu0 %v6879_v25  ;;  %v6896_v25 = vld [vmem:[#allocation45_spill] sm:$0xff] }
 0x57f   :  { %2868 = vmatpush1.bf16.msra.mxu0 %v6880_v52  ;;  %v6897_v52 = vld [vmem:[#allocation6_spill] sm:$0xff] }
 0x580   :  { %2869 = vmatprep.subr.bf16.mxu0 %v6881_v33  ;;  %v6898_v33 = vld [vmem:[#allocation53_spill] sm:$0xff] }
 0x583   :  { %2870 = vmatpush1.bf16.msra.mxu0 %v6882_v45  ;;  %v6899_v45 = vld [vmem:[#allocation54_spill] sm:$0xff] }
 0x584   :  { %2871 = vmatprep.subr.bf16.mxu0 %v6883_v48  ;;  %v6900_v48 = vld [vmem:[#allocation7_spill] sm:$0xff] }
 0x587   :  { %2872 = vmatpush1.bf16.msra.mxu0 %v6884_v34  ;;  %v6901_v34 = vld [vmem:[#allocation55_spill] sm:$0xff] }
 0x588   :  { %2873 = vmatprep.subr.bf16.mxu0 %v6885_v23 }
 0x58b   :  { %2874 = vmatpush2.bf16.msra.mxu0 %v6886_v55 }
 0x58c   :  { %2875 = vmatprep.subr.bf16.mxu0 %v6887_v14 }
 0x58f   :  { %2876 = vmatpush2.bf16.msra.mxu0 %v6888_v61 }
 0x590   :  { %2877 = vmatprep.subr.bf16.mxu0 %v6889_v57  ;;  %v6902_v57 = vld [vmem:[#allocation5_spill] sm:$0xff] }
 0x593   :  { %2878 = vmatpush2.bf16.msra.mxu0 %v6890_v2 }
 0x594   :  { %2879 = vmatprep.subr.bf16.mxu0 %v6891_v7 }
 0x597   :  { %2880 = vmatpush2.bf16.msra.mxu0 %v6892_v36 }
 0x598   :  { %2881 = vmatprep.subr.bf16.mxu0 %v6893_v39 }
 0x59b   :  { %2882 = vmatpush2.bf16.msra.mxu0 %v6894_v35 }
 0x59c   :  { %2883 = vmatprep.subr.bf16.mxu0 %v6895_v24 }
 0x59f   :  { %2884 = vmatpush2.bf16.msra.mxu0 %v6896_v25 }
 0x5a0   :  { %2885 = vmatprep.subr.bf16.mxu0 %v6897_v52 }
 0x5a3   :  { %2886 = vmatpush2.bf16.msra.mxu0 %v6898_v33 }
 0x5a4   :  { %2887 = vmatprep.subr.bf16.mxu0 %v6899_v45 }
 0x5a7   :  { %2888 = vmatpush2.bf16.msra.mxu0 %v6900_v48 }
 0x5a8   :  { %3530 = vmatprep.subr.bf16.mxu0 %v6901_v34 }
 0x5aa   :  { %v2402_v23 = vpop.f32.mrf.mxu0  ;;  %v2443_v55 = vpop.f32.mrf.mxu1 }
 0x5ab   :  { %v2403_v2 = vadd.f32 %v2402_v23, %v6902_v57  ;;  %v2444_v7 = vadd.f32 %v2443_v55, %v5120_v1 }
 0x5ac   :  { %v2404_v14 = vpop.f32.mrf.mxu0  ;;  %v2445_v61 = vpop.f32.mrf.mxu1 }
 0x5ad   :  { %v2405_v36 = vadd.f32 %v2404_v14, %v5123_v3  ;;  %v2446_v39 = vadd.f32 %v2445_v61, %v5125_v5 }
 0x5ae   :  { %v2406_v35 = vpop.f32.mrf.mxu0  ;;  %v2447_v24 = vpop.f32.mrf.mxu1 }
 0x5af   :  { %v3434_v25 = vpack.c.bf16 %v2405_v36, %v2403_v2  ;;  %v3435_v52 = vpack.c.bf16 %v2446_v39, %v2444_v7 }
 0x5b0   :  { %v2407_v33 = vpop.f32.mrf.mxu0  ;;  %v2448_v45 = vpop.f32.mrf.mxu1 }
 0x5b1   :  { %2561 = vst [vmem:[#allocation2 + $0x54] sm:$0xff] %v3434_v25  ;;  %2562 = vst [vmem:[#allocation2 + $0x5c] sm:$0xff] %v3435_v52 }
 0x5ca   :  { %v3524_v48 = vpop.f32.mrf.mxu1 }
 0x5cc   :  { %v3525_v34 = vpop.f32.mrf.mxu1 }
 0x5cd   :  { %v3526_v20 = vadd.f32 %v3525_v34, %v3524_v48 }
 0x5ce   :  { %v3527_v21 = vpop.f32.mrf.mxu1 }
 0x5cf   :  { %v2526_v23 = vadd.f32 %v3526_v20, %v5132_v62  ;;  %v3385_v21 = vld [vmem:[%s6463_s4 + $0x6] sm:$0x3]  ;;  %s4095_s4 = smov [#allocation2]  }
 0x5d0   :  { %v3528_v57 = vpop.f32.mrf.mxu1  ;;  %v2604_v20 = vrot.slane %v3385_v21, %v6719_v17  ;;  %v6904_v17 = vld [vmem:[#allocation56_spill] sm:$0xff]  ;;  %s3018_s29 = sshll.u32 %s4095_s4, 4  ;;  %s3019_s29 = int_to_ptr.vmem [resolvable:$true] %s3018_s29 }
 0x5d1   :  { %v3437_v55 = vpack.c.bf16 %v2526_v23, %v2526_v23  ;;  %v2608_v57 = vrot.slane %v3385_v21, %v4636_v41  ;;  %v6903_v41 = vld [vmem:[#allocation8_spill] sm:$0xff]  ;;  %s4073_s30 = scalar_lea.vmem %s3019_s29, 2240  ;;  %p4078_p1 = scmp.lt.s32.totalorder %s3019_s29, %s3019_s29 }
 0x5d2   :  { %p4074_p0 = scmp.ne.s32.totalorder %s3019_s29, %s4073_s30  ;;  %p4079_p2 = scmp.lt.s32.totalorder %s4073_s30, %s4073_s30 }
 0x5d3   :  { %2564 = vst.msk [vmem:[#allocation2 + $0x6c] sm:$0xf] %vm1221_vm0, %v3437_v55 }
 0x5d4   :  { %p4080_p3 = por %p4079_p2, %p4078_p1 }
 0x5d6   :  { %p4081_p4 = pnand %p4080_p3, %p4074_p0 }
 0x5ea   :  { %v2484_v14 = vpop.f32.mrf.mxu0 }
 0x5eb   :  { %v2485_v35 = vadd.f32 %v2484_v14, %v5138_v37 }
 0x5ec   :  { %v2486_v61 = vpop.f32.mrf.mxu0 }
 0x5ed   :  { %v2487_v2 = vadd.f32 %v2486_v61, %v5140_v38 }
 0x5ee   :  { %v2488_v7 = vpop.f32.mrf.mxu0 }
 0x5ef   :  { %v3436_v36 = vpack.c.bf16 %v2487_v2, %v2485_v35 }
 0x5f0   :  { %v2489_v39 = vpop.f32.mrf.mxu0 }
 0x5f1   :  { %2563 = vst [vmem:[#allocation2 + $0x64] sm:$0xff] %v3436_v36 }
 0x62a   :  { %v2805_v24 = vpop.f32.mrf.mxu0 }
 0x62b   :  { %v2806_v25 = vadd.f32 %v2805_v24, %v2604_v20 }
 0x62c   :  { %v2807_v52 = vpop.f32.mrf.mxu0 }
 0x62d   :  { %v2808_v33 = vadd.f32 %v2807_v52, %v2608_v57  ;;  %v2812_v45 = vmax.f32 %v2806_v25, 0.0 }
 0x62e   :  { %v2809_v48 = vpop.f32.mrf.mxu0 }
 0x62f   :  { %v2813_v34 = vmax.f32 %v2808_v33, 0.0  ;;  %v2814_v14 = vpack.c.bf16 %v2812_v45, %v2812_v45 }
 0x630   :  { %v2810_v23 = vpop.f32.mrf.mxu0 }
 0x631   :  { %v2815_v55 = vpack.c.bf16 %v2813_v34, %v2813_v34 }
 0x633   :  { %2848 = vmatprep.mubr.bf16.mxu1 %v2815_v55  ;;  %2889 = vmatprep.mubr.bf16.mxu0 %v2815_v55 }
 0x634   :  { %2849 = vmatmul.mubr.bf16.vlgmr.msra.gmra.mxu1 %v2814_v14  ;;  %2890 = vmatmul.mubr.bf16.vlgmr.msra.gmra.mxu0 %v2814_v14 }
 0x635   :  { %2899 = vmatpush1.bf16.msra.mxu1 %v5655_v26  ;;  %3531 = vmatpush3.bf16.msra.mxu0 %v5661_v6  ;;  %v6905_v26 = vld [vmem:[#allocation9_spill] sm:$0xff]  ;;  %v6906_v6 = vld [vmem:[#allocation10_spill] sm:$0xff] }
 0x636   :  { %2930 = vmatprep.mubr.bf16.mxu1 %v2815_v55  ;;  %2971 = vmatprep.mubr.bf16.mxu0 %v2815_v55 }
 0x637   :  { %2900 = vmatprep.subr.bf16.mxu1 %v5669_v29  ;;  %3532 = vmatprep.subr.bf16.mxu0 %v5675_v51  ;;  %v6907_v29 = vld [vmem:[#allocation11_spill] sm:$0xff]  ;;  %v6908_v51 = vld [vmem:[#allocation12_spill] sm:$0xff] }
 0x639   :  { %2901 = vmatpush1.bf16.msra.mxu1 %v5681_v30  ;;  %3533 = vmatpush3.bf16.msra.mxu0 %v5687_v22  ;;  %v6909_v30 = vld [vmem:[#allocation13_spill] sm:$0xff]  ;;  %v6910_v22 = vld [vmem:[#allocation14_spill] sm:$0xff] }
 0x63a   :  { %2902 = vmatprep.subr.bf16.mxu1 %v5693_v4  ;;  %3534 = vmatprep.subr.bf16.mxu0 %v5699_v63  ;;  %v6911_v4 = vld [vmem:[#allocation15_spill] sm:$0xff] }
 0x63d   :  { %2903 = vmatpush1.bf16.msra.mxu1 %v5705_v49  ;;  %3535 = vmatpush3.bf16.msra.mxu0 %v5711_v47 }
 0x63e   :  { %2904 = vmatprep.subr.bf16.mxu1 %v5717_v32  ;;  %3536 = vmatprep.subr.bf16.mxu0 %v5723_v9  ;;  %v6912_v9 = vld [vmem:[#allocation5_spill] sm:$0xff] }
 0x641   :  { %2905 = vmatpush1.bf16.msra.mxu1 %v5729_v10  ;;  %3537 = vmatpush3.bf16.msra.mxu0 %v5735_v11 }
 0x642   :  { %2906 = vmatprep.subr.bf16.mxu1 %v6026_v16  ;;  %3538 = vmatprep.subr.bf16.mxu0 %v6032_v31 }
 0x645   :  { %2907 = vmatpush1.bf16.msra.mxu1 %v6038_v28  ;;  %3539 = vmatpush3.bf16.msra.mxu0 %v6044_v54 }
 0x646   :  { %2908 = vmatprep.subr.bf16.mxu1 %v6050_v50  ;;  %3540 = vmatprep.subr.bf16.mxu0 %v6056_v60 }
 0x649   :  { %2909 = vmatpush1.bf16.msra.mxu1 %v6062_v53  ;;  %3541 = vmatpush3.bf16.msra.mxu0 %v6068_v27 }
 0x64a   :  { %2910 = vmatprep.subr.bf16.mxu1 %v6074_v42  ;;  %3542 = vmatprep.subr.bf16.mxu0 %v6080_v58 }
 0x64d   :  { %2911 = vmatpush1.bf16.msra.mxu1 %v6086_v46  ;;  %3543 = vmatpush3.bf16.msra.mxu0 %v6092_v19 }
 0x64e   :  { %2912 = vmatprep.subr.bf16.mxu1 %v6098_v59  ;;  %3544 = vmatprep.subr.bf16.mxu0 %v6903_v41 }
 0x651   :  { %2913 = vmatpush1.bf16.msra.mxu1 %v6904_v17  ;;  %3545 = vmatpush3.bf16.msra.mxu0 %v6905_v26 }
 0x652   :  { %2914 = vmatprep.subr.bf16.mxu1 %v6906_v6 }
 0x654   :  { %2972 = vmatmul.mubr.bf16.vlgmr.msra.gmra.mxu0 %v2814_v14 }
 0x655   :  { %2915 = vmatpush2.bf16.msra.mxu1 %v6907_v29 }
 0x656   :  { %2916 = vmatprep.subr.bf16.mxu1 %v6141_v43 }
 0x659   :  { %2917 = vmatpush2.bf16.msra.mxu1 %v6150_v0 }
 0x65a   :  { %2918 = vmatprep.subr.bf16.mxu1 %v6157_v15 }
 0x65d   :  { %2919 = vmatpush2.bf16.msra.mxu1 %v6164_v56 }
 0x65e   :  { %2920 = vmatprep.subr.bf16.mxu1 %v6171_v8 }
 0x661   :  { %2921 = vmatpush2.bf16.msra.mxu1 %v6178_v12 }
 0x662   :  { %2922 = vmatprep.subr.bf16.mxu1 %v6185_v18 }
 0x665   :  { %2923 = vmatpush2.bf16.msra.mxu1 %v6192_v44 }
 0x666   :  { %2924 = vmatprep.subr.bf16.mxu1 %v6199_v13 }
 0x669   :  { %2925 = vmatpush2.bf16.msra.mxu1 %v6206_v40 }
 0x66a   :  { %2926 = vmatprep.subr.bf16.mxu1 %v6908_v51 }
 0x66d   :  { %2927 = vmatpush2.bf16.msra.mxu1 %v6909_v30 }
 0x66e   :  { %2928 = vmatprep.subr.bf16.mxu1 %v6910_v22 }
 0x671   :  { %2929 = vmatpush2.bf16.msra.mxu1 %v6911_v4 }
 0x674   :  { %2931 = vmatmul.mubr.bf16.vlgmr.msra.gmra.mxu1 %v2814_v14 }
 0x6f4   :  { %v2850_v63 = vpop.f32.mrf.mxu1  ;;  %v2891_v49 = vpop.f32.mrf.mxu0 }
 0x6f5   :  { %v2851_v10 = vadd.f32 %v2850_v63, %v6912_v9  ;;  %v2892_v11 = vadd.f32 %v2891_v49, %v5120_v1 }
 0x6f6   :  { %v2852_v47 = vpop.f32.mrf.mxu1  ;;  %v2893_v32 = vpop.f32.mrf.mxu0 }
 0x6f7   :  { %v2853_v16 = vadd.f32 %v2852_v47, %v5123_v3  ;;  %v2894_v31 = vadd.f32 %v2893_v32, %v5125_v5 }
 0x6f8   :  { %v2854_v28 = vpop.f32.mrf.mxu1  ;;  %v2895_v54 = vpop.f32.mrf.mxu0 }
 0x6f9   :  { %v3438_v50 = vpack.c.bf16 %v2853_v16, %v2851_v10  ;;  %v3439_v60 = vpack.c.bf16 %v2894_v31, %v2892_v11 }
 0x6fa   :  { %v2855_v53 = vpop.f32.mrf.mxu1  ;;  %v2896_v27 = vpop.f32.mrf.mxu0 }
 0x6fb   :  { %3009 = vst [vmem:[#allocation2 + $0x70] sm:$0xff] %v3438_v50  ;;  %3010 = vst [vmem:[#allocation2 + $0x78] sm:$0xff] %v3439_v60 }
 0x714   :  { %v3546_v42 = vpop.f32.mrf.mxu0 }
 0x716   :  { %v3547_v58 = vpop.f32.mrf.mxu0 }
 0x717   :  { %v3548_v46 = vadd.f32 %v3547_v58, %v3546_v42 }
 0x718   :  { %v3549_v19 = vpop.f32.mrf.mxu0 }
 0x719   :  { %v2974_v59 = vadd.f32 %v3548_v46, %v5132_v62 }
 0x71a   :  { %v3550_v0 = vpop.f32.mrf.mxu0 }
 0x71b   :  { %v3441_v1 = vpack.c.bf16 %v2974_v59, %v2974_v59 }
 0x71d   :  { %3012 = vst.msk [vmem:[#allocation2 + $0x88] sm:$0xf] %vm1221_vm0, %v3441_v1 }
 0x734   :  { %v2932_v3 = vpop.f32.mrf.mxu1 }
 0x735   :  { %v2933_v43 = vadd.f32 %v2932_v3, %v5138_v37 }
 0x736   :  { %v2934_v5 = vpop.f32.mrf.mxu1 }
 0x737   :  { %v2935_v15 = vadd.f32 %v2934_v5, %v5140_v38 }
 0x738   :  { %v2936_v56 = vpop.f32.mrf.mxu1 }
 0x739   :  { %v3440_v8 = vpack.c.bf16 %v2935_v15, %v2933_v43 }
 0x73a   :  { %v2937_v12 = vpop.f32.mrf.mxu1 }
 0x73b   :  { %3011 = vst [vmem:[#allocation2 + $0x80] sm:$0xff] %v3440_v8 }
 0x73c   :  { %4084 = shalt.err (!%p4081_p4)
}
 0x73d   :  { %s4096_s2 = smov 448   ;;  %s4097_s8 = smov 28  }
 0x73e   :  { %3024 = dma.vmem_to_hbm [thread:$0]  %s3019_s29, 2240, %s6466_s7, [#allocation3], %s4096_s2, %s4096_s2, %s4097_s8  }
 0x73f   :  { %4093 = dma.done.wait [#allocation3], 2240  }
 0x740   :  { %4094 = vsyncadd [#allocation3], 4294965056 }
 0x741   :  { %3028 = vsyncpa [#allocation3], 1 }

</bundles_post_ra>
